<compile_context>
chip_gen: v7x
topology: tpu7x:2x2x1
jax: 0.10.0
libtpu: 0.0.40
codegen_flags: <defaults>
</compile_context>

<pallas_src>
import numpy as np
import jax
import jax.numpy as jnp
from jax import lax
from jax.experimental import pallas as pl
from jax.experimental.pallas import tpu as pltpu


# ----------------------------------------------------------------------------
# Pallas wrapper: folds BN, packs params/masks, builds the lane-dense kernel.
# ----------------------------------------------------------------------------
def residual_layer_pallas(x, p, *, nb_max=8, block_bytes_budget=4 << 20):
  """ResidualLayer forward (eval mode).  x: (N, C, H, W) f32, p: torch params."""
  N, C, H, W = x.shape
  HW = H * W
  HWp = max(128, ((HW + 127) // 128) * 128)   # lane-dense spatial axis
  eps = 1e-5
  f32 = jnp.float32

  # ---------------- host-side parameter folding (eval-mode BN) ---------------
  def fold(gamma, beta, rm, rv):
    s = gamma / jnp.sqrt(rv + eps)
    return s, beta - rm * s

  s1, b1 = fold(*p['bn1'])
  s2, b2 = fold(*p['bn2'])
  s3, b3 = fold(*p['bn3'])

  w1 = p['w1'][:, 0, 0, 0]                      # (2C,)
  w2 = p['w2'][:, 0].reshape(2 * C, 9)          # (2C, 9)
  w3 = p['w3'][:, :, 0, 0]                      # (C, 2)

  # A half <-> torch even channels (2c), B half <-> torch odd channels (2c+1).
  a1A, b1A = w1[0::2] * s1[0::2], b1[0::2]
  a1B, b1B = w1[1::2] * s1[1::2], b1[1::2]
  b2A, b2B = b2[0::2], b2[1::2]
  wdwA = w2[0::2] * s2[0::2][:, None]           # (C, 9), BN2 scale folded in
  wdwB = w2[1::2] * s2[1::2][:, None]
  w3A, w3B = w3[:, 0] * s3, w3[:, 1] * s3
  caw1t = p['caw1'][:, :, 0, 0].T               # (C, Cr) = torch_w1.T
  caw2m = p['caw2'][:, :, 0, 0]                 # (C, Cr)
  Cr = caw1t.shape[1]
  saw = p['saw'][0].reshape(2, 49)              # (2, 49): row0=avg, row1=max

  # ---------------- samples per grid step (v7x: keep grid >= 2) --------------
  per_sample = C * HWp * 4
  NB = 1
  for d in range(1, min(nb_max, N) + 1):
    if d * per_sample > max(per_sample, block_bytes_budget):
      break
    g_steps = -(-N // d)
    if N >= 2 and g_steps < 2:                  # keep both v7x TensorCores busy
      break
    NB = d
  G = -(-N // NB)
  N_pad = G * NB
  R = NB * C                                    # rows per half-slab

  # ---------------- packed per-channel parameter table (2R, 14+Cr) -----------
  def t1(v):                                    # (C,)   -> (R,)
    return jnp.tile(v, NB)

  def t2(v):                                    # (C, k) -> (R, k)
    return jnp.tile(v, (NB, 1))

  cpar = jnp.concatenate([
      jnp.concatenate([t1(a1A), t1(a1B)])[:, None],      # col 0: conv1 scale
      jnp.concatenate([t1(b1A), t1(b1B)])[:, None],      # col 1: conv1 bias
      jnp.concatenate([t1(b2A), t1(b2B)])[:, None],      # col 2: conv2 bias
      jnp.concatenate([t1(w3A), t1(w3B)])[:, None],      # col 3: conv3 scale
      jnp.concatenate([t1(b3), t1(b3)])[:, None],        # col 4: conv3 bias
      jnp.concatenate([t2(wdwA), t2(wdwB)], axis=0),     # cols 5..13: dw taps
      jnp.concatenate([t2(caw1t), t2(caw2m)], axis=0),   # cols 14..: CA MLP
  ], axis=1).astype(f32)                                  # (2R, 14+Cr)

  sapar = jnp.tile(saw, (NB, 1)).astype(f32)              # (2*NB, 49), rows
                                                          # interleaved avg,max

  # ---------------- host-built combined border masks -------------------------
  lidx = np.arange(HWp)
  hh, ww = lidx // W, lidx % W
  lval = lidx < HW
  TAPROW = {}
  mrows = []
  r = 0
  for dy in range(-3, 4):
    for dx in range(-3, 4):
      if dy == 0 and dx == 0:
        continue
      ok = ((hh + dy >= 0) & (hh + dy < H) &
            (ww + dx >= 0) & (ww + dx < W) & lval)
      mrows.append(ok.astype(np.float32))
      TAPROW[(dy, dx)] = r
      r += 1
  mrows.append(lval.astype(np.float32))                   # row 48: lane-valid
  masks = jnp.asarray(np.stack(mrows, axis=0))             # (49, HWp)

  # ---------------- input packing: (N_pad, C, HWp) ----------------------------
  x2 = x.reshape(N, C, HW).astype(f32)
  if HWp != HW:
    x2 = jnp.pad(x2, ((0, 0), (0, 0), (0, HWp - HW)))
  if N_pad != N:
    x2 = jnp.pad(x2, ((0, N_pad - N), (0, 0), (0, 0)))

  neg_big = np.float32(-3.0e38)

  # ---------------- kernel ----------------------------------------------------
  def kernel(x_ref, cpar_ref, sapar_ref, masks_ref, o_ref):

    def leaky(v):                       # LeakyReLU(0.1)
      return jnp.maximum(v, 0.1 * v)

    def sigmoid(v):                     # stable; tanh rides the EUP slot
      return 0.5 * (jnp.tanh(0.5 * v) + 1.0)

    def lane_roll(v, off):
      # out[..., l] = v[..., l + off]; wrapped lanes are masked by the caller.
      s = (-off) % HWp
      if s == 0:
        return v
      return pltpu.roll(v, s, axis=1)

    def mrow(dy, dx):
      rr = TAPROW[(dy, dx)]
      return masks_ref[rr:rr + 1, :]    # (1, HWp) combined border mask

    xv = x_ref[...].reshape(R, HWp)                         # (R, HWp)

    # conv1: grouped 1x1 (groups=C, 1->2) + folded BN1 + LeakyReLU.
    # Producing the A/B-stacked (2R, HWp) slab directly.
    x_dup = jnp.concatenate([xv, xv], axis=0)               # (2R, HWp)
    y1 = leaky(x_dup * cpar_ref[:, 0:1] + cpar_ref[:, 1:2])

    # conv2: depthwise 3x3, pad 1 (groups=2C), fused A/B halves.
    acc = cpar_ref[:, 9:10] * y1                            # centre tap
    for ki in range(3):
      for kj in range(3):
        dy, dx = ki - 1, kj - 1
        if dy == 0 and dx == 0:
          continue
        t = ki * 3 + kj
        acc = acc + cpar_ref[:, 5 + t:6 + t] * (
            mrow(dy, dx) * lane_roll(y1, dy * W + dx))
    y2 = leaky(acc + cpar_ref[:, 2:3])

    # ShuffleBlock(groups=2C): channels-per-group == 1 -> identity.

    # conv3: grouped 1x1 (groups=C, 2->1) + folded BN3 + LeakyReLU.
    out = leaky(cpar_ref[:R, 3:4] * y2[:R] +
                cpar_ref[R:, 3:4] * y2[R:] + cpar_ref[:R, 4:5])  # (R, HWp)

    out3 = out.reshape(NB, C, HWp)

    # ---- ChannelAttention -------------------------------------------------
    if HWp == HW:
      p_sum = jnp.sum(out3, axis=2, keepdims=True)          # (NB, C, 1)
      p_max = jnp.max(out3, axis=2, keepdims=True)
    else:
      lm = masks_ref[48:49, :][None]                        # (1, 1, HWp)
      p_sum = jnp.sum(out3 * lm, axis=2, keepdims=True)
      p_max = jnp.max(jnp.where(lm > 0.5, out3, neg_big), axis=2, keepdims=True)
    p_avg = p_sum * (1.0 / HW)
    caw1t3 = cpar_ref[0:C, 14:14 + Cr][None]                # (1, C, Cr)
    caw2m3 = cpar_ref[R:R + C, 14:14 + Cr][None]            # (1, C, Cr)
    h_avg = jnp.maximum(jnp.sum(caw1t3 * p_avg, axis=1, keepdims=True), 0.0)
    h_max = jnp.maximum(jnp.sum(caw1t3 * p_max, axis=1, keepdims=True), 0.0)
    att = jnp.sum(caw2m3 * (h_avg + h_max), axis=2, keepdims=True)  # (NB,C,1)
    out3 = out3 * sigmoid(att)

    # ---- SpatialAttention (7x7 over [mean_c, max_c], pad 3) -----------------
    s_avg = jnp.mean(out3, axis=1, keepdims=True)           # (NB, 1, HWp)
    s_max = jnp.max(out3, axis=1, keepdims=True)
    s_pack = jnp.concatenate([s_avg, s_max], axis=1).reshape(2 * NB, HWp)
    sacc = sapar_ref[:, 24:25] * s_pack                     # centre tap
    for ki in range(7):
      for kj in range(7):
        dy, dx = ki - 3, kj - 3
        if dy == 0 and dx == 0:
          continue
        t = ki * 7 + kj
        sacc = sacc + sapar_ref[:, t:t + 1] * (
            mrow(dy, dx) * lane_roll(s_pack, dy * W + dx))
    sa = jnp.sum(sacc.reshape(NB, 2, HWp), axis=1, keepdims=True)  # (NB,1,HWp)
    out3 = out3 * sigmoid(sa)

    # residual add
    o_ref[...] = x_ref[...] + out3

  out_p = pl.pallas_call(
      kernel,
      out_shape=jax.ShapeDtypeStruct((N_pad, C, HWp), f32),
      grid_spec=pltpu.PrefetchScalarGridSpec(
          num_scalar_prefetch=0,
          grid=(G,),
          in_specs=[
              pl.BlockSpec((NB, C, HWp), lambda g: (g, 0, 0)),
              pl.BlockSpec(cpar.shape, lambda g: (0, 0)),
              pl.BlockSpec(sapar.shape, lambda g: (0, 0)),
              pl.BlockSpec(masks.shape, lambda g: (0, 0)),
          ],
          out_specs=pl.BlockSpec((NB, C, HWp), lambda g: (g, 0, 0))),
      compiler_params=pltpu.CompilerParams(
          # samples are independent -> shard batch axis across cores (v7x).
          dimension_semantics=("parallel",)),
  )(x2, cpar, sapar, masks)

  return out_p[:N, :, :HW].reshape(N, C, H, W)


# ----------------------------------------------------------------------------
# Pure-JAX reference (mirrors the PyTorch module in eval mode)
# ----------------------------------------------------------------------------
def residual_layer_ref(x, p, C):
  dn = ('NCHW', 'OIHW', 'NCHW')
  eps = 1e-5
  P = lax.Precision.HIGHEST

  def bn(v, g, b, rm, rv):
    return ((v - rm[None, :, None, None]) /
            jnp.sqrt(rv[None, :, None, None] + eps) *
            g[None, :, None, None] + b[None, :, None, None])

  def leaky(v):
    return jnp.maximum(v, 0.1 * v)

  h = lax.conv_general_dilated(x, p['w1'], (1, 1), 'VALID',
                               feature_group_count=C, dimension_numbers=dn,
                               precision=P)
  h = leaky(bn(h, *p['bn1']))
  h = lax.conv_general_dilated(h, p['w2'], (1, 1), [(1, 1), (1, 1)],
                               feature_group_count=2 * C, dimension_numbers=dn,
                               precision=P)
  h = leaky(bn(h, *p['bn2']))
  # ShuffleBlock(groups=2C)
  Nb, Cc, Hh, Ww = h.shape
  g = 2 * C
  h = h.reshape(Nb, g, Cc // g, Hh, Ww).transpose(0, 2, 1, 3, 4).reshape(Nb, Cc, Hh, Ww)
  h = lax.conv_general_dilated(h, p['w3'], (1, 1), 'VALID',
                               feature_group_count=C, dimension_numbers=dn,
                               precision=P)
  out = leaky(bn(h, *p['bn3']))

  # ChannelAttention
  avg = jnp.mean(out, axis=(2, 3), keepdims=True)
  mx = jnp.max(out, axis=(2, 3), keepdims=True)

  def mlp(v):
    v = lax.conv_general_dilated(v, p['caw1'], (1, 1), 'VALID',
                                 dimension_numbers=dn, precision=P)
    v = jnp.maximum(v, 0.0)
    return lax.conv_general_dilated(v, p['caw2'], (1, 1), 'VALID',
                                    dimension_numbers=dn, precision=P)

  ca = jax.nn.sigmoid(mlp(avg) + mlp(mx))
  out = ca * out

  # SpatialAttention
  s_avg = jnp.mean(out, axis=1, keepdims=True)
  s_max = jnp.max(out, axis=1, keepdims=True)
  s = jnp.concatenate([s_avg, s_max], axis=1)
  s = lax.conv_general_dilated(s, p['saw'], (1, 1), [(3, 3), (3, 3)],
                               dimension_numbers=dn, precision=P)
  out = jax.nn.sigmoid(s) * out
  return x + out


# ----------------------------------------------------------------------------
if __name__ == "__main__":
  N, C, H, W = 2, 16, 16, 16        # ratio=16 -> hidden channels C//16 = 1
  Cr = C // 16
  C2 = 2 * C

  key = jax.random.PRNGKey(0)
  ks = jax.random.split(key, 10)

  def bn_params(k, ch):
    k1, k2, k3, k4 = jax.random.split(k, 4)
    gamma = 1.0 + 0.1 * jax.random.normal(k1, (ch,), jnp.float32)
    beta = 0.1 * jax.random.normal(k2, (ch,), jnp.float32)
    rm = 0.1 * jax.random.normal(k3, (ch,), jnp.float32)
    rv = 1.0 + 0.1 * jnp.abs(jax.random.normal(k4, (ch,), jnp.float32))
    return gamma, beta, rm, rv

  params = {
      'w1': jax.random.normal(ks[0], (C2, 1, 1, 1), jnp.float32) * 0.5,
      'w2': jax.random.normal(ks[1], (C2, 1, 3, 3), jnp.float32) * 0.2,
      'w3': jax.random.normal(ks[2], (C, 2, 1, 1), jnp.float32) * 0.5,
      'bn1': bn_params(ks[3], C2),
      'bn2': bn_params(ks[4], C2),
      'bn3': bn_params(ks[5], C),
      'caw1': jax.random.normal(ks[6], (Cr, C, 1, 1), jnp.float32) * 0.3,
      'caw2': jax.random.normal(ks[7], (C, Cr, 1, 1), jnp.float32) * 0.3,
      'saw': jax.random.normal(ks[8], (1, 2, 7, 7), jnp.float32) * 0.1,
  }
  x = jax.random.normal(ks[9], (N, C, H, W), jnp.float32)

  y = jax.block_until_ready(residual_layer_pallas(x, params))
  y_ref = jax.block_until_ready(residual_layer_ref(x, params, C))

  np.testing.assert_allclose(np.asarray(y), np.asarray(y_ref),
                             rtol=1e-4, atol=1e-4)
  print("KERNEL_OK")
</pallas_src>

<mosaic_0001>
module attributes {stable_mosaic.version = 11 : i64} {
  func.func @kernel(%arg0: i32, %arg1: memref<1x16x256xf32, #tpu.memory_space<vmem>>, %arg2: memref<32x15xf32, #tpu.memory_space<vmem>>, %arg3: memref<2x49xf32, #tpu.memory_space<vmem>>, %arg4: memref<49x256xf32, #tpu.memory_space<vmem>>, %arg5: memref<1x16x256xf32, #tpu.memory_space<vmem>>) attributes {dimension_semantics = [#tpu.dimension_semantics<parallel>], iteration_bounds = array<i64: 2>, scalar_prefetch = 0 : i64, scratch_operands = 0 : i64, tpu.core_type = #tpu.core_type<tc>, window_params = [{transform_indices = @transform_0, window_bounds = array<i64: 1, 16, 256>}, {pipeline_mode = #tpu.pipeline_mode<synchronous>, transform_indices = @transform_1, window_bounds = array<i64: 32, 15>}, {pipeline_mode = #tpu.pipeline_mode<synchronous>, transform_indices = @transform_2, window_bounds = array<i64: 2, 49>}, {pipeline_mode = #tpu.pipeline_mode<synchronous>, transform_indices = @transform_3, window_bounds = array<i64: 49, 256>}, {transform_indices = @transform_4, window_bounds = array<i64: 1, 16, 256>}]} {
    %c0 = arith.constant 0 : index
    %c0_0 = arith.constant 0 : index
    %c0_1 = arith.constant 0 : index
    %0 = vector.load %arg1[%c0, %c0_0, %c0_1] : memref<1x16x256xf32, #tpu.memory_space<vmem>>, vector<1x16x256xf32>
    %1 = vector.shape_cast %0 : vector<1x16x256xf32> to vector<16x256xf32>
    %2 = tpu.concatenate %1, %1 in 0 : vector<16x256xf32>, vector<16x256xf32> -> vector<32x256xf32>
    %c0_2 = arith.constant 0 : index
    %c0_3 = arith.constant 0 : index
    %3 = vector.load %arg2[%c0_2, %c0_3] : memref<32x15xf32, #tpu.memory_space<vmem>>, vector<32x1xf32>
    %4 = vector.broadcast %3 : vector<32x1xf32> to vector<32x256xf32>
    %5 = arith.mulf %2, %4 : vector<32x256xf32>
    %c0_4 = arith.constant 0 : index
    %c1 = arith.constant 1 : index
    %6 = vector.load %arg2[%c0_4, %c1] : memref<32x15xf32, #tpu.memory_space<vmem>>, vector<32x1xf32>
    %7 = vector.broadcast %6 : vector<32x1xf32> to vector<32x256xf32>
    %8 = arith.addf %5, %7 : vector<32x256xf32>
    %cst = arith.constant 1.000000e-01 : f32
    %9 = vector.broadcast %cst : f32 to vector<32x256xf32>
    %10 = arith.mulf %9, %8 : vector<32x256xf32>
    %11 = arith.maximumf %8, %10 : vector<32x256xf32>
    %c0_5 = arith.constant 0 : index
    %c9 = arith.constant 9 : index
    %12 = vector.load %arg2[%c0_5, %c9] : memref<32x15xf32, #tpu.memory_space<vmem>>, vector<32x1xf32>
    %13 = vector.broadcast %12 : vector<32x1xf32> to vector<32x256xf32>
    %14 = arith.mulf %13, %11 : vector<32x256xf32>
    %c0_6 = arith.constant 0 : index
    %c5 = arith.constant 5 : index
    %15 = vector.load %arg2[%c0_6, %c5] : memref<32x15xf32, #tpu.memory_space<vmem>>, vector<32x1xf32>
    %c16 = arith.constant 16 : index
    %c0_7 = arith.constant 0 : index
    %16 = vector.load %arg4[%c16, %c0_7] : memref<49x256xf32, #tpu.memory_space<vmem>>, vector<1x256xf32>
    %c17_i32 = arith.constant 17 : i32
    %17 = tpu.dynamic_rotate %11 by %c17_i32 dim 1 : vector<32x256xf32>, i32 -> vector<32x256xf32>
    %18 = vector.broadcast %16 : vector<1x256xf32> to vector<32x256xf32>
    %19 = arith.mulf %18, %17 : vector<32x256xf32>
    %20 = vector.broadcast %15 : vector<32x1xf32> to vector<32x256xf32>
    %21 = arith.mulf %20, %19 : vector<32x256xf32>
    %22 = arith.addf %14, %21 : vector<32x256xf32>
    %c0_8 = arith.constant 0 : index
    %c6 = arith.constant 6 : index
    %23 = vector.load %arg2[%c0_8, %c6] : memref<32x15xf32, #tpu.memory_space<vmem>>, vector<32x1xf32>
    %c17 = arith.constant 17 : index
    %c0_9 = arith.constant 0 : index
    %24 = vector.load %arg4[%c17, %c0_9] : memref<49x256xf32, #tpu.memory_space<vmem>>, vector<1x256xf32>
    %c16_i32 = arith.constant 16 : i32
    %25 = tpu.dynamic_rotate %11 by %c16_i32 dim 1 : vector<32x256xf32>, i32 -> vector<32x256xf32>
    %26 = vector.broadcast %24 : vector<1x256xf32> to vector<32x256xf32>
    %27 = arith.mulf %26, %25 : vector<32x256xf32>
    %28 = vector.broadcast %23 : vector<32x1xf32> to vector<32x256xf32>
    %29 = arith.mulf %28, %27 : vector<32x256xf32>
    %30 = arith.addf %22, %29 : vector<32x256xf32>
    %c0_10 = arith.constant 0 : index
    %c7 = arith.constant 7 : index
    %31 = vector.load %arg2[%c0_10, %c7] : memref<32x15xf32, #tpu.memory_space<vmem>>, vector<32x1xf32>
    %c18 = arith.constant 18 : index
    %c0_11 = arith.constant 0 : index
    %32 = vector.load %arg4[%c18, %c0_11] : memref<49x256xf32, #tpu.memory_space<vmem>>, vector<1x256xf32>
    %c15_i32 = arith.constant 15 : i32
    %33 = tpu.dynamic_rotate %11 by %c15_i32 dim 1 : vector<32x256xf32>, i32 -> vector<32x256xf32>
    %34 = vector.broadcast %32 : vector<1x256xf32> to vector<32x256xf32>
    %35 = arith.mulf %34, %33 : vector<32x256xf32>
    %36 = vector.broadcast %31 : vector<32x1xf32> to vector<32x256xf32>
    %37 = arith.mulf %36, %35 : vector<32x256xf32>
    %38 = arith.addf %30, %37 : vector<32x256xf32>
    %c0_12 = arith.constant 0 : index
    %c8 = arith.constant 8 : index
    %39 = vector.load %arg2[%c0_12, %c8] : memref<32x15xf32, #tpu.memory_space<vmem>>, vector<32x1xf32>
    %c23 = arith.constant 23 : index
    %c0_13 = arith.constant 0 : index
    %40 = vector.load %arg4[%c23, %c0_13] : memref<49x256xf32, #tpu.memory_space<vmem>>, vector<1x256xf32>
    %c1_i32 = arith.constant 1 : i32
    %41 = tpu.dynamic_rotate %11 by %c1_i32 dim 1 : vector<32x256xf32>, i32 -> vector<32x256xf32>
    %42 = vector.broadcast %40 : vector<1x256xf32> to vector<32x256xf32>
    %43 = arith.mulf %42, %41 : vector<32x256xf32>
    %44 = vector.broadcast %39 : vector<32x1xf32> to vector<32x256xf32>
    %45 = arith.mulf %44, %43 : vector<32x256xf32>
    %46 = arith.addf %38, %45 : vector<32x256xf32>
    %c0_14 = arith.constant 0 : index
    %c10 = arith.constant 10 : index
    %47 = vector.load %arg2[%c0_14, %c10] : memref<32x15xf32, #tpu.memory_space<vmem>>, vector<32x1xf32>
    %c24 = arith.constant 24 : index
    %c0_15 = arith.constant 0 : index
    %48 = vector.load %arg4[%c24, %c0_15] : memref<49x256xf32, #tpu.memory_space<vmem>>, vector<1x256xf32>
    %c255_i32 = arith.constant 255 : i32
    %49 = tpu.dynamic_rotate %11 by %c255_i32 dim 1 : vector<32x256xf32>, i32 -> vector<32x256xf32>
    %50 = vector.broadcast %48 : vector<1x256xf32> to vector<32x256xf32>
    %51 = arith.mulf %50, %49 : vector<32x256xf32>
    %52 = vector.broadcast %47 : vector<32x1xf32> to vector<32x256xf32>
    %53 = arith.mulf %52, %51 : vector<32x256xf32>
    %54 = arith.addf %46, %53 : vector<32x256xf32>
    %c0_16 = arith.constant 0 : index
    %c11 = arith.constant 11 : index
    %55 = vector.load %arg2[%c0_16, %c11] : memref<32x15xf32, #tpu.memory_space<vmem>>, vector<32x1xf32>
    %c29 = arith.constant 29 : index
    %c0_17 = arith.constant 0 : index
    %56 = vector.load %arg4[%c29, %c0_17] : memref<49x256xf32, #tpu.memory_space<vmem>>, vector<1x256xf32>
    %c241_i32 = arith.constant 241 : i32
    %57 = tpu.dynamic_rotate %11 by %c241_i32 dim 1 : vector<32x256xf32>, i32 -> vector<32x256xf32>
    %58 = vector.broadcast %56 : vector<1x256xf32> to vector<32x256xf32>
    %59 = arith.mulf %58, %57 : vector<32x256xf32>
    %60 = vector.broadcast %55 : vector<32x1xf32> to vector<32x256xf32>
    %61 = arith.mulf %60, %59 : vector<32x256xf32>
    %62 = arith.addf %54, %61 : vector<32x256xf32>
    %c0_18 = arith.constant 0 : index
    %c12 = arith.constant 12 : index
    %63 = vector.load %arg2[%c0_18, %c12] : memref<32x15xf32, #tpu.memory_space<vmem>>, vector<32x1xf32>
    %c30 = arith.constant 30 : index
    %c0_19 = arith.constant 0 : index
    %64 = vector.load %arg4[%c30, %c0_19] : memref<49x256xf32, #tpu.memory_space<vmem>>, vector<1x256xf32>
    %c240_i32 = arith.constant 240 : i32
    %65 = tpu.dynamic_rotate %11 by %c240_i32 dim 1 : vector<32x256xf32>, i32 -> vector<32x256xf32>
    %66 = vector.broadcast %64 : vector<1x256xf32> to vector<32x256xf32>
    %67 = arith.mulf %66, %65 : vector<32x256xf32>
    %68 = vector.broadcast %63 : vector<32x1xf32> to vector<32x256xf32>
    %69 = arith.mulf %68, %67 : vector<32x256xf32>
    %70 = arith.addf %62, %69 : vector<32x256xf32>
    %c0_20 = arith.constant 0 : index
    %c13 = arith.constant 13 : index
    %71 = vector.load %arg2[%c0_20, %c13] : memref<32x15xf32, #tpu.memory_space<vmem>>, vector<32x1xf32>
    %c31 = arith.constant 31 : index
    %c0_21 = arith.constant 0 : index
    %72 = vector.load %arg4[%c31, %c0_21] : memref<49x256xf32, #tpu.memory_space<vmem>>, vector<1x256xf32>
    %c239_i32 = arith.constant 239 : i32
    %73 = tpu.dynamic_rotate %11 by %c239_i32 dim 1 : vector<32x256xf32>, i32 -> vector<32x256xf32>
    %74 = vector.broadcast %72 : vector<1x256xf32> to vector<32x256xf32>
    %75 = arith.mulf %74, %73 : vector<32x256xf32>
    %76 = vector.broadcast %71 : vector<32x1xf32> to vector<32x256xf32>
    %77 = arith.mulf %76, %75 : vector<32x256xf32>
    %78 = arith.addf %70, %77 : vector<32x256xf32>
    %c0_22 = arith.constant 0 : index
    %c2 = arith.constant 2 : index
    %79 = vector.load %arg2[%c0_22, %c2] : memref<32x15xf32, #tpu.memory_space<vmem>>, vector<32x1xf32>
    %80 = vector.broadcast %79 : vector<32x1xf32> to vector<32x256xf32>
    %81 = arith.addf %78, %80 : vector<32x256xf32>
    %cst_23 = arith.constant 1.000000e-01 : f32
    %82 = vector.broadcast %cst_23 : f32 to vector<32x256xf32>
    %83 = arith.mulf %82, %81 : vector<32x256xf32>
    %84 = arith.maximumf %81, %83 : vector<32x256xf32>
    %c0_24 = arith.constant 0 : index
    %c3 = arith.constant 3 : index
    %85 = vector.load %arg2[%c0_24, %c3] : memref<32x15xf32, #tpu.memory_space<vmem>>, vector<16x1xf32>
    %86 = vector.extract_strided_slice %84 {offsets = [0, 0], sizes = [16, 256], strides = [1, 1]} : vector<32x256xf32> to vector<16x256xf32>
    %87 = vector.broadcast %85 : vector<16x1xf32> to vector<16x256xf32>
    %88 = arith.mulf %87, %86 : vector<16x256xf32>
    %c16_25 = arith.constant 16 : index
    %c3_26 = arith.constant 3 : index
    %89 = vector.load %arg2[%c16_25, %c3_26] : memref<32x15xf32, #tpu.memory_space<vmem>>, vector<16x1xf32>
    %90 = vector.extract_strided_slice %84 {offsets = [16, 0], sizes = [16, 256], strides = [1, 1]} : vector<32x256xf32> to vector<16x256xf32>
    %91 = vector.broadcast %89 : vector<16x1xf32> to vector<16x256xf32>
    %92 = arith.mulf %91, %90 : vector<16x256xf32>
    %93 = arith.addf %88, %92 : vector<16x256xf32>
    %c0_27 = arith.constant 0 : index
    %c4 = arith.constant 4 : index
    %94 = vector.load %arg2[%c0_27, %c4] : memref<32x15xf32, #tpu.memory_space<vmem>>, vector<16x1xf32>
    %95 = vector.broadcast %94 : vector<16x1xf32> to vector<16x256xf32>
    %96 = arith.addf %93, %95 : vector<16x256xf32>
    %cst_28 = arith.constant 1.000000e-01 : f32
    %97 = vector.broadcast %cst_28 : f32 to vector<16x256xf32>
    %98 = arith.mulf %97, %96 : vector<16x256xf32>
    %99 = arith.maximumf %96, %98 : vector<16x256xf32>
    %100 = vector.shape_cast %99 : vector<16x256xf32> to vector<1x16x256xf32>
    %cst_29 = arith.constant dense<0.000000e+00> : vector<1x16xf32>
    %101 = vector.multi_reduction <add>, %100, %cst_29 [2] : vector<1x16x256xf32> to vector<1x16xf32>
    %102 = vector.shape_cast %101 : vector<1x16xf32> to vector<1x16x1xf32>
    %cst_30 = arith.constant dense<0xFF800000> : vector<1x16xf32>
    %103 = vector.multi_reduction <maximumf>, %100, %cst_30 [2] : vector<1x16x256xf32> to vector<1x16xf32>
    %104 = vector.shape_cast %103 : vector<1x16xf32> to vector<1x16x1xf32>
    %cst_31 = arith.constant 3.906250e-03 : f32
    %105 = vector.broadcast %cst_31 : f32 to vector<1x16x1xf32>
    %106 = arith.mulf %102, %105 : vector<1x16x1xf32>
    %c0_32 = arith.constant 0 : index
    %c14 = arith.constant 14 : index
    %107 = vector.load %arg2[%c0_32, %c14] : memref<32x15xf32, #tpu.memory_space<vmem>>, vector<16x1xf32>
    %108 = vector.shape_cast %107 : vector<16x1xf32> to vector<1x16x1xf32>
    %c16_33 = arith.constant 16 : index
    %c14_34 = arith.constant 14 : index
    %109 = vector.load %arg2[%c16_33, %c14_34] : memref<32x15xf32, #tpu.memory_space<vmem>>, vector<16x1xf32>
    %110 = vector.shape_cast %109 : vector<16x1xf32> to vector<1x16x1xf32>
    %111 = arith.mulf %108, %106 : vector<1x16x1xf32>
    %cst_35 = arith.constant dense<0.000000e+00> : vector<1x1xf32>
    %112 = vector.multi_reduction <add>, %111, %cst_35 [1] : vector<1x16x1xf32> to vector<1x1xf32>
    %113 = vector.shape_cast %112 : vector<1x1xf32> to vector<1x1x1xf32>
    %cst_36 = arith.constant 0.000000e+00 : f32
    %114 = vector.broadcast %cst_36 : f32 to vector<1x1x1xf32>
    %115 = arith.maximumf %113, %114 : vector<1x1x1xf32>
    %116 = arith.mulf %108, %104 : vector<1x16x1xf32>
    %cst_37 = arith.constant dense<0.000000e+00> : vector<1x1xf32>
    %117 = vector.multi_reduction <add>, %116, %cst_37 [1] : vector<1x16x1xf32> to vector<1x1xf32>
    %118 = vector.shape_cast %117 : vector<1x1xf32> to vector<1x1x1xf32>
    %cst_38 = arith.constant 0.000000e+00 : f32
    %119 = vector.broadcast %cst_38 : f32 to vector<1x1x1xf32>
    %120 = arith.maximumf %118, %119 : vector<1x1x1xf32>
    %121 = arith.addf %115, %120 : vector<1x1x1xf32>
    %122 = vector.broadcast %121 : vector<1x1x1xf32> to vector<1x16x1xf32>
    %123 = arith.mulf %110, %122 : vector<1x16x1xf32>
    %cst_39 = arith.constant dense<0.000000e+00> : vector<1x16xf32>
    %124 = vector.multi_reduction <add>, %123, %cst_39 [2] : vector<1x16x1xf32> to vector<1x16xf32>
    %125 = vector.shape_cast %124 : vector<1x16xf32> to vector<1x16x1xf32>
    %cst_40 = arith.constant 5.000000e-01 : f32
    %126 = vector.broadcast %cst_40 : f32 to vector<1x16x1xf32>
    %127 = arith.mulf %126, %125 : vector<1x16x1xf32>
    %128 = math.tanh %127 : vector<1x16x1xf32>
    %cst_41 = arith.constant 1.000000e+00 : f32
    %129 = vector.broadcast %cst_41 : f32 to vector<1x16x1xf32>
    %130 = arith.addf %128, %129 : vector<1x16x1xf32>
    %cst_42 = arith.constant 5.000000e-01 : f32
    %131 = vector.broadcast %cst_42 : f32 to vector<1x16x1xf32>
    %132 = arith.mulf %131, %130 : vector<1x16x1xf32>
    %133 = vector.broadcast %132 : vector<1x16x1xf32> to vector<1x16x256xf32>
    %134 = arith.mulf %100, %133 : vector<1x16x256xf32>
    %cst_43 = arith.constant dense<0.000000e+00> : vector<1x256xf32>
    %135 = vector.multi_reduction <add>, %134, %cst_43 [1] : vector<1x16x256xf32> to vector<1x256xf32>
    %136 = vector.shape_cast %135 : vector<1x256xf32> to vector<1x1x256xf32>
    %cst_44 = arith.constant 1.600000e+01 : f32
    %137 = vector.broadcast %cst_44 : f32 to vector<1x1x256xf32>
    %138 = arith.divf %136, %137 : vector<1x1x256xf32>
    %cst_45 = arith.constant dense<0xFF800000> : vector<1x256xf32>
    %139 = vector.multi_reduction <maximumf>, %134, %cst_45 [1] : vector<1x16x256xf32> to vector<1x256xf32>
    %140 = vector.shape_cast %139 : vector<1x256xf32> to vector<1x1x256xf32>
    %141 = tpu.concatenate %138, %140 in 1 : vector<1x1x256xf32>, vector<1x1x256xf32> -> vector<1x2x256xf32>
    %142 = vector.shape_cast %141 : vector<1x2x256xf32> to vector<2x256xf32>
    %c0_46 = arith.constant 0 : index
    %c24_47 = arith.constant 24 : index
    %143 = vector.load %arg3[%c0_46, %c24_47] : memref<2x49xf32, #tpu.memory_space<vmem>>, vector<2x1xf32>
    %144 = vector.broadcast %143 : vector<2x1xf32> to vector<2x256xf32>
    %145 = arith.mulf %144, %142 : vector<2x256xf32>
    %c0_48 = arith.constant 0 : index
    %c0_49 = arith.constant 0 : index
    %146 = vector.load %arg3[%c0_48, %c0_49] : memref<2x49xf32, #tpu.memory_space<vmem>>, vector<2x1xf32>
    %c0_50 = arith.constant 0 : index
    %c0_51 = arith.constant 0 : index
    %147 = vector.load %arg4[%c0_50, %c0_51] : memref<49x256xf32, #tpu.memory_space<vmem>>, vector<1x256xf32>
    %c51_i32 = arith.constant 51 : i32
    %148 = tpu.dynamic_rotate %142 by %c51_i32 dim 1 : vector<2x256xf32>, i32 -> vector<2x256xf32>
    %149 = vector.broadcast %147 : vector<1x256xf32> to vector<2x256xf32>
    %150 = arith.mulf %149, %148 : vector<2x256xf32>
    %151 = vector.broadcast %146 : vector<2x1xf32> to vector<2x256xf32>
    %152 = arith.mulf %151, %150 : vector<2x256xf32>
    %153 = arith.addf %145, %152 : vector<2x256xf32>
    %c0_52 = arith.constant 0 : index
    %c1_53 = arith.constant 1 : index
    %154 = vector.load %arg3[%c0_52, %c1_53] : memref<2x49xf32, #tpu.memory_space<vmem>>, vector<2x1xf32>
    %c1_54 = arith.constant 1 : index
    %c0_55 = arith.constant 0 : index
    %155 = vector.load %arg4[%c1_54, %c0_55] : memref<49x256xf32, #tpu.memory_space<vmem>>, vector<1x256xf32>
    %c50_i32 = arith.constant 50 : i32
    %156 = tpu.dynamic_rotate %142 by %c50_i32 dim 1 : vector<2x256xf32>, i32 -> vector<2x256xf32>
    %157 = vector.broadcast %155 : vector<1x256xf32> to vector<2x256xf32>
    %158 = arith.mulf %157, %156 : vector<2x256xf32>
    %159 = vector.broadcast %154 : vector<2x1xf32> to vector<2x256xf32>
    %160 = arith.mulf %159, %158 : vector<2x256xf32>
    %161 = arith.addf %153, %160 : vector<2x256xf32>
    %c0_56 = arith.constant 0 : index
    %c2_57 = arith.constant 2 : index
    %162 = vector.load %arg3[%c0_56, %c2_57] : memref<2x49xf32, #tpu.memory_space<vmem>>, vector<2x1xf32>
    %c2_58 = arith.constant 2 : index
    %c0_59 = arith.constant 0 : index
    %163 = vector.load %arg4[%c2_58, %c0_59] : memref<49x256xf32, #tpu.memory_space<vmem>>, vector<1x256xf32>
    %c49_i32 = arith.constant 49 : i32
    %164 = tpu.dynamic_rotate %142 by %c49_i32 dim 1 : vector<2x256xf32>, i32 -> vector<2x256xf32>
    %165 = vector.broadcast %163 : vector<1x256xf32> to vector<2x256xf32>
    %166 = arith.mulf %165, %164 : vector<2x256xf32>
    %167 = vector.broadcast %162 : vector<2x1xf32> to vector<2x256xf32>
    %168 = arith.mulf %167, %166 : vector<2x256xf32>
    %169 = arith.addf %161, %168 : vector<2x256xf32>
    %c0_60 = arith.constant 0 : index
    %c3_61 = arith.constant 3 : index
    %170 = vector.load %arg3[%c0_60, %c3_61] : memref<2x49xf32, #tpu.memory_space<vmem>>, vector<2x1xf32>
    %c3_62 = arith.constant 3 : index
    %c0_63 = arith.constant 0 : index
    %171 = vector.load %arg4[%c3_62, %c0_63] : memref<49x256xf32, #tpu.memory_space<vmem>>, vector<1x256xf32>
    %c48_i32 = arith.constant 48 : i32
    %172 = tpu.dynamic_rotate %142 by %c48_i32 dim 1 : vector<2x256xf32>, i32 -> vector<2x256xf32>
    %173 = vector.broadcast %171 : vector<1x256xf32> to vector<2x256xf32>
    %174 = arith.mulf %173, %172 : vector<2x256xf32>
    %175 = vector.broadcast %170 : vector<2x1xf32> to vector<2x256xf32>
    %176 = arith.mulf %175, %174 : vector<2x256xf32>
    %177 = arith.addf %169, %176 : vector<2x256xf32>
    %c0_64 = arith.constant 0 : index
    %c4_65 = arith.constant 4 : index
    %178 = vector.load %arg3[%c0_64, %c4_65] : memref<2x49xf32, #tpu.memory_space<vmem>>, vector<2x1xf32>
    %c4_66 = arith.constant 4 : index
    %c0_67 = arith.constant 0 : index
    %179 = vector.load %arg4[%c4_66, %c0_67] : memref<49x256xf32, #tpu.memory_space<vmem>>, vector<1x256xf32>
    %c47_i32 = arith.constant 47 : i32
    %180 = tpu.dynamic_rotate %142 by %c47_i32 dim 1 : vector<2x256xf32>, i32 -> vector<2x256xf32>
    %181 = vector.broadcast %179 : vector<1x256xf32> to vector<2x256xf32>
    %182 = arith.mulf %181, %180 : vector<2x256xf32>
    %183 = vector.broadcast %178 : vector<2x1xf32> to vector<2x256xf32>
    %184 = arith.mulf %183, %182 : vector<2x256xf32>
    %185 = arith.addf %177, %184 : vector<2x256xf32>
    %c0_68 = arith.constant 0 : index
    %c5_69 = arith.constant 5 : index
    %186 = vector.load %arg3[%c0_68, %c5_69] : memref<2x49xf32, #tpu.memory_space<vmem>>, vector<2x1xf32>
    %c5_70 = arith.constant 5 : index
    %c0_71 = arith.constant 0 : index
    %187 = vector.load %arg4[%c5_70, %c0_71] : memref<49x256xf32, #tpu.memory_space<vmem>>, vector<1x256xf32>
    %c46_i32 = arith.constant 46 : i32
    %188 = tpu.dynamic_rotate %142 by %c46_i32 dim 1 : vector<2x256xf32>, i32 -> vector<2x256xf32>
    %189 = vector.broadcast %187 : vector<1x256xf32> to vector<2x256xf32>
    %190 = arith.mulf %189, %188 : vector<2x256xf32>
    %191 = vector.broadcast %186 : vector<2x1xf32> to vector<2x256xf32>
    %192 = arith.mulf %191, %190 : vector<2x256xf32>
    %193 = arith.addf %185, %192 : vector<2x256xf32>
    %c0_72 = arith.constant 0 : index
    %c6_73 = arith.constant 6 : index
    %194 = vector.load %arg3[%c0_72, %c6_73] : memref<2x49xf32, #tpu.memory_space<vmem>>, vector<2x1xf32>
    %c6_74 = arith.constant 6 : index
    %c0_75 = arith.constant 0 : index
    %195 = vector.load %arg4[%c6_74, %c0_75] : memref<49x256xf32, #tpu.memory_space<vmem>>, vector<1x256xf32>
    %c45_i32 = arith.constant 45 : i32
    %196 = tpu.dynamic_rotate %142 by %c45_i32 dim 1 : vector<2x256xf32>, i32 -> vector<2x256xf32>
    %197 = vector.broadcast %195 : vector<1x256xf32> to vector<2x256xf32>
    %198 = arith.mulf %197, %196 : vector<2x256xf32>
    %199 = vector.broadcast %194 : vector<2x1xf32> to vector<2x256xf32>
    %200 = arith.mulf %199, %198 : vector<2x256xf32>
    %201 = arith.addf %193, %200 : vector<2x256xf32>
    %c0_76 = arith.constant 0 : index
    %c7_77 = arith.constant 7 : index
    %202 = vector.load %arg3[%c0_76, %c7_77] : memref<2x49xf32, #tpu.memory_space<vmem>>, vector<2x1xf32>
    %c7_78 = arith.constant 7 : index
    %c0_79 = arith.constant 0 : index
    %203 = vector.load %arg4[%c7_78, %c0_79] : memref<49x256xf32, #tpu.memory_space<vmem>>, vector<1x256xf32>
    %c35_i32 = arith.constant 35 : i32
    %204 = tpu.dynamic_rotate %142 by %c35_i32 dim 1 : vector<2x256xf32>, i32 -> vector<2x256xf32>
    %205 = vector.broadcast %203 : vector<1x256xf32> to vector<2x256xf32>
    %206 = arith.mulf %205, %204 : vector<2x256xf32>
    %207 = vector.broadcast %202 : vector<2x1xf32> to vector<2x256xf32>
    %208 = arith.mulf %207, %206 : vector<2x256xf32>
    %209 = arith.addf %201, %208 : vector<2x256xf32>
    %c0_80 = arith.constant 0 : index
    %c8_81 = arith.constant 8 : index
    %210 = vector.load %arg3[%c0_80, %c8_81] : memref<2x49xf32, #tpu.memory_space<vmem>>, vector<2x1xf32>
    %c8_82 = arith.constant 8 : index
    %c0_83 = arith.constant 0 : index
    %211 = vector.load %arg4[%c8_82, %c0_83] : memref<49x256xf32, #tpu.memory_space<vmem>>, vector<1x256xf32>
    %c34_i32 = arith.constant 34 : i32
    %212 = tpu.dynamic_rotate %142 by %c34_i32 dim 1 : vector<2x256xf32>, i32 -> vector<2x256xf32>
    %213 = vector.broadcast %211 : vector<1x256xf32> to vector<2x256xf32>
    %214 = arith.mulf %213, %212 : vector<2x256xf32>
    %215 = vector.broadcast %210 : vector<2x1xf32> to vector<2x256xf32>
    %216 = arith.mulf %215, %214 : vector<2x256xf32>
    %217 = arith.addf %209, %216 : vector<2x256xf32>
    %c0_84 = arith.constant 0 : index
    %c9_85 = arith.constant 9 : index
    %218 = vector.load %arg3[%c0_84, %c9_85] : memref<2x49xf32, #tpu.memory_space<vmem>>, vector<2x1xf32>
    %c9_86 = arith.constant 9 : index
    %c0_87 = arith.constant 0 : index
    %219 = vector.load %arg4[%c9_86, %c0_87] : memref<49x256xf32, #tpu.memory_space<vmem>>, vector<1x256xf32>
    %c33_i32 = arith.constant 33 : i32
    %220 = tpu.dynamic_rotate %142 by %c33_i32 dim 1 : vector<2x256xf32>, i32 -> vector<2x256xf32>
    %221 = vector.broadcast %219 : vector<1x256xf32> to vector<2x256xf32>
    %222 = arith.mulf %221, %220 : vector<2x256xf32>
    %223 = vector.broadcast %218 : vector<2x1xf32> to vector<2x256xf32>
    %224 = arith.mulf %223, %222 : vector<2x256xf32>
    %225 = arith.addf %217, %224 : vector<2x256xf32>
    %c0_88 = arith.constant 0 : index
    %c10_89 = arith.constant 10 : index
    %226 = vector.load %arg3[%c0_88, %c10_89] : memref<2x49xf32, #tpu.memory_space<vmem>>, vector<2x1xf32>
    %c10_90 = arith.constant 10 : index
    %c0_91 = arith.constant 0 : index
    %227 = vector.load %arg4[%c10_90, %c0_91] : memref<49x256xf32, #tpu.memory_space<vmem>>, vector<1x256xf32>
    %c32_i32 = arith.constant 32 : i32
    %228 = tpu.dynamic_rotate %142 by %c32_i32 dim 1 : vector<2x256xf32>, i32 -> vector<2x256xf32>
    %229 = vector.broadcast %227 : vector<1x256xf32> to vector<2x256xf32>
    %230 = arith.mulf %229, %228 : vector<2x256xf32>
    %231 = vector.broadcast %226 : vector<2x1xf32> to vector<2x256xf32>
    %232 = arith.mulf %231, %230 : vector<2x256xf32>
    %233 = arith.addf %225, %232 : vector<2x256xf32>
    %c0_92 = arith.constant 0 : index
    %c11_93 = arith.constant 11 : index
    %234 = vector.load %arg3[%c0_92, %c11_93] : memref<2x49xf32, #tpu.memory_space<vmem>>, vector<2x1xf32>
    %c11_94 = arith.constant 11 : index
    %c0_95 = arith.constant 0 : index
    %235 = vector.load %arg4[%c11_94, %c0_95] : memref<49x256xf32, #tpu.memory_space<vmem>>, vector<1x256xf32>
    %c31_i32 = arith.constant 31 : i32
    %236 = tpu.dynamic_rotate %142 by %c31_i32 dim 1 : vector<2x256xf32>, i32 -> vector<2x256xf32>
    %237 = vector.broadcast %235 : vector<1x256xf32> to vector<2x256xf32>
    %238 = arith.mulf %237, %236 : vector<2x256xf32>
    %239 = vector.broadcast %234 : vector<2x1xf32> to vector<2x256xf32>
    %240 = arith.mulf %239, %238 : vector<2x256xf32>
    %241 = arith.addf %233, %240 : vector<2x256xf32>
    %c0_96 = arith.constant 0 : index
    %c12_97 = arith.constant 12 : index
    %242 = vector.load %arg3[%c0_96, %c12_97] : memref<2x49xf32, #tpu.memory_space<vmem>>, vector<2x1xf32>
    %c12_98 = arith.constant 12 : index
    %c0_99 = arith.constant 0 : index
    %243 = vector.load %arg4[%c12_98, %c0_99] : memref<49x256xf32, #tpu.memory_space<vmem>>, vector<1x256xf32>
    %c30_i32 = arith.constant 30 : i32
    %244 = tpu.dynamic_rotate %142 by %c30_i32 dim 1 : vector<2x256xf32>, i32 -> vector<2x256xf32>
    %245 = vector.broadcast %243 : vector<1x256xf32> to vector<2x256xf32>
    %246 = arith.mulf %245, %244 : vector<2x256xf32>
    %247 = vector.broadcast %242 : vector<2x1xf32> to vector<2x256xf32>
    %248 = arith.mulf %247, %246 : vector<2x256xf32>
    %249 = arith.addf %241, %248 : vector<2x256xf32>
    %c0_100 = arith.constant 0 : index
    %c13_101 = arith.constant 13 : index
    %250 = vector.load %arg3[%c0_100, %c13_101] : memref<2x49xf32, #tpu.memory_space<vmem>>, vector<2x1xf32>
    %c13_102 = arith.constant 13 : index
    %c0_103 = arith.constant 0 : index
    %251 = vector.load %arg4[%c13_102, %c0_103] : memref<49x256xf32, #tpu.memory_space<vmem>>, vector<1x256xf32>
    %c29_i32 = arith.constant 29 : i32
    %252 = tpu.dynamic_rotate %142 by %c29_i32 dim 1 : vector<2x256xf32>, i32 -> vector<2x256xf32>
    %253 = vector.broadcast %251 : vector<1x256xf32> to vector<2x256xf32>
    %254 = arith.mulf %253, %252 : vector<2x256xf32>
    %255 = vector.broadcast %250 : vector<2x1xf32> to vector<2x256xf32>
    %256 = arith.mulf %255, %254 : vector<2x256xf32>
    %257 = arith.addf %249, %256 : vector<2x256xf32>
    %c0_104 = arith.constant 0 : index
    %c14_105 = arith.constant 14 : index
    %258 = vector.load %arg3[%c0_104, %c14_105] : memref<2x49xf32, #tpu.memory_space<vmem>>, vector<2x1xf32>
    %c14_106 = arith.constant 14 : index
    %c0_107 = arith.constant 0 : index
    %259 = vector.load %arg4[%c14_106, %c0_107] : memref<49x256xf32, #tpu.memory_space<vmem>>, vector<1x256xf32>
    %c19_i32 = arith.constant 19 : i32
    %260 = tpu.dynamic_rotate %142 by %c19_i32 dim 1 : vector<2x256xf32>, i32 -> vector<2x256xf32>
    %261 = vector.broadcast %259 : vector<1x256xf32> to vector<2x256xf32>
    %262 = arith.mulf %261, %260 : vector<2x256xf32>
    %263 = vector.broadcast %258 : vector<2x1xf32> to vector<2x256xf32>
    %264 = arith.mulf %263, %262 : vector<2x256xf32>
    %265 = arith.addf %257, %264 : vector<2x256xf32>
    %c0_108 = arith.constant 0 : index
    %c15 = arith.constant 15 : index
    %266 = vector.load %arg3[%c0_108, %c15] : memref<2x49xf32, #tpu.memory_space<vmem>>, vector<2x1xf32>
    %c15_109 = arith.constant 15 : index
    %c0_110 = arith.constant 0 : index
    %267 = vector.load %arg4[%c15_109, %c0_110] : memref<49x256xf32, #tpu.memory_space<vmem>>, vector<1x256xf32>
    %c18_i32 = arith.constant 18 : i32
    %268 = tpu.dynamic_rotate %142 by %c18_i32 dim 1 : vector<2x256xf32>, i32 -> vector<2x256xf32>
    %269 = vector.broadcast %267 : vector<1x256xf32> to vector<2x256xf32>
    %270 = arith.mulf %269, %268 : vector<2x256xf32>
    %271 = vector.broadcast %266 : vector<2x1xf32> to vector<2x256xf32>
    %272 = arith.mulf %271, %270 : vector<2x256xf32>
    %273 = arith.addf %265, %272 : vector<2x256xf32>
    %c0_111 = arith.constant 0 : index
    %c16_112 = arith.constant 16 : index
    %274 = vector.load %arg3[%c0_111, %c16_112] : memref<2x49xf32, #tpu.memory_space<vmem>>, vector<2x1xf32>
    %c16_113 = arith.constant 16 : index
    %c0_114 = arith.constant 0 : index
    %275 = vector.load %arg4[%c16_113, %c0_114] : memref<49x256xf32, #tpu.memory_space<vmem>>, vector<1x256xf32>
    %c17_i32_115 = arith.constant 17 : i32
    %276 = tpu.dynamic_rotate %142 by %c17_i32_115 dim 1 : vector<2x256xf32>, i32 -> vector<2x256xf32>
    %277 = vector.broadcast %275 : vector<1x256xf32> to vector<2x256xf32>
    %278 = arith.mulf %277, %276 : vector<2x256xf32>
    %279 = vector.broadcast %274 : vector<2x1xf32> to vector<2x256xf32>
    %280 = arith.mulf %279, %278 : vector<2x256xf32>
    %281 = arith.addf %273, %280 : vector<2x256xf32>
    %c0_116 = arith.constant 0 : index
    %c17_117 = arith.constant 17 : index
    %282 = vector.load %arg3[%c0_116, %c17_117] : memref<2x49xf32, #tpu.memory_space<vmem>>, vector<2x1xf32>
    %c17_118 = arith.constant 17 : index
    %c0_119 = arith.constant 0 : index
    %283 = vector.load %arg4[%c17_118, %c0_119] : memref<49x256xf32, #tpu.memory_space<vmem>>, vector<1x256xf32>
    %c16_i32_120 = arith.constant 16 : i32
    %284 = tpu.dynamic_rotate %142 by %c16_i32_120 dim 1 : vector<2x256xf32>, i32 -> vector<2x256xf32>
    %285 = vector.broadcast %283 : vector<1x256xf32> to vector<2x256xf32>
    %286 = arith.mulf %285, %284 : vector<2x256xf32>
    %287 = vector.broadcast %282 : vector<2x1xf32> to vector<2x256xf32>
    %288 = arith.mulf %287, %286 : vector<2x256xf32>
    %289 = arith.addf %281, %288 : vector<2x256xf32>
    %c0_121 = arith.constant 0 : index
    %c18_122 = arith.constant 18 : index
    %290 = vector.load %arg3[%c0_121, %c18_122] : memref<2x49xf32, #tpu.memory_space<vmem>>, vector<2x1xf32>
    %c18_123 = arith.constant 18 : index
    %c0_124 = arith.constant 0 : index
    %291 = vector.load %arg4[%c18_123, %c0_124] : memref<49x256xf32, #tpu.memory_space<vmem>>, vector<1x256xf32>
    %c15_i32_125 = arith.constant 15 : i32
    %292 = tpu.dynamic_rotate %142 by %c15_i32_125 dim 1 : vector<2x256xf32>, i32 -> vector<2x256xf32>
    %293 = vector.broadcast %291 : vector<1x256xf32> to vector<2x256xf32>
    %294 = arith.mulf %293, %292 : vector<2x256xf32>
    %295 = vector.broadcast %290 : vector<2x1xf32> to vector<2x256xf32>
    %296 = arith.mulf %295, %294 : vector<2x256xf32>
    %297 = arith.addf %289, %296 : vector<2x256xf32>
    %c0_126 = arith.constant 0 : index
    %c19 = arith.constant 19 : index
    %298 = vector.load %arg3[%c0_126, %c19] : memref<2x49xf32, #tpu.memory_space<vmem>>, vector<2x1xf32>
    %c19_127 = arith.constant 19 : index
    %c0_128 = arith.constant 0 : index
    %299 = vector.load %arg4[%c19_127, %c0_128] : memref<49x256xf32, #tpu.memory_space<vmem>>, vector<1x256xf32>
    %c14_i32 = arith.constant 14 : i32
    %300 = tpu.dynamic_rotate %142 by %c14_i32 dim 1 : vector<2x256xf32>, i32 -> vector<2x256xf32>
    %301 = vector.broadcast %299 : vector<1x256xf32> to vector<2x256xf32>
    %302 = arith.mulf %301, %300 : vector<2x256xf32>
    %303 = vector.broadcast %298 : vector<2x1xf32> to vector<2x256xf32>
    %304 = arith.mulf %303, %302 : vector<2x256xf32>
    %305 = arith.addf %297, %304 : vector<2x256xf32>
    %c0_129 = arith.constant 0 : index
    %c20 = arith.constant 20 : index
    %306 = vector.load %arg3[%c0_129, %c20] : memref<2x49xf32, #tpu.memory_space<vmem>>, vector<2x1xf32>
    %c20_130 = arith.constant 20 : index
    %c0_131 = arith.constant 0 : index
    %307 = vector.load %arg4[%c20_130, %c0_131] : memref<49x256xf32, #tpu.memory_space<vmem>>, vector<1x256xf32>
    %c13_i32 = arith.constant 13 : i32
    %308 = tpu.dynamic_rotate %142 by %c13_i32 dim 1 : vector<2x256xf32>, i32 -> vector<2x256xf32>
    %309 = vector.broadcast %307 : vector<1x256xf32> to vector<2x256xf32>
    %310 = arith.mulf %309, %308 : vector<2x256xf32>
    %311 = vector.broadcast %306 : vector<2x1xf32> to vector<2x256xf32>
    %312 = arith.mulf %311, %310 : vector<2x256xf32>
    %313 = arith.addf %305, %312 : vector<2x256xf32>
    %c0_132 = arith.constant 0 : index
    %c21 = arith.constant 21 : index
    %314 = vector.load %arg3[%c0_132, %c21] : memref<2x49xf32, #tpu.memory_space<vmem>>, vector<2x1xf32>
    %c21_133 = arith.constant 21 : index
    %c0_134 = arith.constant 0 : index
    %315 = vector.load %arg4[%c21_133, %c0_134] : memref<49x256xf32, #tpu.memory_space<vmem>>, vector<1x256xf32>
    %c3_i32 = arith.constant 3 : i32
    %316 = tpu.dynamic_rotate %142 by %c3_i32 dim 1 : vector<2x256xf32>, i32 -> vector<2x256xf32>
    %317 = vector.broadcast %315 : vector<1x256xf32> to vector<2x256xf32>
    %318 = arith.mulf %317, %316 : vector<2x256xf32>
    %319 = vector.broadcast %314 : vector<2x1xf32> to vector<2x256xf32>
    %320 = arith.mulf %319, %318 : vector<2x256xf32>
    %321 = arith.addf %313, %320 : vector<2x256xf32>
    %c0_135 = arith.constant 0 : index
    %c22 = arith.constant 22 : index
    %322 = vector.load %arg3[%c0_135, %c22] : memref<2x49xf32, #tpu.memory_space<vmem>>, vector<2x1xf32>
    %c22_136 = arith.constant 22 : index
    %c0_137 = arith.constant 0 : index
    %323 = vector.load %arg4[%c22_136, %c0_137] : memref<49x256xf32, #tpu.memory_space<vmem>>, vector<1x256xf32>
    %c2_i32 = arith.constant 2 : i32
    %324 = tpu.dynamic_rotate %142 by %c2_i32 dim 1 : vector<2x256xf32>, i32 -> vector<2x256xf32>
    %325 = vector.broadcast %323 : vector<1x256xf32> to vector<2x256xf32>
    %326 = arith.mulf %325, %324 : vector<2x256xf32>
    %327 = vector.broadcast %322 : vector<2x1xf32> to vector<2x256xf32>
    %328 = arith.mulf %327, %326 : vector<2x256xf32>
    %329 = arith.addf %321, %328 : vector<2x256xf32>
    %c0_138 = arith.constant 0 : index
    %c23_139 = arith.constant 23 : index
    %330 = vector.load %arg3[%c0_138, %c23_139] : memref<2x49xf32, #tpu.memory_space<vmem>>, vector<2x1xf32>
    %c23_140 = arith.constant 23 : index
    %c0_141 = arith.constant 0 : index
    %331 = vector.load %arg4[%c23_140, %c0_141] : memref<49x256xf32, #tpu.memory_space<vmem>>, vector<1x256xf32>
    %c1_i32_142 = arith.constant 1 : i32
    %332 = tpu.dynamic_rotate %142 by %c1_i32_142 dim 1 : vector<2x256xf32>, i32 -> vector<2x256xf32>
    %333 = vector.broadcast %331 : vector<1x256xf32> to vector<2x256xf32>
    %334 = arith.mulf %333, %332 : vector<2x256xf32>
    %335 = vector.broadcast %330 : vector<2x1xf32> to vector<2x256xf32>
    %336 = arith.mulf %335, %334 : vector<2x256xf32>
    %337 = arith.addf %329, %336 : vector<2x256xf32>
    %c0_143 = arith.constant 0 : index
    %c25 = arith.constant 25 : index
    %338 = vector.load %arg3[%c0_143, %c25] : memref<2x49xf32, #tpu.memory_space<vmem>>, vector<2x1xf32>
    %c24_144 = arith.constant 24 : index
    %c0_145 = arith.constant 0 : index
    %339 = vector.load %arg4[%c24_144, %c0_145] : memref<49x256xf32, #tpu.memory_space<vmem>>, vector<1x256xf32>
    %c255_i32_146 = arith.constant 255 : i32
    %340 = tpu.dynamic_rotate %142 by %c255_i32_146 dim 1 : vector<2x256xf32>, i32 -> vector<2x256xf32>
    %341 = vector.broadcast %339 : vector<1x256xf32> to vector<2x256xf32>
    %342 = arith.mulf %341, %340 : vector<2x256xf32>
    %343 = vector.broadcast %338 : vector<2x1xf32> to vector<2x256xf32>
    %344 = arith.mulf %343, %342 : vector<2x256xf32>
    %345 = arith.addf %337, %344 : vector<2x256xf32>
    %c0_147 = arith.constant 0 : index
    %c26 = arith.constant 26 : index
    %346 = vector.load %arg3[%c0_147, %c26] : memref<2x49xf32, #tpu.memory_space<vmem>>, vector<2x1xf32>
    %c25_148 = arith.constant 25 : index
    %c0_149 = arith.constant 0 : index
    %347 = vector.load %arg4[%c25_148, %c0_149] : memref<49x256xf32, #tpu.memory_space<vmem>>, vector<1x256xf32>
    %c254_i32 = arith.constant 254 : i32
    %348 = tpu.dynamic_rotate %142 by %c254_i32 dim 1 : vector<2x256xf32>, i32 -> vector<2x256xf32>
    %349 = vector.broadcast %347 : vector<1x256xf32> to vector<2x256xf32>
    %350 = arith.mulf %349, %348 : vector<2x256xf32>
    %351 = vector.broadcast %346 : vector<2x1xf32> to vector<2x256xf32>
    %352 = arith.mulf %351, %350 : vector<2x256xf32>
    %353 = arith.addf %345, %352 : vector<2x256xf32>
    %c0_150 = arith.constant 0 : index
    %c27 = arith.constant 27 : index
    %354 = vector.load %arg3[%c0_150, %c27] : memref<2x49xf32, #tpu.memory_space<vmem>>, vector<2x1xf32>
    %c26_151 = arith.constant 26 : index
    %c0_152 = arith.constant 0 : index
    %355 = vector.load %arg4[%c26_151, %c0_152] : memref<49x256xf32, #tpu.memory_space<vmem>>, vector<1x256xf32>
    %c253_i32 = arith.constant 253 : i32
    %356 = tpu.dynamic_rotate %142 by %c253_i32 dim 1 : vector<2x256xf32>, i32 -> vector<2x256xf32>
    %357 = vector.broadcast %355 : vector<1x256xf32> to vector<2x256xf32>
    %358 = arith.mulf %357, %356 : vector<2x256xf32>
    %359 = vector.broadcast %354 : vector<2x1xf32> to vector<2x256xf32>
    %360 = arith.mulf %359, %358 : vector<2x256xf32>
    %361 = arith.addf %353, %360 : vector<2x256xf32>
    %c0_153 = arith.constant 0 : index
    %c28 = arith.constant 28 : index
    %362 = vector.load %arg3[%c0_153, %c28] : memref<2x49xf32, #tpu.memory_space<vmem>>, vector<2x1xf32>
    %c27_154 = arith.constant 27 : index
    %c0_155 = arith.constant 0 : index
    %363 = vector.load %arg4[%c27_154, %c0_155] : memref<49x256xf32, #tpu.memory_space<vmem>>, vector<1x256xf32>
    %c243_i32 = arith.constant 243 : i32
    %364 = tpu.dynamic_rotate %142 by %c243_i32 dim 1 : vector<2x256xf32>, i32 -> vector<2x256xf32>
    %365 = vector.broadcast %363 : vector<1x256xf32> to vector<2x256xf32>
    %366 = arith.mulf %365, %364 : vector<2x256xf32>
    %367 = vector.broadcast %362 : vector<2x1xf32> to vector<2x256xf32>
    %368 = arith.mulf %367, %366 : vector<2x256xf32>
    %369 = arith.addf %361, %368 : vector<2x256xf32>
    %c0_156 = arith.constant 0 : index
    %c29_157 = arith.constant 29 : index
    %370 = vector.load %arg3[%c0_156, %c29_157] : memref<2x49xf32, #tpu.memory_space<vmem>>, vector<2x1xf32>
    %c28_158 = arith.constant 28 : index
    %c0_159 = arith.constant 0 : index
    %371 = vector.load %arg4[%c28_158, %c0_159] : memref<49x256xf32, #tpu.memory_space<vmem>>, vector<1x256xf32>
    %c242_i32 = arith.constant 242 : i32
    %372 = tpu.dynamic_rotate %142 by %c242_i32 dim 1 : vector<2x256xf32>, i32 -> vector<2x256xf32>
    %373 = vector.broadcast %371 : vector<1x256xf32> to vector<2x256xf32>
    %374 = arith.mulf %373, %372 : vector<2x256xf32>
    %375 = vector.broadcast %370 : vector<2x1xf32> to vector<2x256xf32>
    %376 = arith.mulf %375, %374 : vector<2x256xf32>
    %377 = arith.addf %369, %376 : vector<2x256xf32>
    %c0_160 = arith.constant 0 : index
    %c30_161 = arith.constant 30 : index
    %378 = vector.load %arg3[%c0_160, %c30_161] : memref<2x49xf32, #tpu.memory_space<vmem>>, vector<2x1xf32>
    %c29_162 = arith.constant 29 : index
    %c0_163 = arith.constant 0 : index
    %379 = vector.load %arg4[%c29_162, %c0_163] : memref<49x256xf32, #tpu.memory_space<vmem>>, vector<1x256xf32>
    %c241_i32_164 = arith.constant 241 : i32
    %380 = tpu.dynamic_rotate %142 by %c241_i32_164 dim 1 : vector<2x256xf32>, i32 -> vector<2x256xf32>
    %381 = vector.broadcast %379 : vector<1x256xf32> to vector<2x256xf32>
    %382 = arith.mulf %381, %380 : vector<2x256xf32>
    %383 = vector.broadcast %378 : vector<2x1xf32> to vector<2x256xf32>
    %384 = arith.mulf %383, %382 : vector<2x256xf32>
    %385 = arith.addf %377, %384 : vector<2x256xf32>
    %c0_165 = arith.constant 0 : index
    %c31_166 = arith.constant 31 : index
    %386 = vector.load %arg3[%c0_165, %c31_166] : memref<2x49xf32, #tpu.memory_space<vmem>>, vector<2x1xf32>
    %c30_167 = arith.constant 30 : index
    %c0_168 = arith.constant 0 : index
    %387 = vector.load %arg4[%c30_167, %c0_168] : memref<49x256xf32, #tpu.memory_space<vmem>>, vector<1x256xf32>
    %c240_i32_169 = arith.constant 240 : i32
    %388 = tpu.dynamic_rotate %142 by %c240_i32_169 dim 1 : vector<2x256xf32>, i32 -> vector<2x256xf32>
    %389 = vector.broadcast %387 : vector<1x256xf32> to vector<2x256xf32>
    %390 = arith.mulf %389, %388 : vector<2x256xf32>
    %391 = vector.broadcast %386 : vector<2x1xf32> to vector<2x256xf32>
    %392 = arith.mulf %391, %390 : vector<2x256xf32>
    %393 = arith.addf %385, %392 : vector<2x256xf32>
    %c0_170 = arith.constant 0 : index
    %c32 = arith.constant 32 : index
    %394 = vector.load %arg3[%c0_170, %c32] : memref<2x49xf32, #tpu.memory_space<vmem>>, vector<2x1xf32>
    %c31_171 = arith.constant 31 : index
    %c0_172 = arith.constant 0 : index
    %395 = vector.load %arg4[%c31_171, %c0_172] : memref<49x256xf32, #tpu.memory_space<vmem>>, vector<1x256xf32>
    %c239_i32_173 = arith.constant 239 : i32
    %396 = tpu.dynamic_rotate %142 by %c239_i32_173 dim 1 : vector<2x256xf32>, i32 -> vector<2x256xf32>
    %397 = vector.broadcast %395 : vector<1x256xf32> to vector<2x256xf32>
    %398 = arith.mulf %397, %396 : vector<2x256xf32>
    %399 = vector.broadcast %394 : vector<2x1xf32> to vector<2x256xf32>
    %400 = arith.mulf %399, %398 : vector<2x256xf32>
    %401 = arith.addf %393, %400 : vector<2x256xf32>
    %c0_174 = arith.constant 0 : index
    %c33 = arith.constant 33 : index
    %402 = vector.load %arg3[%c0_174, %c33] : memref<2x49xf32, #tpu.memory_space<vmem>>, vector<2x1xf32>
    %c32_175 = arith.constant 32 : index
    %c0_176 = arith.constant 0 : index
    %403 = vector.load %arg4[%c32_175, %c0_176] : memref<49x256xf32, #tpu.memory_space<vmem>>, vector<1x256xf32>
    %c238_i32 = arith.constant 238 : i32
    %404 = tpu.dynamic_rotate %142 by %c238_i32 dim 1 : vector<2x256xf32>, i32 -> vector<2x256xf32>
    %405 = vector.broadcast %403 : vector<1x256xf32> to vector<2x256xf32>
    %406 = arith.mulf %405, %404 : vector<2x256xf32>
    %407 = vector.broadcast %402 : vector<2x1xf32> to vector<2x256xf32>
    %408 = arith.mulf %407, %406 : vector<2x256xf32>
    %409 = arith.addf %401, %408 : vector<2x256xf32>
    %c0_177 = arith.constant 0 : index
    %c34 = arith.constant 34 : index
    %410 = vector.load %arg3[%c0_177, %c34] : memref<2x49xf32, #tpu.memory_space<vmem>>, vector<2x1xf32>
    %c33_178 = arith.constant 33 : index
    %c0_179 = arith.constant 0 : index
    %411 = vector.load %arg4[%c33_178, %c0_179] : memref<49x256xf32, #tpu.memory_space<vmem>>, vector<1x256xf32>
    %c237_i32 = arith.constant 237 : i32
    %412 = tpu.dynamic_rotate %142 by %c237_i32 dim 1 : vector<2x256xf32>, i32 -> vector<2x256xf32>
    %413 = vector.broadcast %411 : vector<1x256xf32> to vector<2x256xf32>
    %414 = arith.mulf %413, %412 : vector<2x256xf32>
    %415 = vector.broadcast %410 : vector<2x1xf32> to vector<2x256xf32>
    %416 = arith.mulf %415, %414 : vector<2x256xf32>
    %417 = arith.addf %409, %416 : vector<2x256xf32>
    %c0_180 = arith.constant 0 : index
    %c35 = arith.constant 35 : index
    %418 = vector.load %arg3[%c0_180, %c35] : memref<2x49xf32, #tpu.memory_space<vmem>>, vector<2x1xf32>
    %c34_181 = arith.constant 34 : index
    %c0_182 = arith.constant 0 : index
    %419 = vector.load %arg4[%c34_181, %c0_182] : memref<49x256xf32, #tpu.memory_space<vmem>>, vector<1x256xf32>
    %c227_i32 = arith.constant 227 : i32
    %420 = tpu.dynamic_rotate %142 by %c227_i32 dim 1 : vector<2x256xf32>, i32 -> vector<2x256xf32>
    %421 = vector.broadcast %419 : vector<1x256xf32> to vector<2x256xf32>
    %422 = arith.mulf %421, %420 : vector<2x256xf32>
    %423 = vector.broadcast %418 : vector<2x1xf32> to vector<2x256xf32>
    %424 = arith.mulf %423, %422 : vector<2x256xf32>
    %425 = arith.addf %417, %424 : vector<2x256xf32>
    %c0_183 = arith.constant 0 : index
    %c36 = arith.constant 36 : index
    %426 = vector.load %arg3[%c0_183, %c36] : memref<2x49xf32, #tpu.memory_space<vmem>>, vector<2x1xf32>
    %c35_184 = arith.constant 35 : index
    %c0_185 = arith.constant 0 : index
    %427 = vector.load %arg4[%c35_184, %c0_185] : memref<49x256xf32, #tpu.memory_space<vmem>>, vector<1x256xf32>
    %c226_i32 = arith.constant 226 : i32
    %428 = tpu.dynamic_rotate %142 by %c226_i32 dim 1 : vector<2x256xf32>, i32 -> vector<2x256xf32>
    %429 = vector.broadcast %427 : vector<1x256xf32> to vector<2x256xf32>
    %430 = arith.mulf %429, %428 : vector<2x256xf32>
    %431 = vector.broadcast %426 : vector<2x1xf32> to vector<2x256xf32>
    %432 = arith.mulf %431, %430 : vector<2x256xf32>
    %433 = arith.addf %425, %432 : vector<2x256xf32>
    %c0_186 = arith.constant 0 : index
    %c37 = arith.constant 37 : index
    %434 = vector.load %arg3[%c0_186, %c37] : memref<2x49xf32, #tpu.memory_space<vmem>>, vector<2x1xf32>
    %c36_187 = arith.constant 36 : index
    %c0_188 = arith.constant 0 : index
    %435 = vector.load %arg4[%c36_187, %c0_188] : memref<49x256xf32, #tpu.memory_space<vmem>>, vector<1x256xf32>
    %c225_i32 = arith.constant 225 : i32
    %436 = tpu.dynamic_rotate %142 by %c225_i32 dim 1 : vector<2x256xf32>, i32 -> vector<2x256xf32>
    %437 = vector.broadcast %435 : vector<1x256xf32> to vector<2x256xf32>
    %438 = arith.mulf %437, %436 : vector<2x256xf32>
    %439 = vector.broadcast %434 : vector<2x1xf32> to vector<2x256xf32>
    %440 = arith.mulf %439, %438 : vector<2x256xf32>
    %441 = arith.addf %433, %440 : vector<2x256xf32>
    %c0_189 = arith.constant 0 : index
    %c38 = arith.constant 38 : index
    %442 = vector.load %arg3[%c0_189, %c38] : memref<2x49xf32, #tpu.memory_space<vmem>>, vector<2x1xf32>
    %c37_190 = arith.constant 37 : index
    %c0_191 = arith.constant 0 : index
    %443 = vector.load %arg4[%c37_190, %c0_191] : memref<49x256xf32, #tpu.memory_space<vmem>>, vector<1x256xf32>
    %c224_i32 = arith.constant 224 : i32
    %444 = tpu.dynamic_rotate %142 by %c224_i32 dim 1 : vector<2x256xf32>, i32 -> vector<2x256xf32>
    %445 = vector.broadcast %443 : vector<1x256xf32> to vector<2x256xf32>
    %446 = arith.mulf %445, %444 : vector<2x256xf32>
    %447 = vector.broadcast %442 : vector<2x1xf32> to vector<2x256xf32>
    %448 = arith.mulf %447, %446 : vector<2x256xf32>
    %449 = arith.addf %441, %448 : vector<2x256xf32>
    %c0_192 = arith.constant 0 : index
    %c39 = arith.constant 39 : index
    %450 = vector.load %arg3[%c0_192, %c39] : memref<2x49xf32, #tpu.memory_space<vmem>>, vector<2x1xf32>
    %c38_193 = arith.constant 38 : index
    %c0_194 = arith.constant 0 : index
    %451 = vector.load %arg4[%c38_193, %c0_194] : memref<49x256xf32, #tpu.memory_space<vmem>>, vector<1x256xf32>
    %c223_i32 = arith.constant 223 : i32
    %452 = tpu.dynamic_rotate %142 by %c223_i32 dim 1 : vector<2x256xf32>, i32 -> vector<2x256xf32>
    %453 = vector.broadcast %451 : vector<1x256xf32> to vector<2x256xf32>
    %454 = arith.mulf %453, %452 : vector<2x256xf32>
    %455 = vector.broadcast %450 : vector<2x1xf32> to vector<2x256xf32>
    %456 = arith.mulf %455, %454 : vector<2x256xf32>
    %457 = arith.addf %449, %456 : vector<2x256xf32>
    %c0_195 = arith.constant 0 : index
    %c40 = arith.constant 40 : index
    %458 = vector.load %arg3[%c0_195, %c40] : memref<2x49xf32, #tpu.memory_space<vmem>>, vector<2x1xf32>
    %c39_196 = arith.constant 39 : index
    %c0_197 = arith.constant 0 : index
    %459 = vector.load %arg4[%c39_196, %c0_197] : memref<49x256xf32, #tpu.memory_space<vmem>>, vector<1x256xf32>
    %c222_i32 = arith.constant 222 : i32
    %460 = tpu.dynamic_rotate %142 by %c222_i32 dim 1 : vector<2x256xf32>, i32 -> vector<2x256xf32>
    %461 = vector.broadcast %459 : vector<1x256xf32> to vector<2x256xf32>
    %462 = arith.mulf %461, %460 : vector<2x256xf32>
    %463 = vector.broadcast %458 : vector<2x1xf32> to vector<2x256xf32>
    %464 = arith.mulf %463, %462 : vector<2x256xf32>
    %465 = arith.addf %457, %464 : vector<2x256xf32>
    %c0_198 = arith.constant 0 : index
    %c41 = arith.constant 41 : index
    %466 = vector.load %arg3[%c0_198, %c41] : memref<2x49xf32, #tpu.memory_space<vmem>>, vector<2x1xf32>
    %c40_199 = arith.constant 40 : index
    %c0_200 = arith.constant 0 : index
    %467 = vector.load %arg4[%c40_199, %c0_200] : memref<49x256xf32, #tpu.memory_space<vmem>>, vector<1x256xf32>
    %c221_i32 = arith.constant 221 : i32
    %468 = tpu.dynamic_rotate %142 by %c221_i32 dim 1 : vector<2x256xf32>, i32 -> vector<2x256xf32>
    %469 = vector.broadcast %467 : vector<1x256xf32> to vector<2x256xf32>
    %470 = arith.mulf %469, %468 : vector<2x256xf32>
    %471 = vector.broadcast %466 : vector<2x1xf32> to vector<2x256xf32>
    %472 = arith.mulf %471, %470 : vector<2x256xf32>
    %473 = arith.addf %465, %472 : vector<2x256xf32>
    %c0_201 = arith.constant 0 : index
    %c42 = arith.constant 42 : index
    %474 = vector.load %arg3[%c0_201, %c42] : memref<2x49xf32, #tpu.memory_space<vmem>>, vector<2x1xf32>
    %c41_202 = arith.constant 41 : index
    %c0_203 = arith.constant 0 : index
    %475 = vector.load %arg4[%c41_202, %c0_203] : memref<49x256xf32, #tpu.memory_space<vmem>>, vector<1x256xf32>
    %c211_i32 = arith.constant 211 : i32
    %476 = tpu.dynamic_rotate %142 by %c211_i32 dim 1 : vector<2x256xf32>, i32 -> vector<2x256xf32>
    %477 = vector.broadcast %475 : vector<1x256xf32> to vector<2x256xf32>
    %478 = arith.mulf %477, %476 : vector<2x256xf32>
    %479 = vector.broadcast %474 : vector<2x1xf32> to vector<2x256xf32>
    %480 = arith.mulf %479, %478 : vector<2x256xf32>
    %481 = arith.addf %473, %480 : vector<2x256xf32>
    %c0_204 = arith.constant 0 : index
    %c43 = arith.constant 43 : index
    %482 = vector.load %arg3[%c0_204, %c43] : memref<2x49xf32, #tpu.memory_space<vmem>>, vector<2x1xf32>
    %c42_205 = arith.constant 42 : index
    %c0_206 = arith.constant 0 : index
    %483 = vector.load %arg4[%c42_205, %c0_206] : memref<49x256xf32, #tpu.memory_space<vmem>>, vector<1x256xf32>
    %c210_i32 = arith.constant 210 : i32
    %484 = tpu.dynamic_rotate %142 by %c210_i32 dim 1 : vector<2x256xf32>, i32 -> vector<2x256xf32>
    %485 = vector.broadcast %483 : vector<1x256xf32> to vector<2x256xf32>
    %486 = arith.mulf %485, %484 : vector<2x256xf32>
    %487 = vector.broadcast %482 : vector<2x1xf32> to vector<2x256xf32>
    %488 = arith.mulf %487, %486 : vector<2x256xf32>
    %489 = arith.addf %481, %488 : vector<2x256xf32>
    %c0_207 = arith.constant 0 : index
    %c44 = arith.constant 44 : index
    %490 = vector.load %arg3[%c0_207, %c44] : memref<2x49xf32, #tpu.memory_space<vmem>>, vector<2x1xf32>
    %c43_208 = arith.constant 43 : index
    %c0_209 = arith.constant 0 : index
    %491 = vector.load %arg4[%c43_208, %c0_209] : memref<49x256xf32, #tpu.memory_space<vmem>>, vector<1x256xf32>
    %c209_i32 = arith.constant 209 : i32
    %492 = tpu.dynamic_rotate %142 by %c209_i32 dim 1 : vector<2x256xf32>, i32 -> vector<2x256xf32>
    %493 = vector.broadcast %491 : vector<1x256xf32> to vector<2x256xf32>
    %494 = arith.mulf %493, %492 : vector<2x256xf32>
    %495 = vector.broadcast %490 : vector<2x1xf32> to vector<2x256xf32>
    %496 = arith.mulf %495, %494 : vector<2x256xf32>
    %497 = arith.addf %489, %496 : vector<2x256xf32>
    %c0_210 = arith.constant 0 : index
    %c45 = arith.constant 45 : index
    %498 = vector.load %arg3[%c0_210, %c45] : memref<2x49xf32, #tpu.memory_space<vmem>>, vector<2x1xf32>
    %c44_211 = arith.constant 44 : index
    %c0_212 = arith.constant 0 : index
    %499 = vector.load %arg4[%c44_211, %c0_212] : memref<49x256xf32, #tpu.memory_space<vmem>>, vector<1x256xf32>
    %c208_i32 = arith.constant 208 : i32
    %500 = tpu.dynamic_rotate %142 by %c208_i32 dim 1 : vector<2x256xf32>, i32 -> vector<2x256xf32>
    %501 = vector.broadcast %499 : vector<1x256xf32> to vector<2x256xf32>
    %502 = arith.mulf %501, %500 : vector<2x256xf32>
    %503 = vector.broadcast %498 : vector<2x1xf32> to vector<2x256xf32>
    %504 = arith.mulf %503, %502 : vector<2x256xf32>
    %505 = arith.addf %497, %504 : vector<2x256xf32>
    %c0_213 = arith.constant 0 : index
    %c46 = arith.constant 46 : index
    %506 = vector.load %arg3[%c0_213, %c46] : memref<2x49xf32, #tpu.memory_space<vmem>>, vector<2x1xf32>
    %c45_214 = arith.constant 45 : index
    %c0_215 = arith.constant 0 : index
    %507 = vector.load %arg4[%c45_214, %c0_215] : memref<49x256xf32, #tpu.memory_space<vmem>>, vector<1x256xf32>
    %c207_i32 = arith.constant 207 : i32
    %508 = tpu.dynamic_rotate %142 by %c207_i32 dim 1 : vector<2x256xf32>, i32 -> vector<2x256xf32>
    %509 = vector.broadcast %507 : vector<1x256xf32> to vector<2x256xf32>
    %510 = arith.mulf %509, %508 : vector<2x256xf32>
    %511 = vector.broadcast %506 : vector<2x1xf32> to vector<2x256xf32>
    %512 = arith.mulf %511, %510 : vector<2x256xf32>
    %513 = arith.addf %505, %512 : vector<2x256xf32>
    %c0_216 = arith.constant 0 : index
    %c47 = arith.constant 47 : index
    %514 = vector.load %arg3[%c0_216, %c47] : memref<2x49xf32, #tpu.memory_space<vmem>>, vector<2x1xf32>
    %c46_217 = arith.constant 46 : index
    %c0_218 = arith.constant 0 : index
    %515 = vector.load %arg4[%c46_217, %c0_218] : memref<49x256xf32, #tpu.memory_space<vmem>>, vector<1x256xf32>
    %c206_i32 = arith.constant 206 : i32
    %516 = tpu.dynamic_rotate %142 by %c206_i32 dim 1 : vector<2x256xf32>, i32 -> vector<2x256xf32>
    %517 = vector.broadcast %515 : vector<1x256xf32> to vector<2x256xf32>
    %518 = arith.mulf %517, %516 : vector<2x256xf32>
    %519 = vector.broadcast %514 : vector<2x1xf32> to vector<2x256xf32>
    %520 = arith.mulf %519, %518 : vector<2x256xf32>
    %521 = arith.addf %513, %520 : vector<2x256xf32>
    %c0_219 = arith.constant 0 : index
    %c48 = arith.constant 48 : index
    %522 = vector.load %arg3[%c0_219, %c48] : memref<2x49xf32, #tpu.memory_space<vmem>>, vector<2x1xf32>
    %c47_220 = arith.constant 47 : index
    %c0_221 = arith.constant 0 : index
    %523 = vector.load %arg4[%c47_220, %c0_221] : memref<49x256xf32, #tpu.memory_space<vmem>>, vector<1x256xf32>
    %c205_i32 = arith.constant 205 : i32
    %524 = tpu.dynamic_rotate %142 by %c205_i32 dim 1 : vector<2x256xf32>, i32 -> vector<2x256xf32>
    %525 = vector.broadcast %523 : vector<1x256xf32> to vector<2x256xf32>
    %526 = arith.mulf %525, %524 : vector<2x256xf32>
    %527 = vector.broadcast %522 : vector<2x1xf32> to vector<2x256xf32>
    %528 = arith.mulf %527, %526 : vector<2x256xf32>
    %529 = arith.addf %521, %528 : vector<2x256xf32>
    %530 = vector.shape_cast %529 : vector<2x256xf32> to vector<1x2x256xf32>
    %cst_222 = arith.constant dense<0.000000e+00> : vector<1x256xf32>
    %531 = vector.multi_reduction <add>, %530, %cst_222 [1] : vector<1x2x256xf32> to vector<1x256xf32>
    %532 = vector.shape_cast %531 : vector<1x256xf32> to vector<1x1x256xf32>
    %cst_223 = arith.constant 5.000000e-01 : f32
    %533 = vector.broadcast %cst_223 : f32 to vector<1x1x256xf32>
    %534 = arith.mulf %533, %532 : vector<1x1x256xf32>
    %535 = math.tanh %534 : vector<1x1x256xf32>
    %cst_224 = arith.constant 1.000000e+00 : f32
    %536 = vector.broadcast %cst_224 : f32 to vector<1x1x256xf32>
    %537 = arith.addf %535, %536 : vector<1x1x256xf32>
    %cst_225 = arith.constant 5.000000e-01 : f32
    %538 = vector.broadcast %cst_225 : f32 to vector<1x1x256xf32>
    %539 = arith.mulf %538, %537 : vector<1x1x256xf32>
    %540 = vector.broadcast %539 : vector<1x1x256xf32> to vector<1x16x256xf32>
    %541 = arith.mulf %134, %540 : vector<1x16x256xf32>
    %c0_226 = arith.constant 0 : index
    %c0_227 = arith.constant 0 : index
    %c0_228 = arith.constant 0 : index
    %542 = vector.load %arg1[%c0_226, %c0_227, %c0_228] : memref<1x16x256xf32, #tpu.memory_space<vmem>>, vector<1x16x256xf32>
    %543 = arith.addf %542, %541 : vector<1x16x256xf32>
    %c0_229 = arith.constant 0 : index
    %c0_230 = arith.constant 0 : index
    %c0_231 = arith.constant 0 : index
    %544 = vector.load %arg5[%c0_229, %c0_230, %c0_231] : memref<1x16x256xf32, #tpu.memory_space<vmem>>, vector<1x16x256xf32>
    tpu.vector_store %arg5[%c0_229, %c0_230, %c0_231], %543 {strides = array<i32>} : memref<1x16x256xf32, #tpu.memory_space<vmem>>, vector<1x16x256xf32>,
    return
  }
  func.func @transform_0(%arg0: i32) -> (i32, i32, i32) {
    %c0_i32 = arith.constant 0 : i32
    %c0_i32_0 = arith.constant 0 : i32
    %c0_i32_1 = arith.constant 0 : i32
    return %arg0, %c0_i32, %c0_i32_0 : i32, i32, i32
  }
  func.func @transform_1(%arg0: i32) -> (i32, i32) {
    %c0_i32 = arith.constant 0 : i32
    %c0_i32_0 = arith.constant 0 : i32
    %c0_i32_1 = arith.constant 0 : i32
    return %c0_i32, %c0_i32_0 : i32, i32
  }
  func.func @transform_2(%arg0: i32) -> (i32, i32) {
    %c0_i32 = arith.constant 0 : i32
    %c0_i32_0 = arith.constant 0 : i32
    %c0_i32_1 = arith.constant 0 : i32
    return %c0_i32, %c0_i32_0 : i32, i32
  }
  func.func @transform_3(%arg0: i32) -> (i32, i32) {
    %c0_i32 = arith.constant 0 : i32
    %c0_i32_0 = arith.constant 0 : i32
    %c0_i32_1 = arith.constant 0 : i32
    return %c0_i32, %c0_i32_0 : i32, i32
  }
  func.func @transform_4(%arg0: i32) -> (i32, i32, i32) {
    %c0_i32 = arith.constant 0 : i32
    %c0_i32_0 = arith.constant 0 : i32
    %c0_i32_1 = arith.constant 0 : i32
    return %arg0, %c0_i32, %c0_i32_0 : i32, i32, i32
  }
}

</mosaic_0001>

<bundles_post_ra>
// kernel: tpu_custom_call.1
= control target key start
LH: loop header
LB: loop body
LE: loop exit
PB: predicated region body
PF: predicated region fallthrough
CT: control target
= control target key end

     0   :  { %9 = vsyncpa [#allocation3], 0  ;;  %s5173_s0 = inlined_call_operand.hbm [shape: f32[2,16,256], index: 0, kind: input, shape index: {}]   ;;  %s5174_s1 = inlined_call_operand.vmem [shape: f32[32,15], index: 1, kind: input, shape index: {}]   ;;  %s5175_s2 = inlined_call_operand.vmem [shape: f32[2,49], index: 2, kind: input, shape index: {}]   ;;  %s5176_s3 = inlined_call_operand.hbm [shape: f32[49,256], index: 3, kind: input, shape index: {}]   ;;  %s5177_s4 = inlined_call_operand.hbm [shape: f32[2,16,256], index: 4, kind: output, shape index: {}]  }
   0x1   :  { %11 = vsyncpa [#allocation3 + $0x1], 0 }
   0x2   :  { %12 = vsyncpa [#allocation6], 0 }
   0x3   :  { %13 = vsyncpa [#allocation4], 0 }
   0x4   :  { %15 = vsyncpa [#allocation4 + $0x1], 0  ;;  %s3142_s15 = smov 0   ;;  %s3144_s16 = smov 0  }
   0x5   :  { %s3146_s17 = smov 0   ;;  %s3148_s18 = smov 0  }
   0x6 LB: > { %s3163_s19 = sadd.s32 4294967295, %s3012_s18   ;;  %s2616_s20 = sadd.s32 4294967294, %s3012_s18   ;;  %s3012_s18 = sphi %s3148_s18, %s5512_s18   ;;  %s3008_s17 = sphi %s3146_s17, %s5511_s17   ;;  %s3004_s16 = sphi %s3144_s16, %s5510_s16   ;;  %s3000_s15 = sphi %s3142_s15, %s5509_s15  }
   0x7   : > { %p41_p0 = scmp.ne.s32.totalorder %s3004_s16, %s3000_s15  ;;  %p5178_p1 = scmp.eq.s32.totalorder %s3163_s19, 0 }
   0x8   : > { %p134_p3 = scmp.eq.s32.totalorder %s2616_s20, 1  ;;  %p2617_p5 = scmp.ge.s32.totalorder %s3012_s18, 1 }
   0x9   : > { %p3172_p4 = por %p5178_p1, %p41_p0  ;;  %p141_p7 = scmp.lt.s32.totalorder %s3012_s18, 3 }
   0xa   : > { %p3177_p6 = por %p134_p3, %p41_p0  ;;  %s3014_s24 = smov [#allocation5]  }
   0xb   : > { %s5292_s21 = scalar_select %p3172_p4, 1, 0 }
   0xc   : > { %s5293_s22 = scalar_select %p3177_p6, 1, 0 }
   0xd   : > { %p3182_p8 = pnand %p2617_p5, %p141_p7  ;;  %s159_s25 = sshll.u32 %s3014_s24, 4  ;;  %s3186_s25 = int_to_ptr.vmem [resolvable:$true] %s159_s25 }
   0xe   : > { %s3198_s27 = sadd.s32 1, %s3012_s18   ;;  %s28_s28 = sadd.s32 1, %s3008_s17 }
   0xf   : > { %s5294_s23 = scalar_select %p3182_p8, 1, 0 }
  0x10   : > { %p2642_p9 = pneg %p3182_p8  ;;  %s25_s29 = ssub.s32 %s3012_s18, %s3198_s27 }
  0x11   : > { %s2884_s6 = scalar_lea.hbm %s5176_s3, 1792 }
  0x12   : > { %p3193_p11 = pnand %p2642_p9, %p5178_p1  ;;  %p2885_p12 = scmp.ne.s32.totalorder %s5176_s3, %s2884_s6 }
  0x13   : > { %p2891_p5 = scmp.lt.u32.totalorder %s2884_s6, %s5176_s3 }
  0x14   : > { %p2886_p13 = pneg %p3193_p11 }
  0x16   : > { %p2887_p0 = pnand %p2886_p13, %p2885_p12 }
  0x18   : > { %p2888_p3 = pneg %p2887_p0 }
  0x1a   : > { %p2893_p7 = pnand %p2891_p5, %p2888_p3 }
  0x1c   : > { %2896 = shalt.err (!%p2893_p7)
}
  0x1d   : > { %s2897_s11 = scalar_lea.vmem %s3186_s25, 1792  ;;  %p2905_p2 = scmp.lt.s32.totalorder %s3186_s25, %s3186_s25 }
  0x1e   : > { %p2898_p9 = scmp.ne.s32.totalorder %s3186_s25, %s2897_s11  ;;  %p2906_p6 = scmp.lt.s32.totalorder %s2897_s11, %s2897_s11 }
  0x20   : > { %p2900_p10 = pnand %p2898_p9, %p2886_p13  ;;  %p2907_p4 = por %p2906_p6, %p2905_p2 }
  0x22   : > { %p2901_p1 = pneg %p2900_p10 }
  0x24   : > { %p2908_p8 = pnand %p2907_p4, %p2901_p1 }
  0x26   : > { %2911 = shalt.err (!%p2908_p8)
}
  0x27   : > { %s3015_s12 = smov 256   ;;  %s3016_s13 = smov 16  }
  0x28   : > { %2645 = dma.hbm_to_vmem [thread:$0]  (!%p3193_p11), %s5176_s3, 1792, %s3186_s25, [#allocation6], %s3015_s12, %s3015_s12, %s3016_s13  }
  0x29   : > { %p26_p1 = scmp.eq.s32.totalorder %s25_s29, 0  ;;  %p35_p2 = scmp.ne.s32.totalorder %s3008_s17, %s3004_s16 }
  0x2a   : > { %p36_p4 = scmp.eq.s32.totalorder %s3012_s18, 0  ;;  %p2655_p6 = scmp.lt.s32.totalorder %s3012_s18, 2 }
  0x2b   : > { %s3232_s24 = scalar_select %p26_p1, %s3008_s17, %s28_s28  }
  0x2c   : > { %p37_p8 = por %p36_p4, %p35_p2  ;;  %p5296_p10 = scmp.eq.s32.totalorder %s3163_s19, 1 }
  0x2d   : > { %s173_s26 = sand.u32 1, %s3008_s17   ;;  %s2632_s5 = sshll.u32 %s3012_s18, 9 }
  0x2e   : > { %p3236_p12 = por %p5296_p10, %p35_p2  ;;  %s2620_s6 = sshll.u32 %s173_s26, 5 }
  0x2f   : > { %s3245_s9 = scalar_lea.hbm %s5173_s0, %s2632_s5  ;;  %s177_s25 = scalar_lea.vmem [#allocation2], %s2620_s6 }
  0x30   : > { %s184_s28 = sshll.u32 %s177_s25, 4  ;;  %p3247_p11 = pnand %p2655_p6, %p37_p8  ;;  %s3251_s28 = int_to_ptr.vmem [resolvable:$true] %s184_s28 }
  0x31   : > { %s3253_s10 = scalar_lea.sflag [#allocation3], %s173_s26  ;;  %s2912_s11 = scalar_lea.hbm %s3245_s9, 512 }
  0x32   : > { %p2913_p13 = scmp.ne.s32.totalorder %s3245_s9, %s2912_s11  ;;  %p2914_p0 = pneg %p3247_p11 }
  0x33   : > { %s2917_s5 = scalar_lea.hbm %s5173_s0, 1024  ;;  %p2918_p7 = scmp.lt.u32.totalorder %s3245_s9, %s5173_s0 }
  0x34   : > { %p2915_p3 = pnand %p2914_p0, %p2913_p13  ;;  %p2919_p9 = scmp.lt.u32.totalorder %s2917_s5, %s2912_s11 }
  0x35   : > { %p2921_p2 = scmp.lt.u32.totalorder %s2912_s11, %s3245_s9 }
  0x36   : > { %p2916_p5 = pneg %p2915_p3  ;;  %p2920_p1 = por %p2919_p9, %p2918_p7 }
  0x38   : > { %p2922_p4 = por %p2921_p2, %p2920_p1 }
  0x3a   : > { %p2923_p6 = pnand %p2922_p4, %p2916_p5 }
  0x3c   : > { %2926 = shalt.err (!%p2923_p6)
}
  0x3d   : > { %s2927_s26 = scalar_lea.vmem %s3251_s28, 512  ;;  %s3017_s8 = smov [#allocation2]  }
  0x3e   : > { %p2928_p8 = scmp.ne.s32.totalorder %s3251_s28, %s2927_s26  ;;  %s2932_s25 = sshll.u32 %s3017_s8, 4  ;;  %s2933_s25 = int_to_ptr.vmem [resolvable:$false] %s2932_s25 }
  0x3f   : > { %s2934_s14 = scalar_lea.vmem %s2933_s25, 1024  ;;  %p2935_p3 = scmp.lt.s32.totalorder %s3251_s28, %s2933_s25 }
  0x40   : > { %p2930_p10 = pnand %p2928_p8, %p2914_p0  ;;  %p2936_p7 = scmp.lt.s32.totalorder %s2934_s14, %s2927_s26 }
  0x42   : > { %p2931_p13 = pneg %p2930_p10  ;;  %p2937_p9 = por %p2936_p7, %p2935_p3 }
  0x44   : > { %p2938_p1 = pnand %p2937_p9, %p2931_p13 }
  0x46   : > { %2941 = shalt.err (!%p2938_p1)
}
  0x47   : > { %2649 = dma.hbm_to_vmem [thread:$0]  (!%p3247_p11), %s3245_s9, 512, %s3251_s28, %s3253_s10, %s3015_s12, %s3015_s12, %s3016_s13  }
  0x48   : > { %p5299_p0 = scmp.ne.s32.totalorder %s5294_s23, 0 }
  0x4a   : > { %196 = sbr.rel (%p5299_p0) target bundleno = 1434 (0x59a), region = 36 }
  0x51   : > { %s3287_s11 = sand.u32 1, %s3004_s16   ;;  %p5300_p5 = scmp.ne.s32.totalorder %s5292_s21, 0 }
  0x52   : > { %s2624_s20 = sshll.u32 %s3287_s11, 5  ;;  %s199_s5 = scalar_lea.sflag [#allocation3], %s3287_s11 }
  0x53   : > { %s3293_s29 = scalar_lea.vmem [#allocation2], %s2624_s20 }
  0x54   : > { %2987 = dma.done.wait (%p5300_p5), %s199_s5, 512  }
  0x55   : > { %2989 = vsyncadd (%p5300_p5), %s199_s5, 4294966784  ;;  %p5301_p11 = scmp.eq.s32.totalorder %s3163_s19, 0 }
  0x57   : > { %2991 = dma.done.wait (%p5301_p11), [#allocation6], 1792   ;;  %p5302_p2 = pmov %p5301_p11 }
  0x58   : > { %v5191_v0 = vmov 0   ;;  %v3308_v1 = vld [vmem:[%s5174_s1 + $0x10] sm:$0xff]  ;;  %v3313_v2 = vld [vmem:[%s5174_s1] sm:$0xff]  ;;  %v3320_v3 = vld [vmem:[%s5174_s1 + $0x18] sm:$0xff]  ;;  %v5189_v5 = vmov 1   ;;  %v5185_v6 = vmov 9  }
  0x59   : > { %2993 = vsyncadd (%p5302_p2), [#allocation6], 4294965504  ;;  %2792 = vset.pattern.permute.xlu1 %v5191_v0  ;;  %2791 = vset.pattern.permute.xlu0 %v5191_v0  ;;  %v3325_v4 = vld [vmem:[%s5174_s1 + $0x8] sm:$0xff]  ;;  %v5190_v7 = vmov 5   ;;  %v5188_v8 = vmov 6   ;;  %v5187_v9 = vmov 7  }
  0x5a   : > { %251 = vperm.xlu1 %2792, %v3308_v1   ;;  %241 = vperm.xlu0 %2791, %v3313_v2   ;;  %v5186_v10 = vmov 8   ;;  %v5184_v11 = vmov 10   ;;  %v231_v16 = vld [vmem:[%s3293_s29] sm:$0xff]  ;;  %v233_v17 = vld [vmem:[%s3293_s29 + $0x10] sm:$0xff]  ;;  %v232_v20 = vld [vmem:[%s3293_s29 + $0x8] sm:$0xff]  ;;  %s3026_s7 = smov 17  }
  0x5b   : > { %v234_v23 = vld [vmem:[%s3293_s29 + $0x18] sm:$0xff]  ;;  %s3027_s26 = smov 16   ;;  %s3028_s8 = smov 15   ;;  %vm1065_vm8 = vcmask 121968   ;;  %vm1146_vm9 = vcmask 1040384  }
  0x5c   : > { %s3029_s25 = smov 1   ;;  %s3030_s14 = smov 127  }
  0x5d   : > { %s3031_s5 = smov 113   ;;  %s3033_s23 = smov 112  }
  0x5e   : > { %256 = vperm.xlu1 %2792, %v3320_v3   ;;  %246 = vperm.xlu0 %2791, %v3325_v4   ;;  %s3035_s12 = smov 111   ;;  %s3065_s10 = smov 49  }
  0x5f   : > { %s3066_s6 = smov 51   ;;  %s3068_s13 = smov 50  }
  0x60   : > { %s3070_s9 = smov 48   ;;  %s3073_s21 = smov 47  }
  0x61   : > { %s3076_s28 = smov 46  }
  0x62   : > { %2794 = vset.pattern.permute.xlu1 %v5189_v5  ;;  %2793 = vset.pattern.permute.xlu0 %v5189_v5 }
  0x63   : > { %272 = vperm.xlu1 %2794, %v3325_v4   ;;  %268 = vperm.xlu0 %2793, %v3313_v2  }
  0x67   : > { %276 = vperm.xlu1 %2794, %v3308_v1   ;;  %280 = vperm.xlu0 %2793, %v3320_v3  }
  0x6b   : > { %2795 = vset.pattern.permute.xlu1 %v5185_v6  ;;  %2796 = vset.pattern.permute.xlu0 %v5185_v6 }
  0x6c   : > { %308 = vperm.xlu1 %2795, %v3313_v2   ;;  %312 = vperm.xlu0 %2796, %v3325_v4  }
  0x70   : > { %316 = vperm.xlu1 %2795, %v3308_v1   ;;  %2797 = vset.pattern.permute.xlu0 %v5190_v7 }
  0x71   : > { %380 = vperm.xlu0 %2797, %v3313_v2  }
  0x74   : > { %320 = vperm.xlu1 %2795, %v3320_v3  }
  0x75   : > { %392 = vperm.xlu0 %2797, %v3320_v3  }
  0x78   : > { %2798 = vset.pattern.permute.xlu1 %v5190_v7 }
  0x79   : > { %384 = vperm.xlu1 %2798, %v3325_v4   ;;  %2800 = vset.pattern.permute.xlu0 %v5188_v8 }
  0x7a   : > { %462 = vperm.xlu0 %2800, %v3325_v4  }
  0x7d   : > { %388 = vperm.xlu1 %2798, %v3308_v1  }
  0x7e   : > { %2801 = vset.pattern.permute.xlu0 %v5187_v9 }
  0x7f   : > { %536 = vperm.xlu0 %2801, %v3313_v2  }
  0x81   : > { %2799 = vset.pattern.permute.xlu1 %v5188_v8 }
  0x82   : > { %458 = vperm.xlu1 %2799, %v3313_v2  }
  0x83   : > { %548 = vperm.xlu0 %2801, %v3320_v3  }
  0x86   : > { %466 = vperm.xlu1 %2799, %v3308_v1  }
  0x87   : > { %2804 = vset.pattern.permute.xlu0 %v5186_v10 }
  0x88   : > { %618 = vperm.xlu0 %2804, %v3325_v4  }
  0x8a   : > { %470 = vperm.xlu1 %2799, %v3320_v3  }
  0x8c   : > { %2805 = vset.pattern.permute.xlu0 %v5184_v11 }
  0x8e   : > { %2802 = vset.pattern.permute.xlu1 %v5187_v9 }
  0x8f   : > { %540 = vperm.xlu1 %2802, %v3325_v4  }
  0x93   : > { %544 = vperm.xlu1 %2802, %v3308_v1  }
  0x97   : > { %2803 = vset.pattern.permute.xlu1 %v5186_v10  ;;  %v3039_v10 = vmov 2  }
  0x98   : > { %614 = vperm.xlu1 %2803, %v3313_v2  }
  0x9c   : > { %622 = vperm.xlu1 %2803, %v3308_v1  }
  0xa0   : > { %626 = vperm.xlu1 %2803, %v3320_v3  }
  0xa4   : > { %2806 = vset.pattern.permute.xlu1 %v5184_v11 }
  0xd9   : > { %v252_v12 = vpop.permute.xlu1 %251  ;;  %v242_v13 = vpop.permute.xlu0 %241 }
  0xda   : > { %v259_v18 = vmul.f32 %v242_v13, %v231_v16  ;;  %v263_v26 = vmul.f32 %v252_v12, %v231_v16  ;;  %v260_v27 = vmul.f32 %v242_v13, %v232_v20  ;;  %v264_v40 = vmul.f32 %v252_v12, %v232_v20 }
  0xdb   : > { %v5183_v16 = vmov 11  }
  0xdd   : > { %v257_v14 = vpop.permute.xlu1 %256  ;;  %v247_v15 = vpop.permute.xlu0 %246 }
  0xde   : > { %v261_v19 = vmul.f32 %v247_v15, %v233_v17  ;;  %v265_v30 = vmul.f32 %v257_v14, %v233_v17  ;;  %v262_v31 = vmul.f32 %v247_v15, %v234_v23  ;;  %v266_v42 = vmul.f32 %v257_v14, %v234_v23 }
  0xe2   : > { %v273_v21 = vpop.permute.xlu1 %272  ;;  %v269_v22 = vpop.permute.xlu0 %268 }
  0xe3   : > { %v285_v24 = vadd.f32 %v273_v21, %v261_v19  ;;  %v283_v25 = vadd.f32 %v269_v22, %v259_v18  ;;  %v284_v35 = vadd.f32 %v269_v22, %v260_v27  ;;  %v286_v38 = vadd.f32 %v273_v21, %v262_v31 }
  0xe5   : > { %v293_v28 = vmul.f32 0.1, %v285_v24  ;;  %v291_v29 = vmul.f32 0.1, %v283_v25  ;;  %v292_v44 = vmul.f32 0.1, %v284_v35 }
  0xe6   : > { %v277_v32 = vpop.permute.xlu1 %276  ;;  %v281_v33 = vpop.permute.xlu0 %280  ;;  %v294_v47 = vmul.f32 0.1, %v286_v38 }
  0xe7   : > { %v3371_v34 = vmax.f32 %v285_v24, %v293_v28  ;;  %v3373_v36 = vmax.f32 %v283_v25, %v291_v29  ;;  %v287_v37 = vadd.f32 %v277_v32, %v263_v26  ;;  %v289_v39 = vadd.f32 %v281_v33, %v265_v30 }
  0xe8   : > { %v288_v45 = vadd.f32 %v277_v32, %v264_v40  ;;  %v290_v48 = vadd.f32 %v281_v33, %v266_v42  ;;  %v3387_v50 = vmax.f32 %v284_v35, %v292_v44  ;;  %v3389_v52 = vmax.f32 %v286_v38, %v294_v47 }
  0xe9   : > { %v295_v41 = vmul.f32 0.1, %v287_v37  ;;  %335 = vrot.lane.b32.xlu1 %v3371_v34, %s3026_s7  ;;  %333 = vrot.lane.b32.xlu0 %v3373_v36, %s3026_s7  ;;  %v297_v43 = vmul.f32 0.1, %v289_v39  ;;  %v5182_v25 = vmov 12   ;;  %v5181_v38 = vmov 13  }
  0xea   : > { %v296_v51 = vmul.f32 0.1, %v288_v45  ;;  %v298_v53 = vmul.f32 0.1, %v290_v48 }
  0xeb   : > { %v3379_v46 = vmax.f32 %v287_v37, %v295_v41  ;;  %v3381_v49 = vmax.f32 %v289_v39, %v297_v43  ;;  %v3427_v56 = vpop.permute.xlu1 %308  ;;  %v3477_v63 = vpop.permute.xlu0 %312 }
  0xec   : > { %v3395_v54 = vmax.f32 %v288_v45, %v296_v51  ;;  %v3397_v55 = vmax.f32 %v290_v48, %v298_v53  ;;  %v5200_v53 = vmov 3  }
  0xed   : > { %337 = vrot.lane.b32.xlu0 %v3379_v46, %s3026_s7  ;;  %339 = vrot.lane.b32.xlu1 %v3381_v49, %s3026_s7 }
  0xef   : > { %v3433_v57 = vpop.permute.xlu1 %316 }
  0xf0   : > { %v3485_v13 = vpop.permute.xlu0 %380 }
  0xf1   : > { %341 = vrot.lane.b32.xlu0 %v3387_v50, %s3026_s7  ;;  %343 = vrot.lane.b32.xlu1 %v3389_v52, %s3026_s7 }
  0xf3   : > { %v3443_v58 = vpop.permute.xlu1 %320 }
  0xf4   : > { %v3492_v15 = vpop.permute.xlu0 %392 }
  0xf5   : > { %345 = vrot.lane.b32.xlu0 %v3395_v54, %s3026_s7  ;;  %347 = vrot.lane.b32.xlu1 %v3397_v55, %s3026_s7 }
  0xf8   : > { %v3449_v59 = vpop.permute.xlu1 %384 }
  0xf9   : > { %415 = vrot.lane.b32.xlu0 %v3371_v34, %s3027_s26  ;;  %413 = vrot.lane.b32.xlu1 %v3373_v36, %s3027_s26  ;;  %v3502_v18 = vpop.permute.xlu0 %462 }
  0xfc   : > { %v3457_v60 = vpop.permute.xlu1 %388 }
  0xfd   : > { %419 = vrot.lane.b32.xlu0 %v3381_v49, %s3027_s26  ;;  %417 = vrot.lane.b32.xlu1 %v3379_v46, %s3027_s26 }
  0xfe   : > { %v3513_v20 = vpop.permute.xlu0 %536 }
 0x101   : > { %423 = vrot.lane.b32.xlu0 %v3389_v52, %s3027_s26  ;;  %421 = vrot.lane.b32.xlu1 %v3387_v50, %s3027_s26  ;;  %v3465_v61 = vpop.permute.xlu1 %458 }
 0x102   : > { %v3523_v22 = vpop.permute.xlu0 %548 }
 0x103   : > { %5307 = vst [vmem:[#allocation15_spill] sm:$0xff] %v3523_v22 }
 0x105   : > { %427 = vrot.lane.b32.xlu0 %v3397_v55, %s3027_s26  ;;  %425 = vrot.lane.b32.xlu1 %v3395_v54, %s3027_s26  ;;  %v3473_v62 = vpop.permute.xlu1 %466 }
 0x107   : > { %v3531_v24 = vpop.permute.xlu0 %618 }
 0x108   : > { %5309 = vst [vmem:[#allocation17_spill] sm:$0xff] %v3531_v24 }
 0x109   : > { %491 = vrot.lane.b32.xlu0 %v3373_v36, %s3028_s8  ;;  %493 = vrot.lane.b32.xlu1 %v3371_v34, %s3028_s8  ;;  %v3483_v12 = vpop.permute.xlu1 %470 }
 0x10d   : > { %495 = vrot.lane.b32.xlu0 %v3379_v46, %s3028_s8  ;;  %497 = vrot.lane.b32.xlu1 %v3381_v49, %s3028_s8 }
 0x10e   : > { %v3490_v14 = vpop.permute.xlu1 %540 }
 0x10f   : > { %5303 = vst [vmem:[#allocation11_spill] sm:$0xff] %v3490_v14 }
 0x111   : > { %499 = vrot.lane.b32.xlu0 %v3387_v50, %s3028_s8  ;;  %501 = vrot.lane.b32.xlu1 %v3389_v52, %s3028_s8 }
 0x112   : > { %v3500_v17 = vpop.permute.xlu1 %544 }
 0x113   : > { %5304 = vst [vmem:[#allocation12_spill] sm:$0xff] %v3500_v17 }
 0x115   : > { %503 = vrot.lane.b32.xlu0 %v3395_v54, %s3028_s8  ;;  %505 = vrot.lane.b32.xlu1 %v3397_v55, %s3028_s8 }
 0x117   : > { %v3511_v19 = vpop.permute.xlu1 %614 }
 0x118   : > { %5305 = vst [vmem:[#allocation13_spill] sm:$0xff] %v3511_v19 }
 0x119   : > { %571 = vrot.lane.b32.xlu0 %v3371_v34, %s3029_s25  ;;  %569 = vrot.lane.b32.xlu1 %v3373_v36, %s3029_s25 }
 0x11b   : > { %v3521_v21 = vpop.permute.xlu1 %622 }
 0x11c   : > { %5306 = vst [vmem:[#allocation14_spill] sm:$0xff] %v3521_v21 }
 0x11d   : > { %575 = vrot.lane.b32.xlu0 %v3381_v49, %s3029_s25  ;;  %573 = vrot.lane.b32.xlu1 %v3379_v46, %s3029_s25 }
 0x11f   : > { %v3529_v23 = vpop.permute.xlu1 %626 }
 0x120   : > { %5308 = vst [vmem:[#allocation16_spill] sm:$0xff] %v3529_v23 }
 0x121   : > { %579 = vrot.lane.b32.xlu0 %v3389_v52, %s3029_s25  ;;  %577 = vrot.lane.b32.xlu1 %v3387_v50, %s3029_s25 }
 0x125   : > { %583 = vrot.lane.b32.xlu0 %v3397_v55, %s3029_s25  ;;  %581 = vrot.lane.b32.xlu1 %v3395_v54, %s3029_s25 }
 0x129   : > { %647 = vrot.lane.b32.xlu0 %v3373_v36, %s3030_s14  ;;  %649 = vrot.lane.b32.xlu1 %v3371_v34, %s3030_s14 }
 0x12d   : > { %651 = vrot.lane.b32.xlu0 %v3379_v46, %s3030_s14  ;;  %653 = vrot.lane.b32.xlu1 %v3381_v49, %s3030_s14 }
 0x131   : > { %655 = vrot.lane.b32.xlu0 %v3387_v50, %s3030_s14  ;;  %657 = vrot.lane.b32.xlu1 %v3389_v52, %s3030_s14 }
 0x135   : > { %659 = vrot.lane.b32.xlu0 %v3395_v54, %s3030_s14  ;;  %661 = vrot.lane.b32.xlu1 %v3397_v55, %s3030_s14 }
 0x139   : > { %692 = vperm.xlu0 %2805, %v3313_v2   ;;  %696 = vperm.xlu1 %2806, %v3325_v4  }
 0x13d   : > { %704 = vperm.xlu0 %2805, %v3320_v3   ;;  %700 = vperm.xlu1 %2806, %v3308_v1  }
 0x141   : > { %727 = vrot.lane.b32.xlu0 %v3371_v34, %s3031_s5  ;;  %725 = vrot.lane.b32.xlu1 %v3373_v36, %s3031_s5 }
 0x142   : > { %2808 = vset.pattern.permute.xlu0 %v5183_v16  ;;  %2807 = vset.pattern.permute.xlu1 %v5183_v16  ;;  %v5192_v16 = vmov 4  }
 0x145   : > { %731 = vrot.lane.b32.xlu0 %v3381_v49, %s3031_s5  ;;  %729 = vrot.lane.b32.xlu1 %v3379_v46, %s3031_s5 }
 0x149   : > { %735 = vrot.lane.b32.xlu0 %v3389_v52, %s3031_s5  ;;  %733 = vrot.lane.b32.xlu1 %v3387_v50, %s3031_s5 }
 0x14d   : > { %739 = vrot.lane.b32.xlu0 %v3397_v55, %s3031_s5  ;;  %737 = vrot.lane.b32.xlu1 %v3395_v54, %s3031_s5 }
 0x151   : > { %774 = vperm.xlu0 %2808, %v3325_v4   ;;  %770 = vperm.xlu1 %2807, %v3313_v2  }
 0x155   : > { %803 = vrot.lane.b32.xlu0 %v3373_v36, %s3033_s23  ;;  %778 = vperm.xlu1 %2807, %v3308_v1  }
 0x156   : > { %2809 = vset.pattern.permute.xlu0 %v5182_v25 }
 0x159   : > { %807 = vrot.lane.b32.xlu0 %v3379_v46, %s3033_s23  ;;  %782 = vperm.xlu1 %2807, %v3320_v3  }
 0x15b   : > { %v3538_v26 = vpop.permute.xlu1 %335  ;;  %v3540_v27 = vpop.permute.xlu0 %333 }
 0x15d   : > { %811 = vrot.lane.b32.xlu0 %v3387_v50, %s3033_s23  ;;  %805 = vrot.lane.b32.xlu1 %v3371_v34, %s3033_s23 }
 0x15e   : > { %2810 = vset.pattern.permute.xlu1 %v5182_v25 }
 0x15f   : > { %v3546_v28 = vpop.permute.xlu0 %337  ;;  %v3549_v29 = vpop.permute.xlu1 %339 }
 0x161   : > { %815 = vrot.lane.b32.xlu0 %v3395_v54, %s3033_s23  ;;  %809 = vrot.lane.b32.xlu1 %v3381_v49, %s3033_s23 }
 0x163   : > { %v3555_v30 = vpop.permute.xlu0 %341  ;;  %v3557_v31 = vpop.permute.xlu1 %343 }
 0x165   : > { %848 = vperm.xlu0 %2809, %v3313_v2   ;;  %813 = vrot.lane.b32.xlu1 %v3389_v52, %s3033_s23 }
 0x167   : > { %v3562_v32 = vpop.permute.xlu0 %345  ;;  %v3564_v33 = vpop.permute.xlu1 %347 }
 0x169   : > { %860 = vperm.xlu0 %2809, %v3320_v3   ;;  %817 = vrot.lane.b32.xlu1 %v3397_v55, %s3033_s23 }
 0x16b   : > { %v3569_v35 = vpop.permute.xlu0 %415  ;;  %v3571_v37 = vpop.permute.xlu1 %413 }
 0x16d   : > { %883 = vrot.lane.b32.xlu0 %v3371_v34, %s3035_s12  ;;  %852 = vperm.xlu1 %2810, %v3325_v4  }
 0x16e   : > { %2812 = vset.pattern.permute.xlu0 %v5181_v38 }
 0x16f   : > { %v3577_v39 = vpop.permute.xlu0 %419  ;;  %v3579_v40 = vpop.permute.xlu1 %417 }
 0x171   : > { %887 = vrot.lane.b32.xlu0 %v3381_v49, %s3035_s12  ;;  %856 = vperm.xlu1 %2810, %v3308_v1  }
 0x173   : > { %v3584_v41 = vpop.permute.xlu0 %423  ;;  %v3586_v42 = vpop.permute.xlu1 %421 }
 0x175   : > { %891 = vrot.lane.b32.xlu0 %v3389_v52, %s3035_s12  ;;  %881 = vrot.lane.b32.xlu1 %v3373_v36, %s3035_s12 }
 0x176   : > { %2811 = vset.pattern.permute.xlu1 %v5181_v38 }
 0x177   : > { %v3592_v43 = vpop.permute.xlu0 %427  ;;  %v3595_v44 = vpop.permute.xlu1 %425 }
 0x179   : > { %895 = vrot.lane.b32.xlu0 %v3397_v55, %s3035_s12  ;;  %885 = vrot.lane.b32.xlu1 %v3379_v46, %s3035_s12 }
 0x17b   : > { %v3601_v45 = vpop.permute.xlu0 %491  ;;  %v3603_v47 = vpop.permute.xlu1 %493 }
 0x17d   : > { %930 = vperm.xlu0 %2812, %v3325_v4   ;;  %889 = vrot.lane.b32.xlu1 %v3387_v50, %s3035_s12 }
 0x17f   : > { %v3608_v48 = vpop.permute.xlu0 %495  ;;  %v3610_v51 = vpop.permute.xlu1 %497 }
 0x181   : > { %2815 = vset.pattern.permute.xlu0 %v5200_v53  ;;  %893 = vrot.lane.b32.xlu1 %v3395_v54, %s3035_s12 }
 0x182   : > { %1006 = vperm.xlu0 %2815, %v3325_v4  }
 0x183   : > { %v3616_v38 = vpop.permute.xlu0 %499  ;;  %v3618_v25 = vpop.permute.xlu1 %501 }
 0x185   : > { %926 = vperm.xlu1 %2811, %v3313_v2  }
 0x186   : > { %2816 = vset.pattern.permute.xlu0 %v5192_v16 }
 0x187   : > { %1030 = vperm.xlu0 %2816, %v3313_v2   ;;  %v3623_v11 = vpop.permute.xlu0 %503  ;;  %v3625_v6 = vpop.permute.xlu1 %505 }
 0x189   : > { %934 = vperm.xlu1 %2811, %v3308_v1  }
 0x18b   : > { %2817 = vset.pattern.permute.xlu0 %v3039_v10  ;;  %v3628_v9 = vpop.permute.xlu0 %571  ;;  %v3630_v8 = vpop.permute.xlu1 %569 }
 0x18c   : > { %5310 = vst [vmem:[#allocation18_spill] sm:$0xff] %v3630_v8  ;;  %958 = vperm.xlu0 %2817, %v3313_v2  }
 0x18d   : > { %938 = vperm.xlu1 %2811, %v3320_v3  }
 0x18f   : > { %v3634_v5 = vpop.permute.xlu0 %575  ;;  %v3637_v7 = vpop.permute.xlu1 %573 }
 0x190   : > { %5311 = vst [vmem:[#allocation19_spill] sm:$0xff] %v3634_v5  ;;  %970 = vperm.xlu0 %2817, %v3320_v3   ;;  %5312 = vst [vmem:[#allocation20_spill] sm:$0xff] %v3637_v7  ;;  %v5319_v7 = vmov 4  }
 0x191   : > { %2813 = vset.pattern.permute.xlu1 %v3039_v10 }
 0x192   : > { %962 = vperm.xlu1 %2813, %v3325_v4  }
 0x193   : > { %v3640_v0 = vpop.permute.xlu0 %579  ;;  %v3642_v16 = vpop.permute.xlu1 %577 }
 0x194   : > { %5313 = vst [vmem:[#allocation21_spill] sm:$0xff] %v3642_v16 }
 0x196   : > { %966 = vperm.xlu1 %2813, %v3308_v1  }
 0x197   : > { %v3646_v21 = vpop.permute.xlu0 %583  ;;  %v3649_v23 = vpop.permute.xlu1 %581 }
 0x198   : > { %5314 = vst [vmem:[#allocation22_spill] sm:$0xff] %v3646_v21  ;;  %5315 = vst [vmem:[#allocation23_spill] sm:$0xff] %v3649_v23  ;;  %v326_v21 = vmul.f32 %v3477_v63, %v3389_v52 }
 0x19a   : > { %2814 = vset.pattern.permute.xlu1 %v5200_v53 }
 0x19b   : > { %1001 = vperm.xlu1 %2814, %v3313_v2   ;;  %v3652_v19 = vpop.permute.xlu0 %647  ;;  %v3654_v10 = vpop.permute.xlu1 %649 }
 0x19c   : > { %5316 = vst [vmem:[#allocation24_spill] sm:$0xff] %v3652_v19  ;;  %5317 = vst [vmem:[#allocation25_spill] sm:$0xff] %v3654_v10 }
 0x19f   : > { %1014 = vperm.xlu1 %2814, %v3308_v1   ;;  %v3657_v24 = vpop.permute.xlu0 %651  ;;  %v3660_v17 = vpop.permute.xlu1 %653 }
 0x1a0   : > { %5318 = vst [vmem:[#allocation26_spill] sm:$0xff] %v3657_v24  ;;  %5320 = vst [vmem:[#allocation27_spill] sm:$0xff] %v3660_v17 }
 0x1a3   : > { %1018 = vperm.xlu1 %2814, %v3320_v3   ;;  %v3663_v53 = vpop.permute.xlu0 %655  ;;  %v3665_v2 = vpop.permute.xlu1 %657 }
 0x1a4   : > { %5321 = vst [vmem:[#allocation28_spill] sm:$0xff] %v3663_v53  ;;  %5322 = vst [vmem:[#allocation29_spill] sm:$0xff] %v3665_v2 }
 0x1a7   : > { %2818 = vset.pattern.permute.xlu1 %v5319_v7  ;;  %v3667_v23 = vpop.permute.xlu0 %659  ;;  %v3669_v1 = vpop.permute.xlu1 %661 }
 0x1a8   : > { %1034 = vperm.xlu1 %2818, %v3325_v4   ;;  %5323 = vst [vmem:[#allocation30_spill] sm:$0xff] %v3667_v23  ;;  %5324 = vst [vmem:[#allocation31_spill] sm:$0xff] %v3669_v1  ;;  %v349_v4 = vlaneseq }
 0x1aa   : > { %v362_v23 = vshrl.u32 %v349_v4, 7  ;;  %v3687_v5 = vand.u32 127, %v349_v4 }
 0x1ac   : > { %vm351_vm0 = vcmp.lt.s32.totalorder %v3687_v5, 17  ;;  %vm429_vm1 = vcmp.lt.s32.totalorder %v3687_v5, 16  ;;  %vm507_vm2 = vcmp.lt.s32.totalorder %v3687_v5, 15  ;;  %vm585_vm3 = vcmp.lt.s32.totalorder %v3687_v5, 1 }
 0x1ad   : > { %vm663_vm4 = vcmp.lt.s32.totalorder %v3687_v5, 127  ;;  %vm741_vm5 = vcmp.lt.s32.totalorder %v3687_v5, 113  ;;  %vm819_vm6 = vcmp.lt.s32.totalorder %v3687_v5, 112  ;;  %vm897_vm7 = vcmp.lt.s32.totalorder %v3687_v5, 111 }
 0x1ae   : > { %vm1162_vm10 = vcmp.lt.s32.totalorder %v3687_v5, 51  ;;  %vm1192_vm11 = vcmp.lt.s32.totalorder %v3687_v5, 50  ;;  %vm1222_vm12 = vcmp.lt.s32.totalorder %v3687_v5, 49  ;;  %vm1252_vm13 = vcmp.lt.s32.totalorder %v3687_v5, 48 }
 0x1af   : > { %vm1282_vm14 = vcmp.lt.s32.totalorder %v3687_v5, 47  ;;  %vm1312_vm15 = vcmp.lt.s32.totalorder %v3687_v5, 46 }
 0x1b8   : > { %v3671_v19 = vpop.permute.xlu0 %692  ;;  %v3673_v10 = vpop.permute.xlu1 %696 }
 0x1b9   : > { %5325 = vst [vmem:[#allocation32_spill] sm:$0xff] %v3671_v19  ;;  %5326 = vst [vmem:[#allocation33_spill] sm:$0xff] %v3673_v10  ;;  %v3693_v10 = vsub.s32 0, %v362_v23 }
 0x1bc   : > { %v3675_v3 = vpop.permute.xlu0 %704  ;;  %v3677_v24 = vpop.permute.xlu1 %700 }
 0x1bd   : > { %5327 = vst [vmem:[#allocation34_spill] sm:$0xff] %v3675_v3  ;;  %5328 = vst [vmem:[#allocation35_spill] sm:$0xff] %v3677_v24  ;;  %v3695_v3 = vsub.s32 1, %v362_v23  ;;  %v332_v24 = vld [vmem:[#allocation5 + $0x20] ss:$8 sm:$0x3]  ;;  %v356_v23 = vsel %vm351_vm0, %v3555_v30, %v3540_v27 }
 0x1bf   : > { %v3706_v4 = vrot.slane %v332_v24, %v3695_v3 }
 0x1c0   : > { %v3679_v7 = vpop.permute.xlu0 %727  ;;  %v3681_v17 = vpop.permute.xlu1 %725 }
 0x1c1   : > { %5329 = vst [vmem:[#allocation36_spill] sm:$0xff] %v3679_v7  ;;  %5330 = vst [vmem:[#allocation37_spill] sm:$0xff] %v3681_v17 }
 0x1c2   : > { %5338 = vst [vmem:[#allocation45_spill] sm:$0xff] %v3706_v4 }
 0x1c4   : > { %v3683_v53 = vpop.permute.xlu0 %731  ;;  %v3685_v2 = vpop.permute.xlu1 %729 }
 0x1c5   : > { %5331 = vst [vmem:[#allocation38_spill] sm:$0xff] %v3683_v53  ;;  %5332 = vst [vmem:[#allocation39_spill] sm:$0xff] %v3685_v2  ;;  %v3703_v53 = vrot.slane %v332_v24, %v3693_v10  ;;  %v352_v2 = vsel %vm351_vm0, %v3540_v27, %v3555_v30  ;;  %v325_v24 = vmul.f32 %v3477_v63, %v3371_v34  ;;  %v490_v30 = vld [vmem:[#allocation5 + $0x22] ss:$8 sm:$0x3] }
 0x1c6   : > { %v353_v27 = vsel %vm351_vm0, %v3538_v26, %v3557_v31  ;;  %v3742_v34 = vmul.f32 %v3433_v57, %v3395_v54  ;;  %v372_v63 = vmul.f32 %v3706_v4, %v352_v2  ;;  %v355_v2 = vsel %vm351_vm0, %v3549_v29, %v3564_v33 }
 0x1c7   : > { %5337 = vst [vmem:[#allocation44_spill] sm:$0xff] %v3703_v53  ;;  %v371_v52 = vmul.f32 %v3703_v53, %v356_v23 }
 0x1c8   : > { %v3689_v1 = vpop.permute.xlu0 %735  ;;  %v3691_v19 = vpop.permute.xlu1 %733 }
 0x1c9   : > { %5333 = vst [vmem:[#allocation40_spill] sm:$0xff] %v3689_v1  ;;  %5334 = vst [vmem:[#allocation41_spill] sm:$0xff] %v3691_v19  ;;  %v412_v19 = vld [vmem:[#allocation5 + $0x21] ss:$8 sm:$0x3]  ;;  %v395_v8 = vmul.f32 %v3485_v13, %v371_v52 }
 0x1cc   : > { %v3698_v17 = vpop.permute.xlu0 %739  ;;  %v3700_v7 = vpop.permute.xlu1 %737 }
 0x1cd   : > { %5335 = vst [vmem:[#allocation42_spill] sm:$0xff] %v3698_v17  ;;  %5336 = vst [vmem:[#allocation43_spill] sm:$0xff] %v3700_v7  ;;  %v323_v17 = vmul.f32 %v3427_v56, %v3373_v36  ;;  %v324_v7 = vmul.f32 %v3427_v56, %v3387_v50  ;;  %v357_v36 = vsel %vm351_vm0, %v3557_v31, %v3538_v26  ;;  %v568_v31 = vld [vmem:[#allocation5 + $0x27] ss:$8 sm:$0x3] }
 0x1ce   : > { %v3738_v56 = vmul.f32 %v3433_v57, %v3379_v46  ;;  %v3750_v26 = vrot.slane %v412_v19, %v3693_v10  ;;  %v3753_v46 = vrot.slane %v412_v19, %v3695_v3  ;;  %v373_v54 = vmul.f32 %v3703_v53, %v357_v36 }
 0x1cf   : > { %v374_v57 = vmul.f32 %v3706_v4, %v353_v27  ;;  %v330_v19 = vmul.f32 %v3443_v58, %v3397_v55  ;;  %v3771_v36 = vrot.slane %v490_v30, %v3693_v10  ;;  %v3774_v27 = vrot.slane %v490_v30, %v3695_v3 }
 0x1d0   : > { %v3720_v1 = vpop.permute.xlu0 %774  ;;  %v3734_v50 = vpop.permute.xlu1 %770  ;;  %5341 = vst [vmem:[#allocation48_spill] sm:$0xff] %v3750_v26  ;;  %5342 = vst [vmem:[#allocation49_spill] sm:$0xff] %v3753_v46  ;;  %v3784_v55 = vrot.slane %v568_v31, %v3695_v3  ;;  %v378_v30 = vmul.f32 %v3706_v4, %v355_v2  ;;  %v397_v52 = vmul.f32 %v3449_v59, %v373_v54 }
 0x1d1   : > { %5339 = vst [vmem:[#allocation46_spill] sm:$0xff] %v3720_v1  ;;  %5340 = vst [vmem:[#allocation47_spill] sm:$0xff] %v3734_v50  ;;  %v329_v1 = vmul.f32 %v3443_v58, %v3381_v49  ;;  %v359_v49 = vsel %vm351_vm0, %v3564_v33, %v3549_v29  ;;  %v646_v50 = vld [vmem:[#allocation5 + $0x30] ss:$8 sm:$0x3]  ;;  %v396_v29 = vmul.f32 %v3485_v13, %v372_v63 }
 0x1d2   : > { %5344 = vst [vmem:[#allocation51_spill] sm:$0xff] %v3771_v36  ;;  %5345 = vst [vmem:[#allocation52_spill] sm:$0xff] %v3774_v27  ;;  %v3781_v33 = vrot.slane %v568_v31, %v3693_v10  ;;  %v724_v58 = vld [vmem:[#allocation5 + $0x35] ss:$8 sm:$0x3]  ;;  %v377_v16 = vmul.f32 %v3703_v53, %v359_v49  ;;  %v358_v13 = vsel %vm351_vm0, %v3562_v32, %v3546_v28 }
 0x1d3   : > { %5348 = vst [vmem:[#allocation55_spill] sm:$0xff] %v3784_v55  ;;  %v398_v63 = vmul.f32 %v3449_v59, %v374_v57  ;;  %v3799_v31 = vrot.slane %v646_v50, %v3693_v10  ;;  %v3802_v49 = vrot.slane %v646_v50, %v3695_v3  ;;  %v3807_v55 = vrot.slane %v724_v58, %v3693_v10 }
 0x1d4   : > { %v3765_v23 = vpop.permute.xlu0 %803  ;;  %v3776_v22 = vpop.permute.xlu1 %778  ;;  %5347 = vst [vmem:[#allocation54_spill] sm:$0xff] %v3781_v33  ;;  %v3810_v33 = vrot.slane %v724_v58, %v3695_v3  ;;  %v431_v54 = vsel %vm429_vm1, %v3569_v35, %v3584_v41  ;;  %v435_v57 = vsel %vm429_vm1, %v3584_v41, %v3569_v35  ;;  %v403_v58 = vadd.f32 %v395_v8, %v323_v17 }
 0x1d5   : > { %5343 = vst [vmem:[#allocation50_spill] sm:$0xff] %v3765_v23  ;;  %5346 = vst [vmem:[#allocation53_spill] sm:$0xff] %v3776_v22  ;;  %v802_v23 = vld [vmem:[#allocation5 + $0x36] ss:$8 sm:$0x3]  ;;  %v354_v22 = vsel %vm351_vm0, %v3546_v28, %v3562_v32  ;;  %v375_v32 = vmul.f32 %v3703_v53, %v358_v13  ;;  %v406_v13 = vadd.f32 %v398_v63, %v326_v21 }
 0x1d6   : > { %5349 = vst [vmem:[#allocation56_spill] sm:$0xff] %v3799_v31  ;;  %5350 = vst [vmem:[#allocation57_spill] sm:$0xff] %v3802_v49  ;;  %v3815_v28 = vrot.slane %v802_v23, %v3693_v10  ;;  %v3818_v59 = vrot.slane %v802_v23, %v3695_v3  ;;  %v376_v50 = vmul.f32 %v3706_v4, %v354_v22 }
 0x1d7   : > { %5352 = vst [vmem:[#allocation59_spill] sm:$0xff] %v3807_v55  ;;  %5353 = vst [vmem:[#allocation60_spill] sm:$0xff] %v3810_v33  ;;  %v402_v23 = vmul.f32 %v3492_v15, %v378_v30  ;;  %v430_v22 = vsel %vm429_vm1, %v3571_v37, %v3586_v42  ;;  %v434_v4 = vsel %vm429_vm1, %v3586_v42, %v3571_v37 }
 0x1d8   : > { %v3804_v2 = vpop.permute.xlu0 %807  ;;  %v3812_v14 = vpop.permute.xlu1 %782  ;;  %5354 = vst [vmem:[#allocation61_spill] sm:$0xff] %v3815_v28  ;;  %5355 = vst [vmem:[#allocation62_spill] sm:$0xff] %v3818_v59  ;;  %v401_v28 = vmul.f32 %v3492_v15, %v377_v16  ;;  %v405_v59 = vadd.f32 %v397_v52, %v325_v24  ;;  %v452_v8 = vmul.f32 %v3753_v46, %v431_v54 }
 0x1d9   : > { %5351 = vst [vmem:[#allocation58_spill] sm:$0xff] %v3804_v2  ;;  %v404_v2 = vadd.f32 %v396_v29, %v324_v7  ;;  %v451_v7 = vmul.f32 %v3750_v26, %v435_v57  ;;  %v432_v15 = vsel %vm429_vm1, %v3579_v40, %v3595_v44  ;;  %v436_v16 = vsel %vm429_vm1, %v3595_v44, %v3579_v40  ;;  %v880_v29 = vld [vmem:[#allocation5 + $0x37] ss:$8 sm:$0x3] }
 0x1da   : > { %v399_v21 = vmul.f32 %v3457_v60, %v375_v32  ;;  %v400_v35 = vmul.f32 %v3457_v60, %v376_v50  ;;  %v433_v37 = vsel %vm429_vm1, %v3577_v39, %v3592_v43  ;;  %v437_v41 = vsel %vm429_vm1, %v3592_v43, %v3577_v39 }
 0x1db   : > { %v409_v42 = vadd.f32 %v401_v28, %v329_v1  ;;  %v410_v40 = vadd.f32 %v402_v23, %v330_v19  ;;  %v449_v44 = vmul.f32 %v3750_v26, %v434_v4  ;;  %v450_v24 = vmul.f32 %v3753_v46, %v430_v22 }
 0x1dc   : > { %v3840_v53 = vpop.permute.xlu0 %811  ;;  %v3852_v17 = vpop.permute.xlu1 %805  ;;  %v453_v60 = vmul.f32 %v3750_v26, %v436_v16  ;;  %v454_v30 = vmul.f32 %v3753_v46, %v432_v15  ;;  %v508_v52 = vsel %vm507_vm2, %v3601_v45, %v3616_v38  ;;  %v512_v39 = vsel %vm507_vm2, %v3616_v38, %v3601_v45 }
 0x1dd   : > { %v475_v1 = vmul.f32 %v3502_v18, %v451_v7  ;;  %v476_v4 = vmul.f32 %v3502_v18, %v452_v8  ;;  %v455_v19 = vmul.f32 %v3750_v26, %v437_v41  ;;  %v456_v63 = vmul.f32 %v3753_v46, %v433_v37 }
 0x1de   : > { %v407_v32 = vadd.f32 %v399_v21, %v3738_v56  ;;  %v408_v50 = vadd.f32 %v400_v35, %v3742_v34  ;;  %v3888_v54 = vrot.slane %v880_v29, %v3693_v10  ;;  %v3891_v38 = vrot.slane %v880_v29, %v3695_v3 }
 0x1df   : > { %v509_v18 = vsel %vm507_vm2, %v3603_v47, %v3618_v25  ;;  %v513_v45 = vsel %vm507_vm2, %v3618_v25, %v3603_v47  ;;  %v527_v56 = vmul.f32 %v3771_v36, %v512_v39  ;;  %v528_v34 = vmul.f32 %v3774_v27, %v508_v52 }
 0x1e0   : > { %v3877_v43 = vpop.permute.xlu0 %815  ;;  %v3883_v28 = vpop.permute.xlu1 %809  ;;  %5356 = vst [vmem:[#allocation63_spill] sm:$0xff] %v3888_v54  ;;  %5357 = vst [vmem:[#allocation64_spill] sm:$0xff] %v3891_v38  ;;  %v473_v57 = vmul.f32 %v3465_v61, %v449_v44  ;;  %v474_v23 = vmul.f32 %v3465_v61, %v450_v24  ;;  %v477_v22 = vmul.f32 %v3473_v62, %v453_v60 }
 0x1e1   : > { %v478_v7 = vmul.f32 %v3473_v62, %v454_v30  ;;  %v483_v15 = vadd.f32 %v475_v1, %v405_v59  ;;  %v484_v16 = vadd.f32 %v476_v4, %v406_v13  ;;  %v479_v21 = vmul.f32 %v3483_v12, %v455_v19  ;;  %v5358_v1 = vld [vmem:[#allocation11_spill] sm:$0xff] }
 0x1e2   : > { %v480_v25 = vmul.f32 %v3483_v12, %v456_v63  ;;  %v529_v35 = vmul.f32 %v3771_v36, %v513_v45  ;;  %v530_v37 = vmul.f32 %v3774_v27, %v509_v18  ;;  %v511_v61 = vsel %vm507_vm2, %v3610_v51, %v3625_v6  ;;  %v5360_v18 = vld [vmem:[#allocation18_spill] sm:$0xff] }
 0x1e3   : > { %v515_v62 = vsel %vm507_vm2, %v3625_v6, %v3610_v51  ;;  %v551_v59 = vmul.f32 %v3513_v20, %v527_v56  ;;  %v552_v12 = vmul.f32 %v3513_v20, %v528_v34  ;;  %v510_v13 = vsel %vm507_vm2, %v3608_v48, %v3623_v11 }
 0x1e4   : > { %v3907_v8 = vpop.permute.xlu0 %848  ;;  %v3911_v47 = vpop.permute.xlu1 %813  ;;  %v514_v41 = vsel %vm507_vm2, %v3623_v11, %v3608_v48  ;;  %v481_v44 = vadd.f32 %v473_v57, %v403_v58  ;;  %v482_v24 = vadd.f32 %v474_v23, %v404_v2  ;;  %v485_v29 = vadd.f32 %v477_v22, %v407_v32  ;;  %v5363_v57 = vld [vmem:[#allocation15_spill] sm:$0xff] }
 0x1e5   : > { %v486_v6 = vadd.f32 %v478_v7, %v408_v50  ;;  %v533_v20 = vmul.f32 %v3771_v36, %v515_v62  ;;  %v534_v60 = vmul.f32 %v3774_v27, %v511_v61  ;;  %v587_v30 = vsel %vm585_vm3, %v3628_v9, %v3640_v0  ;;  %v5359_v50 = vld [vmem:[#allocation21_spill] sm:$0xff]  ;;  %v5364_v7 = vld [vmem:[#allocation22_spill] sm:$0xff]  ;;  %v5366_v61 = vld [vmem:[#allocation12_spill] sm:$0xff] }
 0x1e6   : > { %v591_v11 = vsel %vm585_vm3, %v3640_v0, %v3628_v9  ;;  %v487_v2 = vadd.f32 %v479_v21, %v409_v42  ;;  %v488_v58 = vadd.f32 %v480_v25, %v410_v40  ;;  %v531_v52 = vmul.f32 %v3771_v36, %v514_v41  ;;  %v5361_v9 = vld [vmem:[#allocation54_spill] sm:$0xff]  ;;  %v5362_v40 = vld [vmem:[#allocation55_spill] sm:$0xff] }
 0x1e7   : > { %v532_v39 = vmul.f32 %v3774_v27, %v510_v13  ;;  %v553_v4 = vmul.f32 %v5358_v1, %v529_v35  ;;  %v554_v19 = vmul.f32 %v5358_v1, %v530_v37  ;;  %v559_v63 = vadd.f32 %v551_v59, %v481_v44  ;;  %v5365_v21 = vld [vmem:[#allocation19_spill] sm:$0xff]  ;;  %v5368_v13 = vld [vmem:[#allocation20_spill] sm:$0xff]  ;;  %v1247_v36 = vld [vmem:[#allocation5 + $0x3] ss:$8 sm:$0x3] }
 0x1e8   : > { %v3934_v51 = vpop.permute.xlu0 %860  ;;  %v3946_v48 = vpop.permute.xlu1 %817  ;;  %v560_v32 = vadd.f32 %v552_v12, %v482_v24  ;;  %v586_v45 = vsel %vm585_vm3, %v5360_v18, %v5359_v50  ;;  %v590_v0 = vsel %vm585_vm3, %v5359_v50, %v5360_v18  ;;  %v607_v42 = vmul.f32 %v5361_v9, %v591_v11  ;;  %v5367_v12 = vld [vmem:[#allocation23_spill] sm:$0xff]  ;;  %v5369_v11 = vld [vmem:[#allocation17_spill] sm:$0xff] }
 0x1e9   : > { %v608_v56 = vmul.f32 %v5362_v40, %v587_v30  ;;  %v557_v23 = vmul.f32 %v5363_v57, %v533_v20  ;;  %v558_v22 = vmul.f32 %v5363_v57, %v534_v60  ;;  %v589_v25 = vsel %vm585_vm3, %v5365_v21, %v5364_v7 }
 0x1ea   : > { %v593_v35 = vsel %vm585_vm3, %v5364_v7, %v5365_v21  ;;  %v555_v62 = vmul.f32 %v5366_v61, %v531_v52  ;;  %v556_v59 = vmul.f32 %v5366_v61, %v532_v39  ;;  %v588_v41 = vsel %vm585_vm3, %v5368_v13, %v5367_v12 }
 0x1eb   : > { %v592_v44 = vsel %vm585_vm3, %v5367_v12, %v5368_v13  ;;  %v561_v24 = vadd.f32 %v553_v4, %v483_v15  ;;  %v562_v20 = vadd.f32 %v554_v19, %v484_v16  ;;  %v605_v60 = vmul.f32 %v5361_v9, %v590_v0  ;;  %v5370_v0 = vld [vmem:[#allocation28_spill] sm:$0xff]  ;;  %v5376_v13 = vld [vmem:[#allocation14_spill] sm:$0xff] }
 0x1ec   : > { %v3962_v34 = vpop.permute.xlu0 %883  ;;  %v3974_v37 = vpop.permute.xlu1 %852  ;;  %v606_v30 = vmul.f32 %v5362_v40, %v586_v45  ;;  %v631_v52 = vmul.f32 %v5369_v11, %v607_v42  ;;  %v632_v39 = vmul.f32 %v5369_v11, %v608_v56  ;;  %v611_v1 = vmul.f32 %v5361_v9, %v593_v35  ;;  %v5371_v42 = vld [vmem:[#allocation24_spill] sm:$0xff] }
 0x1ed   : > { %v612_v50 = vmul.f32 %v5362_v40, %v589_v25  ;;  %v565_v57 = vadd.f32 %v557_v23, %v487_v2  ;;  %v566_v7 = vadd.f32 %v558_v22, %v488_v58  ;;  %v609_v15 = vmul.f32 %v5361_v9, %v592_v44  ;;  %v5372_v2 = vld [vmem:[#allocation13_spill] sm:$0xff]  ;;  %v5375_v35 = vld [vmem:[#allocation16_spill] sm:$0xff] }
 0x1ee   : > { %v610_v16 = vmul.f32 %v5362_v40, %v588_v41  ;;  %v563_v19 = vadd.f32 %v555_v62, %v485_v29  ;;  %v564_v45 = vadd.f32 %v556_v59, %v486_v6  ;;  %v664_v56 = vsel %vm663_vm4, %v5371_v42, %v5370_v0  ;;  %v5373_v22 = vld [vmem:[#allocation29_spill] sm:$0xff] }
 0x1ef   : > { %v668_v21 = vsel %vm663_vm4, %v5370_v0, %v5371_v42  ;;  %v629_v58 = vmul.f32 %v5372_v2, %v605_v60  ;;  %v630_v23 = vmul.f32 %v5372_v2, %v606_v30  ;;  %v5374_v25 = vld [vmem:[#allocation25_spill] sm:$0xff]  ;;  %v635_v61 = vmul.f32 %v5375_v35, %v611_v1  ;;  %v5377_v2 = vld [vmem:[#allocation30_spill] sm:$0xff] }
 0x1f0   : > { %v3993_v18 = vpop.permute.xlu0 %887  ;;  %v3997_v4 = vpop.permute.xlu1 %856  ;;  %v665_v29 = vsel %vm663_vm4, %v5374_v25, %v5373_v22  ;;  %v669_v6 = vsel %vm663_vm4, %v5373_v22, %v5374_v25  ;;  %v636_v62 = vmul.f32 %v5375_v35, %v612_v50  ;;  %v639_v59 = vadd.f32 %v631_v52, %v561_v24  ;;  %v5378_v50 = vld [vmem:[#allocation26_spill] sm:$0xff]  ;;  %v5379_v52 = vld [vmem:[#allocation31_spill] sm:$0xff] }
 0x1f1   : > { %v640_v12 = vadd.f32 %v632_v39, %v562_v20  ;;  %v633_v41 = vmul.f32 %v5376_v13, %v609_v15  ;;  %v634_v44 = vmul.f32 %v5376_v13, %v610_v16  ;;  %v683_v60 = vmul.f32 %v3799_v31, %v664_v56  ;;  %v5380_v39 = vld [vmem:[#allocation27_spill] sm:$0xff]  ;;  %v5381_v56 = vld [vmem:[#allocation32_spill] sm:$0xff]  ;;  %v5382_v13 = vld [vmem:[#allocation33_spill] sm:$0xff] }
 0x1f2   : > { %v684_v30 = vmul.f32 %v3802_v49, %v668_v21  ;;  %v685_v42 = vmul.f32 %v3799_v31, %v665_v29  ;;  %v686_v1 = vmul.f32 %v3802_v49, %v669_v6  ;;  %v666_v24 = vsel %vm663_vm4, %v5378_v50, %v5377_v2 }
 0x1f3   : > { %v670_v20 = vsel %vm663_vm4, %v5377_v2, %v5378_v50  ;;  %v667_v15 = vsel %vm663_vm4, %v5380_v39, %v5379_v52  ;;  %v671_v16 = vsel %vm663_vm4, %v5379_v52, %v5380_v39  ;;  %v707_v21 = vmul.f32 %v5381_v56, %v683_v60 }
 0x1f4   : > { %v4023_v11 = vpop.permute.xlu1 %881  ;;  %v4025_v0 = vpop.permute.xlu0 %891  ;;  %v708_v22 = vmul.f32 %v5381_v56, %v684_v30  ;;  %v638_v25 = vadd.f32 %v630_v23, %v560_v32  ;;  %v637_v29 = vadd.f32 %v629_v58, %v559_v63  ;;  %v643_v6 = vadd.f32 %v635_v61, %v565_v57  ;;  %v5384_v58 = vld [vmem:[#allocation36_spill] sm:$0xff]  ;;  %v5385_v61 = vld [vmem:[#allocation34_spill] sm:$0xff] }
 0x1f5   : > { %v644_v35 = vadd.f32 %v636_v62, %v566_v7  ;;  %v709_v2 = vmul.f32 %v5382_v13, %v685_v42  ;;  %v710_v50 = vmul.f32 %v5382_v13, %v686_v1  ;;  %v641_v40 = vadd.f32 %v633_v41, %v563_v19  ;;  %v5383_v7 = vld [vmem:[#allocation40_spill] sm:$0xff]  ;;  %v5387_v42 = vld [vmem:[#allocation37_spill] sm:$0xff] }
 0x1f6   : > { %v642_v9 = vadd.f32 %v634_v44, %v564_v45  ;;  %v689_v52 = vmul.f32 %v3799_v31, %v667_v15  ;;  %v690_v60 = vmul.f32 %v3802_v49, %v671_v16  ;;  %v687_v30 = vmul.f32 %v3799_v31, %v666_v24  ;;  %v5386_v44 = vld [vmem:[#allocation41_spill] sm:$0xff]  ;;  %v5388_v15 = vld [vmem:[#allocation43_spill] sm:$0xff] }
 0x1f7   : > { %v688_v63 = vmul.f32 %v3802_v49, %v670_v20  ;;  %v715_v32 = vadd.f32 %v707_v21, %v637_v29  ;;  %v716_v57 = vadd.f32 %v708_v22, %v638_v25  ;;  %v743_v23 = vsel %vm741_vm5, %v5384_v58, %v5383_v7  ;;  %v5389_v16 = vld [vmem:[#allocation39_spill] sm:$0xff] }
 0x1f8   : > { %v4050_v27 = vpop.permute.xlu1 %885  ;;  %v747_v19 = vsel %vm741_vm5, %v5383_v7, %v5384_v58  ;;  %v4064_v45 = vpop.permute.xlu0 %895  ;;  %v713_v62 = vmul.f32 %v5385_v61, %v689_v52  ;;  %v714_v41 = vmul.f32 %v5385_v61, %v690_v60  ;;  %v742_v1 = vsel %vm741_vm5, %v5387_v42, %v5386_v44  ;;  %v5390_v25 = vld [vmem:[#allocation35_spill] sm:$0xff]  ;;  %v5392_v60 = vld [vmem:[#allocation38_spill] sm:$0xff] }
 0x1f9   : > { %v746_v24 = vsel %vm741_vm5, %v5386_v44, %v5387_v42  ;;  %v717_v20 = vadd.f32 %v709_v2, %v639_v59  ;;  %v718_v39 = vadd.f32 %v710_v50, %v640_v12  ;;  %v744_v56 = vsel %vm741_vm5, %v5389_v16, %v5388_v15  ;;  %v5391_v50 = vld [vmem:[#allocation42_spill] sm:$0xff]  ;;  %v5393_v61 = vld [vmem:[#allocation47_spill] sm:$0xff] }
 0x1fa   : > { %v748_v21 = vsel %vm741_vm5, %v5388_v15, %v5389_v16  ;;  %v711_v29 = vmul.f32 %v5390_v25, %v687_v30  ;;  %v712_v13 = vmul.f32 %v5390_v25, %v688_v63  ;;  %v763_v52 = vmul.f32 %v3807_v55, %v743_v23 }
 0x1fb   : > { %v764_v59 = vmul.f32 %v3810_v33, %v747_v19  ;;  %v761_v12 = vmul.f32 %v3807_v55, %v742_v1  ;;  %v762_v2 = vmul.f32 %v3810_v33, %v746_v24  ;;  %v745_v7 = vsel %vm741_vm5, %v5392_v60, %v5391_v50  ;;  %v5394_v1 = vld [vmem:[#allocation46_spill] sm:$0xff] }
 0x1fc   : > { %v890_v22 = vpop.permute.xlu1 %889  ;;  %v749_v30 = vsel %vm741_vm5, %v5391_v50, %v5392_v60  ;;  %v721_v58 = vadd.f32 %v713_v62, %v643_v6  ;;  %v722_v63 = vadd.f32 %v714_v41, %v644_v35  ;;  %v765_v23 = vmul.f32 %v3807_v55, %v744_v56  ;;  %v4105_v16 = vpop.permute.xlu0 %930  ;;  %v5395_v41 = vld [vmem:[#allocation53_spill] sm:$0xff] }
 0x1fd   : > { %v766_v19 = vmul.f32 %v3810_v33, %v748_v21  ;;  %v785_v44 = vmul.f32 %v5393_v61, %v761_v12  ;;  %v786_v42 = vmul.f32 %v5393_v61, %v762_v2  ;;  %v787_v24 = vmul.f32 %v5394_v1, %v763_v52  ;;  %v5396_v12 = vld [vmem:[#allocation50_spill] sm:$0xff] }
 0x1fe   : > { %v788_v15 = vmul.f32 %v5394_v1, %v764_v59  ;;  %v719_v50 = vadd.f32 %v711_v29, %v641_v40  ;;  %v720_v6 = vadd.f32 %v712_v13, %v642_v9  ;;  %v767_v35 = vmul.f32 %v3807_v55, %v745_v7 }
 0x1ff   : > { %v768_v62 = vmul.f32 %v3810_v33, %v749_v30  ;;  %v789_v56 = vmul.f32 %v5395_v41, %v765_v23  ;;  %v790_v21 = vmul.f32 %v5395_v41, %v766_v19  ;;  %v820_v52 = vsel %vm819_vm6, %v5396_v12, %v3840_v53  ;;  %v5397_v19 = vld [vmem:[#allocation61_spill] sm:$0xff] }
 0x200   : > { %v894_v25 = vpop.permute.xlu1 %893  ;;  %v824_v59 = vsel %vm819_vm6, %v3840_v53, %v5396_v12  ;;  %v791_v9 = vmul.f32 %v3812_v14, %v767_v35  ;;  %v823_v29 = vsel %vm819_vm6, %v3883_v28, %v3946_v48  ;;  %v827_v13 = vsel %vm819_vm6, %v3946_v48, %v3883_v28  ;;  %v5399_v35 = vld [vmem:[#allocation58_spill] sm:$0xff] }
 0x201   : > { %v792_v40 = vmul.f32 %v3812_v14, %v768_v62  ;;  %v793_v2 = vadd.f32 %v785_v44, %v715_v32  ;;  %v794_v60 = vadd.f32 %v786_v42, %v716_v57  ;;  %v795_v7 = vadd.f32 %v787_v24, %v717_v20  ;;  %v4129_v23 = vpop.permute.xlu0 %1006  ;;  %v5398_v14 = vld [vmem:[#allocation62_spill] sm:$0xff] }
 0x202   : > { %v796_v30 = vadd.f32 %v788_v15, %v718_v39  ;;  %v839_v61 = vmul.f32 %v5397_v19, %v820_v52  ;;  %v840_v1 = vmul.f32 %v5398_v14, %v824_v59  ;;  %v822_v62 = vsel %vm819_vm6, %v5399_v35, %v3877_v43 }
 0x203   : > { %v826_v28 = vsel %vm819_vm6, %v3877_v43, %v5399_v35  ;;  %v821_v48 = vsel %vm819_vm6, %v3852_v17, %v3911_v47  ;;  %v825_v32 = vsel %vm819_vm6, %v3911_v47, %v3852_v17  ;;  %v845_v57 = vmul.f32 %v5397_v19, %v823_v29 }
 0x204   : > { %v927_v53 = vpop.permute.xlu1 %926  ;;  %v846_v20 = vmul.f32 %v5398_v14, %v827_v13  ;;  %v797_v39 = vadd.f32 %v789_v56, %v719_v50  ;;  %v798_v44 = vadd.f32 %v790_v21, %v720_v6  ;;  %v799_v42 = vadd.f32 %v791_v9, %v721_v58 }
 0x205   : > { %v800_v24 = vadd.f32 %v792_v40, %v722_v63  ;;  %v843_v43 = vmul.f32 %v5397_v19, %v822_v62  ;;  %v844_v15 = vmul.f32 %v5398_v14, %v826_v28  ;;  %v863_v41 = vmul.f32 %v3907_v8, %v839_v61 }
 0x206   : > { %v864_v12 = vmul.f32 %v3907_v8, %v840_v1  ;;  %v841_v59 = vmul.f32 %v5397_v19, %v821_v48  ;;  %v842_v17 = vmul.f32 %v5398_v14, %v825_v32  ;;  %v898_v47 = vsel %vm897_vm7, %v4023_v11, %v890_v22  ;;  %v4173_v56 = vpop.permute.xlu0 %1030 }
 0x207   : > { %v902_v58 = vsel %vm897_vm7, %v890_v22, %v4023_v11  ;;  %v869_v63 = vmul.f32 %v3934_v51, %v845_v57  ;;  %v870_v50 = vmul.f32 %v3934_v51, %v846_v20  ;;  %v899_v8 = vsel %vm897_vm7, %v3962_v34, %v4025_v0 }
 0x208   : > { %v935_v52 = vpop.permute.xlu1 %934  ;;  %v903_v6 = vsel %vm897_vm7, %v4025_v0, %v3962_v34  ;;  %v865_v21 = vmul.f32 %v3974_v37, %v841_v59  ;;  %v866_v11 = vmul.f32 %v3974_v37, %v842_v17  ;;  %v900_v51 = vsel %vm897_vm7, %v4050_v27, %v894_v25 }
 0x209   : > { %v904_v22 = vsel %vm897_vm7, %v894_v25, %v4050_v27  ;;  %v901_v9 = vsel %vm897_vm7, %v3993_v18, %v4064_v45  ;;  %v905_v34 = vsel %vm897_vm7, %v4064_v45, %v3993_v18  ;;  %v917_v37 = vmul.f32 %v3888_v54, %v898_v47 }
 0x20a   : > { %v918_v0 = vmul.f32 %v3891_v38, %v902_v58  ;;  %v867_v29 = vmul.f32 %v3997_v4, %v843_v43  ;;  %v868_v13 = vmul.f32 %v3997_v4, %v844_v15  ;;  %v919_v27 = vmul.f32 %v3888_v54, %v899_v8 }
 0x20b   : > { %v920_v25 = vmul.f32 %v3891_v38, %v903_v6  ;;  %v921_v61 = vmul.f32 %v3888_v54, %v900_v51  ;;  %v922_v1 = vmul.f32 %v3891_v38, %v904_v22  ;;  %v941_v35 = vmul.f32 %v927_v53, %v917_v37  ;;  %v959_v43 = vpop.permute.xlu0 %958 }
 0x20c   : > { %v939_v40 = vpop.permute.xlu1 %938  ;;  %v942_v62 = vmul.f32 %v927_v53, %v918_v0  ;;  %v923_v18 = vmul.f32 %v3888_v54, %v901_v9  ;;  %v924_v45 = vmul.f32 %v3891_v38, %v905_v34  ;;  %v943_v28 = vmul.f32 %v4105_v16, %v919_v27 }
 0x20d   : > { %v944_v48 = vmul.f32 %v4105_v16, %v920_v25  ;;  %v871_v32 = vadd.f32 %v863_v41, %v793_v2  ;;  %v872_v4 = vadd.f32 %v864_v12, %v794_v60  ;;  %v945_v57 = vmul.f32 %v935_v52, %v921_v61 }
 0x20e   : > { %v946_v20 = vmul.f32 %v935_v52, %v922_v1  ;;  %v873_v15 = vadd.f32 %v865_v21, %v795_v7  ;;  %v874_v59 = vadd.f32 %v866_v11, %v796_v30  ;;  %v947_v17 = vmul.f32 %v939_v40, %v923_v18 }
 0x20f   : > { %v948_v47 = vmul.f32 %v939_v40, %v924_v45  ;;  %v875_v8 = vadd.f32 %v867_v29, %v797_v39  ;;  %v876_v53 = vadd.f32 %v868_v13, %v798_v44  ;;  %v950_v6 = vadd.f32 %v942_v62, %v872_v4  ;;  %v971_v7 = vpop.permute.xlu0 %970 }
 0x210   : > { %v949_v51 = vadd.f32 %v941_v35, %v871_v32  ;;  %v877_v22 = vadd.f32 %v869_v63, %v799_v42  ;;  %v878_v9 = vadd.f32 %v870_v50, %v800_v24  ;;  %v951_v34 = vadd.f32 %v943_v28, %v873_v15 }
 0x211   : > { %v963_v58 = vpop.permute.xlu1 %962  ;;  %v952_v37 = vadd.f32 %v944_v48, %v874_v59  ;;  %v974_v16 = vadd.f32 %v959_v43, %v950_v6  ;;  %v953_v2 = vadd.f32 %v945_v57, %v875_v8  ;;  %v954_v60 = vadd.f32 %v946_v20, %v876_v53 }
 0x212   : > { %v973_v0 = vadd.f32 %v959_v43, %v949_v51  ;;  %v955_v41 = vadd.f32 %v947_v17, %v877_v22  ;;  %v956_v12 = vadd.f32 %v948_v47, %v878_v9  ;;  %v975_v30 = vadd.f32 %v963_v58, %v951_v34 }
 0x213   : > { %v976_v21 = vadd.f32 %v963_v58, %v952_v37  ;;  %v982_v44 = vmul.f32 0.1, %v974_v16 }
 0x214   : > { %v981_v39 = vmul.f32 0.1, %v973_v0  ;;  %v979_v29 = vadd.f32 %v971_v7, %v955_v41  ;;  %v980_v13 = vadd.f32 %v971_v7, %v956_v12  ;;  %v983_v63 = vmul.f32 0.1, %v975_v30 }
 0x215   : > { %v967_v52 = vpop.permute.xlu1 %966  ;;  %v984_v50 = vmul.f32 0.1, %v976_v21  ;;  %v990_v61 = vmax.f32 %v974_v16, %v982_v44  ;;  %v5400_v44 = vmov 3  }
 0x216   : > { %v977_v11 = vadd.f32 %v967_v52, %v953_v2  ;;  %v978_v40 = vadd.f32 %v967_v52, %v954_v60  ;;  %v989_v25 = vmax.f32 %v973_v0, %v981_v39  ;;  %v987_v1 = vmul.f32 0.1, %v979_v29  ;;  %v4226_v39 = vld [vmem:[%s5175_s2] sm:$0x3] }
 0x217   : > { %v988_v35 = vmul.f32 0.1, %v980_v13  ;;  %v991_v45 = vmax.f32 %v975_v30, %v983_v63  ;;  %v992_v28 = vmax.f32 %v976_v21, %v984_v50  ;;  %v5404_v63 = vmov 1  }
 0x218   : > { %v985_v42 = vmul.f32 0.1, %v977_v11  ;;  %v986_v24 = vmul.f32 0.1, %v978_v40  ;;  %v995_v59 = vmax.f32 %v979_v29, %v987_v1  ;;  %v3040_v29 = vmov 24  }
 0x219   : > { %v996_v17 = vmax.f32 %v980_v13, %v988_v35  ;;  %v1011_v58 = vmul.f32 %v4129_v23, %v991_v45  ;;  %v1012_v8 = vmul.f32 %v4129_v23, %v992_v28  ;;  %2819 = vset.pattern.permute.xlu1 %v3040_v29  ;;  %v5401_v13 = vmov 4  }
 0x21a   : > { %v1002_v27 = vpop.permute.xlu1 %1001  ;;  %v993_v62 = vmax.f32 %v977_v11, %v985_v42  ;;  %v994_v18 = vmax.f32 %v978_v40, %v986_v24  ;;  %v5402_v42 = vmov 0   ;;  %v5403_v24 = vmov 5  }
 0x21b   : > { %v1009_v32 = vmul.f32 %v1002_v27, %v989_v25  ;;  %v1010_v4 = vmul.f32 %v1002_v27, %v990_v61  ;;  %v5405_v50 = vmov 6   ;;  %v3041_v27 = vmov 32  }
 0x21c   : > { %v5406_v25 = vmov 7   ;;  %v3042_v61 = vmov 33   ;;  %v5407_v1 = vmov 8   ;;  %v3043_v35 = vmov 14  }
 0x21d   : > { %v5410_v45 = vmov 11   ;;  %v5411_v28 = vmov 12  }
 0x21e   : > { %v1015_v48 = vpop.permute.xlu1 %1014 }
 0x21f   : > { %v1021_v57 = vmul.f32 %v1015_v48, %v993_v62  ;;  %v1022_v20 = vmul.f32 %v1015_v48, %v994_v18  ;;  %v5408_v62 = vmov 9   ;;  %v5409_v18 = vmov 10  }
 0x220   : > { %v5412_v48 = vmov 13  }
 0x221   : > { %v1025_v43 = vadd.f32 %v1021_v57, %v1009_v32  ;;  %v1026_v15 = vadd.f32 %v1022_v20, %v1010_v4  ;;  %v3044_v32 = vmov 15   ;;  %v3045_v4 = vmov 16  }
 0x222   : > { %v1019_v47 = vpop.permute.xlu1 %1018  ;;  %v3046_v57 = vmov 17   ;;  %v3047_v20 = vmov 18  }
 0x223   : > { %v1037_v53 = vadd.f32 %v4173_v56, %v1025_v43  ;;  %v1038_v6 = vadd.f32 %v4173_v56, %v1026_v15  ;;  %v1023_v51 = vmul.f32 %v1019_v47, %v995_v59  ;;  %v1024_v22 = vmul.f32 %v1019_v47, %v996_v17  ;;  %v2876_v47 = vld [vmem:[%s5174_s1] sm:$0xff] }
 0x225   : > { %v1041_v9 = vmul.f32 0.1, %v1037_v53  ;;  %v1042_v34 = vmul.f32 0.1, %v1038_v6  ;;  %v1027_v37 = vadd.f32 %v1023_v51, %v1011_v58  ;;  %v1028_v0 = vadd.f32 %v1024_v22, %v1012_v8 }
 0x227   : > { %v1035_v16 = vpop.permute.xlu1 %1034  ;;  %v4207_v2 = vmax.f32 %v1037_v53, %v1041_v9  ;;  %v4209_v60 = vmax.f32 %v1038_v6, %v1042_v34  ;;  %v2877_v53 = vld [vmem:[%s5174_s1 + $0x8] sm:$0xff] }
 0x228   : > { %v1039_v41 = vadd.f32 %v1035_v16, %v1027_v37  ;;  %v1040_v12 = vadd.f32 %v1035_v16, %v1028_v0 }
 0x229   : > { %v1049_v23 = vadd.f32 %v4209_v60, %v4207_v2  ;;  %v1055_v40 = vmax.f32 %v4207_v2, %v4209_v60 }
 0x22a   : > { %v1043_v52 = vmul.f32 0.1, %v1039_v41  ;;  %v1044_v7 = vmul.f32 0.1, %v1040_v12 }
 0x22b   : > { %1050 = vadd.xlane.f32.xlu1 %v1049_v23 }
 0x22c   : > { %v4213_v56 = vmax.f32 %v1039_v41, %v1043_v52  ;;  %v4215_v30 = vmax.f32 %v1040_v12, %v1044_v7 }
 0x22e   : > { %v1052_v21 = vadd.f32 %v4215_v30, %v4213_v56  ;;  %v1058_v11 = vmax.f32 %v4213_v56, %v4215_v30 }
 0x230   : > { %1053 = vadd.xlane.f32.xlu0 %v1052_v21  ;;  %1059 = vmax.xlane.f32.xlu1 %v1058_v11 }
 0x234   : > { %1056 = vmax.xlane.f32.xlu0 %v1055_v40 }
 0x241   : > { %1152 = vperm.xlu1 %2819, %v4226_v39  }
 0x245   : > { %2820 = vset.pattern.permute.xlu1 %v5402_v42 }
 0x246   : > { %1179 = vperm.xlu1 %2820, %v4226_v39  }
 0x24a   : > { %1239 = vperm.xlu0 %2817, %v4226_v39   ;;  %2821 = vset.pattern.permute.xlu1 %v5404_v63 }
 0x24b   : > { %1209 = vperm.xlu1 %2821, %v4226_v39  }
 0x24e   : > { %2822 = vset.pattern.permute.xlu0 %v5400_v44 }
 0x24f   : > { %1269 = vperm.xlu0 %2822, %v4226_v39   ;;  %2850 = vset.pattern.permute.xlu1 %v3041_v27 }
 0x250   : > { %1997 = vperm.xlu1 %2850, %v4226_v39  }
 0x253   : > { %2823 = vset.pattern.permute.xlu0 %v5401_v13 }
 0x254   : > { %1299 = vperm.xlu0 %2823, %v4226_v39   ;;  %2851 = vset.pattern.permute.xlu1 %v3042_v61  ;;  %v2878_v61 = vld [vmem:[%s5174_s1 + $0x18] sm:$0xff] }
 0x255   : > { %2027 = vperm.xlu1 %2851, %v4226_v39  }
 0x258   : > { %2824 = vset.pattern.permute.xlu0 %v5403_v24 }
 0x259   : > { %1329 = vperm.xlu0 %2824, %v4226_v39   ;;  %2856 = vset.pattern.permute.xlu1 %v3043_v35 }
 0x25d   : > { %2825 = vset.pattern.permute.xlu0 %v5405_v50 }
 0x25e   : > { %1359 = vperm.xlu0 %2825, %v4226_v39  }
 0x262   : > { %2826 = vset.pattern.permute.xlu0 %v5406_v25 }
 0x263   : > { %1389 = vperm.xlu0 %2826, %v4226_v39  }
 0x267   : > { %2827 = vset.pattern.permute.xlu0 %v5407_v1 }
 0x268   : > { %1419 = vperm.xlu0 %2827, %v4226_v39  }
 0x26c   : > { %2828 = vset.pattern.permute.xlu0 %v5408_v62 }
 0x26d   : > { %1449 = vperm.xlu0 %2828, %v4226_v39  }
 0x271   : > { %2829 = vset.pattern.permute.xlu0 %v5409_v18 }
 0x272   : > { %1479 = vperm.xlu0 %2829, %v4226_v39  }
 0x276   : > { %2830 = vset.pattern.permute.xlu0 %v5410_v45 }
 0x277   : > { %1509 = vperm.xlu0 %2830, %v4226_v39  }
 0x27b   : > { %2831 = vset.pattern.permute.xlu0 %v5411_v28 }
 0x27c   : > { %1539 = vperm.xlu0 %2831, %v4226_v39  }
 0x280   : > { %2832 = vset.pattern.permute.xlu0 %v5412_v48 }
 0x281   : > { %1569 = vperm.xlu0 %2832, %v4226_v39  }
 0x285   : > { %2833 = vset.pattern.permute.xlu0 %v3044_v32 }
 0x286   : > { %1629 = vperm.xlu0 %2833, %v4226_v39  }
 0x28a   : > { %2834 = vset.pattern.permute.xlu0 %v3045_v4 }
 0x28b   : > { %1645 = vperm.xlu0 %2834, %v4226_v39  }
 0x28f   : > { %2835 = vset.pattern.permute.xlu0 %v3046_v57 }
 0x290   : > { %1661 = vperm.xlu0 %2835, %v4226_v39  }
 0x294   : > { %2836 = vset.pattern.permute.xlu0 %v3047_v20 }
 0x295   : > { %1677 = vperm.xlu0 %2836, %v4226_v39  }
 0x299   : > { %2837 = vset.pattern.permute.xlu0 %v3043_v35  ;;  %v2879_v35 = vld [vmem:[%s5174_s1 + $0x10] sm:$0xff] }
 0x29a   : > { %1599 = vperm.xlu0 %2837, %v4226_v39  }
 0x2b8   : > { %v1051_v43 = vpop.xlane.xlu1 %1050 }
 0x2b9   : > { %v1061_v15 = vmul.f32 0.00390625, %v1051_v43  ;;  %v3048_v43 = vmov 19  }
 0x2bb   : > { %v1063_v58 = vmul.f32 %v2876_v47, %v1061_v15  ;;  %v3049_v15 = vmov 20  }
 0x2bd   : > { %v1054_v59 = vpop.xlane.xlu0 %1053  ;;  %v1060_v17 = vpop.xlane.xlu1 %1059  ;;  %v1066_v9 = vsel %vm1065_vm8, %v1063_v58, 0.0 }
 0x2be   : > { %v1062_v8 = vmul.f32 0.00390625, %v1054_v59  ;;  %v1077_v51 = vmul.f32 %v2877_v53, %v1060_v17  ;;  %v3050_v59 = vmov 21   ;;  %v3051_v17 = vmov 22  }
 0x2c0   : > { %v1064_v6 = vmul.f32 %v2877_v53, %v1062_v8  ;;  %v1079_v16 = vsel %vm1065_vm8, %v1077_v51, 0.0  ;;  %v3053_v8 = vmov 25  }
 0x2c1   : > { %v1057_v22 = vpop.xlane.xlu0 %1056 }
 0x2c2   : > { %v1067_v34 = vsel %vm1065_vm8, %v1064_v6, 0.0  ;;  %v1076_v37 = vmul.f32 %v2876_v47, %v1057_v22  ;;  %v3052_v47 = vmov 23   ;;  %v3054_v6 = vmov 26  }
 0x2c3   : > { %v1068_v0 = vadd.f32 %v1067_v34, %v1066_v9  ;;  %v3055_v22 = vmov 27   ;;  %v3056_v34 = vmov 28  }
 0x2c4   : > { %v1078_v41 = vsel %vm1065_vm8, %v1076_v37, 0.0  ;;  %vm1342_vm8 = vcmp.lt.s32.totalorder %v3687_v5, 45 }
 0x2c5   : > { %v1069_v12 = vrot.slane %v1068_v0, 4  ;;  %v1080_v23 = vadd.f32 %v1079_v16, %v1078_v41  ;;  %v3058_v16 = vmov 30  }
 0x2c7   : > { %v1070_v52 = vadd.f32 %v1069_v12, %v1068_v0  ;;  %v1081_v7 = vrot.slane %v1080_v23, 4  ;;  %v3057_v0 = vmov 29   ;;  %v3059_v12 = vmov 31  }
 0x2c9   : > { %v1071_v21 = vrot.slane %v1070_v52, 2  ;;  %v1082_v11 = vadd.f32 %v1081_v7, %v1080_v23  ;;  %v4280_v58 = vpop.permute.xlu0 %1239 }
 0x2cb   : > { %v1072_v40 = vadd.f32 %v1071_v21, %v1070_v52  ;;  %v1083_v44 = vrot.slane %v1082_v11, 2  ;;  %v3060_v52 = vmov 34   ;;  %v3061_v21 = vmov 35  }
 0x2cd   : > { %v1073_v29 = vrot.slane %v1072_v40, 1  ;;  %v1084_v13 = vadd.f32 %v1083_v44, %v1082_v11 }
 0x2ce   : > { %v4283_v53 = vpop.permute.xlu0 %1269 }
 0x2cf   : > { %v1074_v42 = vadd.f32 %v1073_v29, %v1072_v40  ;;  %v1085_v24 = vrot.slane %v1084_v13, 1  ;;  %v3062_v40 = vmov 36   ;;  %v3063_v29 = vmov 37  }
 0x2d1   : > { %v1086_v63 = vadd.f32 %v1085_v24, %v1084_v13  ;;  %v1075_v50 = vmax.f32 %v1074_v42, 0.0  ;;  %v3064_v13 = vmov 38  }
 0x2d3   : > { %v1087_v27 = vmax.f32 %v1086_v63, 0.0  ;;  %v4286_v51 = vpop.permute.xlu0 %1299  ;;  %v4315_v63 = vpop.permute.xlu1 %1152 }
 0x2d5   : > { %v1088_v25 = vadd.f32 %v1087_v27, %v1075_v50 }
 0x2d7   : > { %v1090_v1 = vmul.f32 %v2878_v61, %v1088_v25  ;;  %v1089_v62 = vmul.f32 %v2879_v35, %v1088_v25  ;;  %v4319_v27 = vpop.permute.xlu1 %1179 }
 0x2d8   : > { %v4289_v9 = vpop.permute.xlu0 %1329 }
 0x2d9   : > { %v1094_v18 = vmul.f32 0.5, %v1090_v1  ;;  %v1093_v45 = vmul.f32 0.5, %v1089_v62 }
 0x2db   : > { %2868 = vtanh.f32 %v1094_v18  ;;  %v4323_v61 = vpop.permute.xlu1 %1209 }
 0x2dc   : > { %2870 = vtanh.f32 %v1093_v45 }
 0x2dd   : > { %v4292_v37 = vpop.permute.xlu0 %1359 }
 0x2df   : > { %v4327_v35 = vpop.permute.xlu1 %1997 }
 0x2e0   : > { %5419 = vst [vmem:[#allocation12_spill] sm:$0xff] %v4327_v35 }
 0x2e2   : > { %v4295_v41 = vpop.permute.xlu0 %1389 }
 0x2e3   : > { %v4331_v18 = vpop.permute.xlu1 %2027 }
 0x2e4   : > { %5421 = vst [vmem:[#allocation20_spill] sm:$0xff] %v4331_v18 }
 0x2e5   : > { %v2869_v28 = vpop.eup %2868 }
 0x2e6   : > { %v2871_v48 = vpop.eup %2870  ;;  %v1098_v32 = vadd.f32 1.0, %v2869_v28 }
 0x2e7   : > { %v1097_v4 = vadd.f32 1.0, %v2871_v48  ;;  %v4299_v23 = vpop.permute.xlu0 %1419 }
 0x2e8   : > { %v1100_v57 = vmul.f32 0.5, %v1098_v32 }
 0x2e9   : > { %v1099_v20 = vmul.f32 0.5, %v1097_v4 }
 0x2ea   : > { %1108 = vperm.xlu1 %2856, %v1100_v57  }
 0x2eb   : > { %1103 = vperm.xlu0 %2837, %v1099_v20  }
 0x2ec   : > { %v4302_v7 = vpop.permute.xlu0 %1449 }
 0x2ef   : > { %2838 = vset.pattern.permute.xlu0 %v3048_v43 }
 0x2f0   : > { %1707 = vperm.xlu0 %2838, %v4226_v39  }
 0x2f1   : > { %v4305_v11 = vpop.permute.xlu0 %1479 }
 0x2f4   : > { %2839 = vset.pattern.permute.xlu0 %v3049_v15 }
 0x2f5   : > { %1737 = vperm.xlu0 %2839, %v4226_v39  }
 0x2f6   : > { %v4308_v44 = vpop.permute.xlu0 %1509 }
 0x2f7   : > { %5413 = vst [vmem:[#allocation11_spill] sm:$0xff] %v4308_v44  ;;  %v4595_v44 = vld [vmem:[#allocation5 + $0x7] ss:$8 sm:$0x3] }
 0x2f9   : > { %2840 = vset.pattern.permute.xlu0 %v3050_v59 }
 0x2fa   : > { %1767 = vperm.xlu0 %2840, %v4226_v39  }
 0x2fb   : > { %v4311_v42 = vpop.permute.xlu0 %1539 }
 0x2fc   : > { %5414 = vst [vmem:[#allocation21_spill] sm:$0xff] %v4311_v42 }
 0x2fe   : > { %2841 = vset.pattern.permute.xlu0 %v3051_v17 }
 0x2ff   : > { %1797 = vperm.xlu0 %2841, %v4226_v39  }
 0x300   : > { %v4313_v24 = vpop.permute.xlu0 %1569 }
 0x301   : > { %5415 = vst [vmem:[#allocation18_spill] sm:$0xff] %v4313_v24 }
 0x303   : > { %2842 = vset.pattern.permute.xlu0 %v3052_v47 }
 0x304   : > { %1813 = vperm.xlu0 %2842, %v4226_v39  }
 0x305   : > { %v4317_v50 = vpop.permute.xlu0 %1629 }
 0x306   : > { %5416 = vst [vmem:[#allocation15_spill] sm:$0xff] %v4317_v50  ;;  %v1277_v50 = vld [vmem:[#allocation5 + $0x4] ss:$8 sm:$0x3] }
 0x308   : > { %2843 = vset.pattern.permute.xlu0 %v3053_v8 }
 0x309   : > { %1829 = vperm.xlu0 %2843, %v4226_v39  }
 0x30a   : > { %v4321_v25 = vpop.permute.xlu0 %1645 }
 0x30b   : > { %5417 = vst [vmem:[#allocation22_spill] sm:$0xff] %v4321_v25 }
 0x30d   : > { %2844 = vset.pattern.permute.xlu0 %v3054_v6 }
 0x30e   : > { %1859 = vperm.xlu0 %2844, %v4226_v39  }
 0x30f   : > { %v4325_v1 = vpop.permute.xlu0 %1661 }
 0x310   : > { %5418 = vst [vmem:[#allocation19_spill] sm:$0xff] %v4325_v1  ;;  %v1217_v1 = vld [vmem:[#allocation5 + $0x2] ss:$8 sm:$0x3] }
 0x311   : > { %v1229_v24 = vrot.slane %v1217_v1, %v3693_v10 }
 0x312   : > { %2845 = vset.pattern.permute.xlu0 %v3055_v22 }
 0x313   : > { %1889 = vperm.xlu0 %2845, %v4226_v39  }
 0x314   : > { %v4329_v62 = vpop.permute.xlu0 %1677 }
 0x315   : > { %5420 = vst [vmem:[#allocation23_spill] sm:$0xff] %v4329_v62 }
 0x317   : > { %2846 = vset.pattern.permute.xlu0 %v3056_v34 }
 0x318   : > { %1919 = vperm.xlu0 %2846, %v4226_v39  }
 0x319   : > { %v4333_v45 = vpop.permute.xlu0 %1599 }
 0x31a   : > { %5422 = vst [vmem:[#allocation17_spill] sm:$0xff] %v4333_v45 }
 0x31c   : > { %2847 = vset.pattern.permute.xlu0 %v3057_v0 }
 0x31d   : > { %1949 = vperm.xlu0 %2847, %v4226_v39  }
 0x321   : > { %2848 = vset.pattern.permute.xlu0 %v3058_v16 }
 0x322   : > { %1965 = vperm.xlu0 %2848, %v4226_v39  }
 0x326   : > { %2849 = vset.pattern.permute.xlu0 %v3059_v12 }
 0x327   : > { %1981 = vperm.xlu0 %2849, %v4226_v39  }
 0x32b   : > { %2852 = vset.pattern.permute.xlu0 %v3060_v52 }
 0x32c   : > { %2057 = vperm.xlu0 %2852, %v4226_v39  }
 0x330   : > { %2853 = vset.pattern.permute.xlu0 %v3061_v21 }
 0x331   : > { %2087 = vperm.xlu0 %2853, %v4226_v39  }
 0x335   : > { %2854 = vset.pattern.permute.xlu0 %v3062_v40 }
 0x336   : > { %2117 = vperm.xlu0 %2854, %v4226_v39  }
 0x33a   : > { %2855 = vset.pattern.permute.xlu0 %v3063_v29 }
 0x33b   : > { %2147 = vperm.xlu0 %2855, %v4226_v39  }
 0x33f   : > { %2857 = vset.pattern.permute.xlu0 %v3064_v13 }
 0x369   : > { %v1109_v28 = vpop.permute.xlu1 %1108 }
 0x36a   : > { %v1104_v48 = vpop.permute.xlu0 %1103  ;;  %v4336_v32 = vmul.f32 %v1109_v28, %v4213_v56  ;;  %v4339_v4 = vmul.f32 %v1109_v28, %v4215_v30 }
 0x36b   : > { %v4342_v57 = vmul.f32 %v1104_v48, %v4207_v2  ;;  %v4345_v20 = vmul.f32 %v1104_v48, %v4209_v60 }
 0x36c   : > { %5423 = vst [vmem:[#allocation28_spill] sm:$0xff] %v4336_v32  ;;  %5424 = vst [vmem:[#allocation24_spill] sm:$0xff] %v4339_v4 }
 0x36d   : > { %5425 = vst [vmem:[#allocation13_spill] sm:$0xff] %v4342_v57  ;;  %5426 = vst [vmem:[#allocation29_spill] sm:$0xff] %v4345_v20  ;;  %v1115_v43 = vadd.f32 %v4336_v32, %v4342_v57  ;;  %v1122_v15 = vadd.f32 %v4339_v4, %v4345_v20  ;;  %v1132_v59 = vmax.f32 %v4342_v57, %v4336_v32 }
 0x36e   : > { %v1139_v56 = vmax.f32 %v4345_v20, %v4339_v4 }
 0x36f   : > { %v1116_v30 = vrot.slane %v1115_v43, 4  ;;  %v1123_v17 = vrot.slane %v1122_v15, 4  ;;  %v1133_v47 = vrot.slane %v1132_v59, 4 }
 0x370   : > { %v1140_v2 = vrot.slane %v1139_v56, 4 }
 0x371   : > { %v1117_v8 = vadd.f32 %v1116_v30, %v1115_v43  ;;  %v1124_v6 = vadd.f32 %v1123_v17, %v1122_v15  ;;  %v1134_v60 = vmax.f32 %v1132_v59, %v1133_v47  ;;  %v3067_v17 = vmov 39  }
 0x372   : > { %v1141_v22 = vmax.f32 %v1139_v56, %v1140_v2  ;;  %v3075_v47 = vmov 44   ;;  %v3077_v2 = vmov 45  }
 0x373   : > { %v1118_v34 = vrot.slane %v1117_v8, 2  ;;  %v1125_v0 = vrot.slane %v1124_v6, 2  ;;  %v1135_v16 = vrot.slane %v1134_v60, 2 }
 0x374   : > { %v1142_v12 = vrot.slane %v1141_v22, 2 }
 0x375   : > { %v1119_v52 = vadd.f32 %v1118_v34, %v1117_v8  ;;  %v1126_v21 = vadd.f32 %v1125_v0, %v1124_v6  ;;  %v1136_v40 = vmax.f32 %v1134_v60, %v1135_v16  ;;  %v3079_v8 = vmov 46  }
 0x376   : > { %v1143_v48 = vmax.f32 %v1141_v22, %v1142_v12  ;;  %v3080_v6 = vmov 47   ;;  %v3082_v60 = vmov 48  }
 0x377   : > { %v1120_v29 = vrot.slane %v1119_v52, 1  ;;  %v1127_v13 = vrot.slane %v1126_v21, 1  ;;  %v1137_v28 = vrot.slane %v1136_v40, 1 }
 0x378   : > { %v1144_v43 = vrot.slane %v1143_v48, 1 }
 0x379   : > { %v1121_v4 = vadd.f32 %v1120_v29, %v1119_v52  ;;  %v1128_v20 = vadd.f32 %v1127_v13, %v1126_v21  ;;  %v1138_v57 = vmax.f32 %v1136_v40, %v1137_v28  ;;  %v4434_v40 = vpop.permute.xlu0 %1707 }
 0x37a   : > { %v1145_v56 = vmax.f32 %v1143_v48, %v1144_v43  ;;  %5427 = vst [vmem:[#allocation25_spill] sm:$0xff] %v4434_v40 }
 0x37b   : > { %v1130_v32 = vmul.f32 0.0625, %v1121_v4  ;;  %v1131_v15 = vmul.f32 0.0625, %v1128_v20  ;;  %v3071_v4 = vmov 41   ;;  %v3074_v20 = vmov 43  }
 0x37d   : > { %v4355_v59 = vsel %vm1146_vm9, %v1130_v32, %v1138_v57  ;;  %v4359_v30 = vsel %vm1146_vm9, %v1131_v15, %v1145_v56  ;;  %v3069_v32 = vmov 40   ;;  %v3072_v57 = vmov 42   ;;  %v4441_v28 = vpop.permute.xlu0 %1737 }
 0x37e   : > { %1218 = vrot.lane.b32.xlu0 %v4355_v59, %s3065_s10  ;;  %1158 = vrot.lane.b32.xlu1 %v4355_v59, %s3066_s6  ;;  %5428 = vst [vmem:[#allocation16_spill] sm:$0xff] %v4441_v28  ;;  %vm1372_vm9 = vcmp.lt.s32.totalorder %v3687_v5, 35 }
 0x381   : > { %v4447_v43 = vpop.permute.xlu0 %1767 }
 0x382   : > { %2177 = vperm.xlu0 %2857, %v4226_v39   ;;  %1160 = vrot.lane.b32.xlu1 %v4359_v30, %s3066_s6  ;;  %s3081_s6 = smov 35   ;;  %5429 = vst [vmem:[#allocation14_spill] sm:$0xff] %v4447_v43  ;;  %v1187_v43 = vld [vmem:[#allocation5 + $0x1] ss:$8 sm:$0x3] }
 0x383   : > { %v1199_v46 = vrot.slane %v1187_v43, %v3693_v10  ;;  %v1203_v26 = vrot.slane %v1187_v43, %v3695_v3 }
 0x386   : > { %2858 = vset.pattern.permute.xlu0 %v3067_v17  ;;  %1188 = vrot.lane.b32.xlu1 %v4355_v59, %s3068_s13  ;;  %v4454_v17 = vpop.permute.xlu0 %1797 }
 0x387   : > { %2207 = vperm.xlu0 %2858, %v4226_v39   ;;  %5430 = vst [vmem:[#allocation30_spill] sm:$0xff] %v4454_v17 }
 0x38a   : > { %1190 = vrot.lane.b32.xlu1 %v4359_v30, %s3068_s13  ;;  %s3083_s13 = smov 34  }
 0x38b   : > { %1988 = vrot.lane.b32.xlu0 %v4355_v59, %s3035_s12 }
 0x38c   : > { %2859 = vset.pattern.permute.xlu0 %v3069_v32 }
 0x38e   : > { %1220 = vrot.lane.b32.xlu1 %v4359_v30, %s3065_s10  ;;  %s3078_s10 = smov 45  }
 0x38f   : > { %2237 = vperm.xlu0 %2859, %v4226_v39  }
 0x392   : > { %1248 = vrot.lane.b32.xlu1 %v4355_v59, %s3070_s9 }
 0x393   : > { %2860 = vset.pattern.permute.xlu0 %v3071_v4  ;;  %v4460_v4 = vpop.permute.xlu0 %1813 }
 0x394   : > { %2267 = vperm.xlu0 %2860, %v4226_v39   ;;  %5431 = vst [vmem:[#allocation26_spill] sm:$0xff] %v4460_v4 }
 0x396   : > { %1250 = vrot.lane.b32.xlu1 %v4359_v30, %s3070_s9  ;;  %s3084_s9 = smov 77  }
 0x398   : > { %2861 = vset.pattern.permute.xlu0 %v3072_v57 }
 0x399   : > { %2297 = vperm.xlu0 %2861, %v4226_v39  }
 0x39a   : > { %1278 = vrot.lane.b32.xlu1 %v4355_v59, %s3073_s21 }
 0x39d   : > { %2862 = vset.pattern.permute.xlu0 %v3074_v20 }
 0x39e   : > { %2327 = vperm.xlu0 %2862, %v4226_v39   ;;  %1280 = vrot.lane.b32.xlu1 %v4359_v30, %s3073_s21  ;;  %s3085_s21 = smov 33  }
 0x3a2   : > { %2863 = vset.pattern.permute.xlu0 %v3075_v47  ;;  %1308 = vrot.lane.b32.xlu1 %v4355_v59, %s3076_s28  ;;  %v4467_v47 = vpop.permute.xlu0 %1829 }
 0x3a3   : > { %2357 = vperm.xlu0 %2863, %v4226_v39   ;;  %5432 = vst [vmem:[#allocation31_spill] sm:$0xff] %v4467_v47 }
 0x3a6   : > { %1310 = vrot.lane.b32.xlu1 %v4359_v30, %s3076_s28  ;;  %s3086_s28 = smov 32  }
 0x3a7   : > { %2864 = vset.pattern.permute.xlu0 %v3077_v2 }
 0x3a8   : > { %2387 = vperm.xlu0 %2864, %v4226_v39  }
 0x3aa   : > { %1338 = vrot.lane.b32.xlu1 %v4355_v59, %s3078_s10 }
 0x3ac   : > { %2865 = vset.pattern.permute.xlu0 %v3079_v8  ;;  %v4474_v8 = vpop.permute.xlu0 %1859 }
 0x3ad   : > { %2417 = vperm.xlu0 %2865, %v4226_v39   ;;  %5433 = vst [vmem:[#allocation27_spill] sm:$0xff] %v4474_v8 }
 0x3ae   : > { %1340 = vrot.lane.b32.xlu1 %v4359_v30, %s3078_s10  ;;  %s3087_s10 = smov 31  }
 0x3b0   : > { %v4482_v18 = vpop.permute.xlu0 %1889 }
 0x3b1   : > { %2866 = vset.pattern.permute.xlu0 %v3080_v6  ;;  %5434 = vst [vmem:[#allocation32_spill] sm:$0xff] %v4482_v18 }
 0x3b2   : > { %2447 = vperm.xlu0 %2866, %v4226_v39   ;;  %1368 = vrot.lane.b32.xlu1 %v4355_v59, %s3081_s6 }
 0x3b4   : > { %v4490_v38 = vpop.permute.xlu0 %1919 }
 0x3b5   : > { %5435 = vst [vmem:[#allocation33_spill] sm:$0xff] %v4490_v38 }
 0x3b6   : > { %2867 = vset.pattern.permute.xlu0 %v3082_v60  ;;  %1370 = vrot.lane.b32.xlu1 %v4359_v30, %s3081_s6  ;;  %s3088_s6 = smov 30  }
 0x3b7   : > { %2477 = vperm.xlu0 %2867, %v4226_v39  }
 0x3b8   : > { %v4497_v19 = vpop.permute.xlu0 %1949 }
 0x3b9   : > { %5436 = vst [vmem:[#allocation40_spill] sm:$0xff] %v4497_v19 }
 0x3ba   : > { %1398 = vrot.lane.b32.xlu1 %v4355_v59, %s3083_s13 }
 0x3bb   : > { %2456 = vrot.lane.b32.xlu0 %v4355_v59, %s3084_s9 }
 0x3bc   : > { %v4503_v55 = vpop.permute.xlu0 %1965 }
 0x3bd   : > { %5437 = vst [vmem:[#allocation36_spill] sm:$0xff] %v4503_v55 }
 0x3be   : > { %1400 = vrot.lane.b32.xlu1 %v4359_v30, %s3083_s13  ;;  %s3089_s13 = smov 29  }
 0x3c0   : > { %v4510_v8 = vpop.permute.xlu0 %1981 }
 0x3c1   : > { %5438 = vst [vmem:[#allocation34_spill] sm:$0xff] %v4510_v8 }
 0x3c2   : > { %1428 = vrot.lane.b32.xlu1 %v4355_v59, %s3085_s21 }
 0x3c4   : > { %v4516_v47 = vpop.permute.xlu0 %2057 }
 0x3c5   : > { %5440 = vst [vmem:[#allocation37_spill] sm:$0xff] %v4516_v47  ;;  %v1157_v47 = vld [vmem:[#allocation5] ss:$8 sm:$0x3] }
 0x3c6   : > { %1430 = vrot.lane.b32.xlu1 %v4359_v30, %s3085_s21  ;;  %s3090_s21 = smov 19   ;;  %v1169_v40 = vrot.slane %v1157_v47, %v3693_v10  ;;  %v1173_v62 = vrot.slane %v1157_v47, %v3695_v3  ;;  %v1156_v47 = vmul.f32 %v4315_v63, %v4359_v30 }
 0x3c8   : > { %v4523_v31 = vpop.permute.xlu0 %2087 }
 0x3c9   : > { %5443 = vst [vmem:[#allocation35_spill] sm:$0xff] %v4523_v31 }
 0x3ca   : > { %1458 = vrot.lane.b32.xlu1 %v4355_v59, %s3086_s28 }
 0x3cc   : > { %v4530_v4 = vpop.permute.xlu0 %2117 }
 0x3cd   : > { %5445 = vst [vmem:[#allocation38_spill] sm:$0xff] %v4530_v4 }
 0x3ce   : > { %1460 = vrot.lane.b32.xlu1 %v4359_v30, %s3086_s28  ;;  %s3091_s28 = smov 18  }
 0x3d0   : > { %v4539_v31 = vpop.permute.xlu0 %2147 }
 0x3d1   : > { %5448 = vst [vmem:[#allocation53_spill] sm:$0xff] %v4539_v31  ;;  %v1155_v31 = vmul.f32 %v4315_v63, %v4355_v59 }
 0x3d2   : > { %1488 = vrot.lane.b32.xlu1 %v4355_v59, %s3087_s10 }
 0x3d6   : > { %1490 = vrot.lane.b32.xlu1 %v4359_v30, %s3087_s10  ;;  %s3093_s10 = smov 13  }
 0x3da   : > { %1518 = vrot.lane.b32.xlu1 %v4355_v59, %s3088_s6 }
 0x3de   : > { %1520 = vrot.lane.b32.xlu1 %v4359_v30, %s3088_s6  ;;  %s3095_s6 = smov 2  }
 0x3e2   : > { %1548 = vrot.lane.b32.xlu1 %v4355_v59, %s3089_s13 }
 0x3e6   : > { %1550 = vrot.lane.b32.xlu1 %v4359_v30, %s3089_s13  ;;  %s3096_s13 = smov 126  }
 0x3ea   : > { %1578 = vrot.lane.b32.xlu1 %v4355_v59, %s3090_s21 }
 0x3ee   : > { %1580 = vrot.lane.b32.xlu1 %v4359_v30, %s3090_s21  ;;  %s3099_s21 = smov 114  }
 0x3f0   : > { %v4404_v39 = vpop.permute.xlu1 %1158 }
 0x3f2   : > { %1608 = vrot.lane.b32.xlu1 %v4355_v59, %s3091_s28 }
 0x3f4   : > { %v4407_v22 = vpop.permute.xlu1 %1160 }
 0x3f5   : > { %v1163_v4 = vsel %vm1162_vm10, %v4404_v39, %v4407_v22  ;;  %v1164_v25 = vsel %vm1162_vm10, %v4407_v22, %v4404_v39  ;;  %v1233_v39 = vrot.slane %v1217_v1, %v3695_v3  ;;  %v1259_v22 = vrot.slane %v1247_v36, %v3693_v10  ;;  %v1219_v1 = vpop.permute.xlu0 %1218 }
 0x3f6   : > { %1610 = vrot.lane.b32.xlu1 %v4359_v30, %s3091_s28  ;;  %v1177_v42 = vmul.f32 %v1173_v62, %v1163_v4  ;;  %v1293_v62 = vrot.slane %v1277_v50, %v3695_v3  ;;  %vm1402_vm10 = vcmp.lt.s32.totalorder %v3687_v5, 34  ;;  %s3103_s28 = smov 98  }
 0x3f8   : > { %v4410_v34 = vpop.permute.xlu1 %1188 }
 0x3fa   : > { %1636 = vrot.lane.b32.xlu1 %v4355_v59, %s3026_s7 }
 0x3fc   : > { %v4414_v0 = vpop.permute.xlu1 %1190 }
 0x3fd   : > { %v1193_v63 = vsel %vm1192_vm11, %v4410_v34, %v4414_v0  ;;  %v1194_v43 = vsel %vm1192_vm11, %v4414_v0, %v4410_v34  ;;  %vm1432_vm11 = vcmp.lt.s32.totalorder %v3687_v5, 33 }
 0x3fe   : > { %1638 = vrot.lane.b32.xlu1 %v4359_v30, %s3026_s7  ;;  %s3092_s7 = smov 14  }
 0x400   : > { %v4418_v16 = vpop.permute.xlu1 %1220 }
 0x401   : > { %v1223_v4 = vsel %vm1222_vm12, %v1219_v1, %v4418_v16  ;;  %v1224_v34 = vsel %vm1222_vm12, %v4418_v16, %v1219_v1  ;;  %v1183_v16 = vmul.f32 %v4319_v27, %v1177_v42  ;;  %vm1462_vm12 = vcmp.lt.s32.totalorder %v3687_v5, 32 }
 0x402   : > { %1652 = vrot.lane.b32.xlu1 %v4355_v59, %s3027_s26 }
 0x404   : > { %v4422_v12 = vpop.permute.xlu1 %1248 }
 0x406   : > { %1654 = vrot.lane.b32.xlu1 %v4359_v30, %s3027_s26 }
 0x408   : > { %v4426_v52 = vpop.permute.xlu1 %1250 }
 0x409   : > { %v1254_v42 = vsel %vm1252_vm13, %v4426_v52, %v4422_v12 }
 0x40a   : > { %1668 = vrot.lane.b32.xlu1 %v4355_v59, %s3028_s8 }
 0x40c   : > { %v4430_v21 = vpop.permute.xlu1 %1278 }
 0x40e   : > { %1670 = vrot.lane.b32.xlu1 %v4359_v30, %s3028_s8  ;;  %s3094_s8 = smov 3  }
 0x410   : > { %v4436_v29 = vpop.permute.xlu1 %1280 }
 0x412   : > { %1686 = vrot.lane.b32.xlu1 %v4355_v59, %s3092_s7 }
 0x414   : > { %v4439_v13 = vpop.permute.xlu1 %1308 }
 0x416   : > { %1688 = vrot.lane.b32.xlu1 %v4359_v30, %s3092_s7  ;;  %s3104_s7 = smov 97  }
 0x418   : > { %v4444_v48 = vpop.permute.xlu1 %1310 }
 0x41a   : > { %1716 = vrot.lane.b32.xlu1 %v4355_v59, %s3093_s10 }
 0x41c   : > { %v4449_v15 = vpop.permute.xlu1 %1338 }
 0x41e   : > { %1718 = vrot.lane.b32.xlu1 %v4359_v30, %s3093_s10  ;;  %s3105_s10 = smov 96  }
 0x420   : > { %v4452_v56 = vpop.permute.xlu1 %1340 }
 0x422   : > { %1746 = vrot.lane.b32.xlu1 %v4355_v59, %s3094_s8 }
 0x424   : > { %v4457_v32 = vpop.permute.xlu1 %1368 }
 0x426   : > { %1748 = vrot.lane.b32.xlu1 %v4359_v30, %s3094_s8  ;;  %s3106_s8 = smov 95  }
 0x428   : > { %v4462_v57 = vpop.permute.xlu1 %1370 }
 0x42a   : > { %1776 = vrot.lane.b32.xlu1 %v4355_v59, %s3095_s6 }
 0x42c   : > { %v4465_v20 = vpop.permute.xlu1 %1398 }
 0x42e   : > { %1778 = vrot.lane.b32.xlu1 %v4359_v30, %s3095_s6  ;;  %s3107_s6 = smov 94  }
 0x430   : > { %v4470_v2 = vpop.permute.xlu1 %1400 }
 0x432   : > { %1804 = vrot.lane.b32.xlu1 %v4355_v59, %s3029_s25 }
 0x434   : > { %v4476_v6 = vpop.permute.xlu1 %1428 }
 0x436   : > { %1806 = vrot.lane.b32.xlu1 %v4359_v30, %s3029_s25  ;;  %s3097_s25 = smov 125  }
 0x438   : > { %v4480_v60 = vpop.permute.xlu1 %1430 }
 0x43a   : > { %1820 = vrot.lane.b32.xlu1 %v4355_v59, %s3030_s14 }
 0x43c   : > { %v4486_v35 = vpop.permute.xlu1 %1458 }
 0x43e   : > { %1822 = vrot.lane.b32.xlu1 %v4359_v30, %s3030_s14  ;;  %s3098_s14 = smov 115  }
 0x440   : > { %v4492_v54 = vpop.permute.xlu1 %1460 }
 0x442   : > { %1838 = vrot.lane.b32.xlu1 %v4355_v59, %s3096_s13 }
 0x444   : > { %v4495_v14 = vpop.permute.xlu1 %1488 }
 0x446   : > { %1840 = vrot.lane.b32.xlu1 %v4359_v30, %s3096_s13  ;;  %s3108_s13 = smov 93  }
 0x448   : > { %v4500_v33 = vpop.permute.xlu1 %1490 }
 0x44a   : > { %1868 = vrot.lane.b32.xlu1 %v4355_v59, %s3097_s25 }
 0x44c   : > { %v4505_v18 = vpop.permute.xlu1 %1518 }
 0x44e   : > { %1870 = vrot.lane.b32.xlu1 %v4359_v30, %s3097_s25  ;;  %s3109_s25 = smov 83  }
 0x450   : > { %v4508_v38 = vpop.permute.xlu1 %1520 }
 0x452   : > { %1898 = vrot.lane.b32.xlu1 %v4355_v59, %s3098_s14 }
 0x454   : > { %v4513_v19 = vpop.permute.xlu1 %1548 }
 0x455   : > { %5439 = vst [vmem:[#allocation41_spill] sm:$0xff] %v4513_v19 }
 0x456   : > { %1900 = vrot.lane.b32.xlu1 %v4359_v30, %s3098_s14  ;;  %s3110_s14 = smov 82  }
 0x458   : > { %v4518_v49 = vpop.permute.xlu1 %1550 }
 0x459   : > { %5441 = vst [vmem:[#allocation43_spill] sm:$0xff] %v4518_v49 }
 0x45a   : > { %1928 = vrot.lane.b32.xlu1 %v4355_v59, %s3099_s21 }
 0x45c   : > { %v4521_v55 = vpop.permute.xlu1 %1578 }
 0x45d   : > { %5442 = vst [vmem:[#allocation39_spill] sm:$0xff] %v4521_v55  ;;  %v1206_v55 = vmul.f32 %v1199_v46, %v1194_v43  ;;  %v1237_v46 = vmul.f32 %v1233_v39, %v1223_v4 }
 0x45e   : > { %1930 = vrot.lane.b32.xlu1 %v4359_v30, %s3099_s21  ;;  %s3111_s21 = smov 81  }
 0x460   : > { %v4526_v8 = vpop.permute.xlu1 %1580 }
 0x461   : > { %5444 = vst [vmem:[#allocation42_spill] sm:$0xff] %v4526_v8  ;;  %v1207_v8 = vmul.f32 %v1203_v26, %v1193_v63  ;;  %v1236_v26 = vmul.f32 %v1229_v24, %v1224_v34  ;;  %v1383_v24 = vrot.slane %v4595_v44, %v3695_v3  ;;  %v1212_v63 = vmul.f32 %v4323_v61, %v1206_v55  ;;  %v4637_v34 = vld [vmem:[#allocation5 + $0x11] ss:$8 sm:$0x3] }
 0x462   : > { %1956 = vrot.lane.b32.xlu1 %v4355_v59, %s3031_s5 }
 0x463   : > { %v1213_v43 = vmul.f32 %v4323_v61, %v1207_v8  ;;  %v1185_v8 = vadd.f32 %v1183_v16, %v1156_v47 }
 0x464   : > { %v4532_v17 = vpop.permute.xlu1 %1608 }
 0x465   : > { %5446 = vst [vmem:[#allocation47_spill] sm:$0xff] %v4532_v17  ;;  %v4563_v17 = vld [vmem:[#allocation5 + $0x5] ss:$8 sm:$0x3] }
 0x466   : > { %1958 = vrot.lane.b32.xlu1 %v4359_v30, %s3031_s5  ;;  %s3100_s5 = smov 110  }
 0x468   : > { %v4537_v28 = vpop.permute.xlu1 %1610 }
 0x469   : > { %5447 = vst [vmem:[#allocation46_spill] sm:$0xff] %v4537_v28  ;;  %v1176_v28 = vmul.f32 %v1169_v40, %v1164_v25  ;;  %v1289_v25 = vrot.slane %v1277_v50, %v3693_v10  ;;  %v4579_v40 = vld [vmem:[#allocation5 + $0x6] ss:$8 sm:$0x3]  ;;  %v1323_v50 = vrot.slane %v4563_v17, %v3695_v3 }
 0x46a   : > { %1972 = vrot.lane.b32.xlu1 %v4355_v59, %s3033_s23  ;;  %v1349_v1 = vrot.slane %v4579_v40, %v3693_v10  ;;  %v1353_v49 = vrot.slane %v4579_v40, %v3695_v3  ;;  %v1266_v40 = vmul.f32 %v1259_v22, %v1254_v42  ;;  %v1314_v22 = vsel %vm1312_vm15, %v4444_v48, %v4439_v13 }
 0x46b   : > { %v1182_v19 = vmul.f32 %v4319_v27, %v1176_v28  ;;  %v4613_v27 = vld [vmem:[#allocation5 + $0x10] ss:$8 sm:$0x3]  ;;  %v1379_v28 = vrot.slane %v4595_v44, %v3693_v10 }
 0x46c   : > { %v4557_v45 = vpop.permute.xlu1 %1636  ;;  %v1409_v4 = vrot.slane %v4613_v27, %v3693_v10  ;;  %v1413_v55 = vrot.slane %v4613_v27, %v3695_v3  ;;  %v1272_v16 = vmul.f32 %v4283_v53, %v1266_v40 }
 0x46d   : > { %5449 = vst [vmem:[#allocation50_spill] sm:$0xff] %v4557_v45  ;;  %v1263_v45 = vrot.slane %v1247_v36, %v3695_v3  ;;  %v1319_v36 = vrot.slane %v4563_v17, %v3693_v10  ;;  %v1253_v17 = vsel %vm1252_vm13, %v4422_v12, %v4426_v52  ;;  %v1283_v12 = vsel %vm1282_vm14, %v4430_v21, %v4436_v29 }
 0x46e   : > { %1974 = vrot.lane.b32.xlu1 %v4359_v30, %s3033_s23  ;;  %v1284_v52 = vsel %vm1282_vm14, %v4436_v29, %v4430_v21  ;;  %v1184_v61 = vadd.f32 %v1182_v19, %v1155_v31  ;;  %v1297_v21 = vmul.f32 %v1293_v62, %v1283_v12  ;;  %v1313_v29 = vsel %vm1312_vm15, %v4439_v13, %v4444_v48  ;;  %v4651_v31 = vld [vmem:[#allocation5 + $0x12] ss:$8 sm:$0x3]  ;;  %s3101_s23 = smov 109  }
 0x46f   : > { %v1267_v44 = vmul.f32 %v1263_v45, %v1253_v17  ;;  %v1296_v45 = vmul.f32 %v1289_v25, %v1284_v52  ;;  %v1439_v25 = vrot.slane %v4637_v34, %v3693_v10  ;;  %v1443_v62 = vrot.slane %v4637_v34, %v3695_v3 }
 0x470   : > { %v4590_v0 = vpop.permute.xlu1 %1638  ;;  %v1214_v47 = vadd.f32 %v1212_v63, %v1184_v61  ;;  %v1343_v13 = vsel %vm1342_vm8, %v4449_v15, %v4452_v56  ;;  %v1344_v48 = vsel %vm1342_vm8, %v4452_v56, %v4449_v15  ;;  %v1327_v17 = vmul.f32 %v1323_v50, %v1313_v29 }
 0x471   : > { %5450 = vst [vmem:[#allocation58_spill] sm:$0xff] %v4590_v0  ;;  %v1243_v0 = vmul.f32 %v4280_v58, %v1237_v46  ;;  %v1326_v46 = vmul.f32 %v1319_v36, %v1314_v22  ;;  %v1469_v42 = vrot.slane %v4651_v31, %v3693_v10  ;;  %v1302_v63 = vmul.f32 %v4286_v51, %v1296_v45  ;;  %v1487_v36 = vld [vmem:[#allocation5 + $0x13] ss:$8 sm:$0x3] }
 0x472   : > { %1990 = vrot.lane.b32.xlu1 %v4359_v30, %s3035_s12  ;;  %v1356_v52 = vmul.f32 %v1349_v1, %v1344_v48  ;;  %v1357_v40 = vmul.f32 %v1353_v49, %v1343_v13  ;;  %v1373_v15 = vsel %vm1372_vm9, %v4457_v32, %v4462_v57  ;;  %v1374_v56 = vsel %vm1372_vm9, %v4462_v57, %v4457_v32  ;;  %v1547_v48 = vld [vmem:[#allocation5 + $0x15] ss:$8 sm:$0x3]  ;;  %s3102_s12 = smov 99  }
 0x473   : > { %vm1492_vm13 = vcmp.lt.s32.totalorder %v3687_v5, 31  ;;  %v1332_v49 = vmul.f32 %v4289_v9, %v1326_v46  ;;  %v1333_v1 = vmul.f32 %v4289_v9, %v1327_v17  ;;  %v1403_v32 = vsel %vm1402_vm10, %v4465_v20, %v4470_v2 }
 0x474   : > { %v4621_v39 = vpop.permute.xlu1 %1652  ;;  %v1404_v57 = vsel %vm1402_vm10, %v4470_v2, %v4465_v20  ;;  %v1499_v34 = vrot.slane %v1487_v36, %v3693_v10  ;;  %v1503_v61 = vrot.slane %v1487_v36, %v3695_v3  ;;  %v1362_v29 = vmul.f32 %v4292_v37, %v1356_v52 }
 0x475   : > { %5451 = vst [vmem:[#allocation65_spill] sm:$0xff] %v4621_v39  ;;  %v1242_v39 = vmul.f32 %v4280_v58, %v1236_v26  ;;  %v1215_v58 = vadd.f32 %v1213_v43, %v1185_v8  ;;  %v1273_v26 = vmul.f32 %v4283_v53, %v1267_v44  ;;  %v1303_v43 = vmul.f32 %v4286_v51, %v1297_v21  ;;  %v1517_v8 = vld [vmem:[#allocation5 + $0x14] ss:$8 sm:$0x3] }
 0x476   : > { %2006 = vrot.lane.b32.xlu1 %v4355_v59, %s3100_s5  ;;  %v1473_v51 = vrot.slane %v4651_v31, %v3695_v3  ;;  %v1387_v44 = vmul.f32 %v1383_v24, %v1373_v15  ;;  %v1363_v22 = vmul.f32 %v4292_v37, %v1357_v40  ;;  %v1416_v31 = vmul.f32 %v1409_v4, %v1404_v57  ;;  %v5452_v57 = vld [vmem:[#allocation43_spill] sm:$0xff] }
 0x477   : > { %v1244_v53 = vadd.f32 %v1242_v39, %v1214_v47  ;;  %v1245_v27 = vadd.f32 %v1243_v0, %v1215_v58  ;;  %v1386_v39 = vmul.f32 %v1379_v28, %v1374_v56  ;;  %v1417_v47 = vmul.f32 %v1413_v55, %v1403_v32 }
 0x478   : > { %v4653_v19 = vpop.permute.xlu1 %1654  ;;  %v1433_v20 = vsel %vm1432_vm11, %v4476_v6, %v4480_v60  ;;  %v1434_v2 = vsel %vm1432_vm11, %v4480_v60, %v4476_v6  ;;  %vm1522_vm14 = vcmp.lt.s32.totalorder %v3687_v5, 30  ;;  %v1529_v37 = vrot.slane %v1517_v8, %v3693_v10 }
 0x479   : > { %v1274_v0 = vadd.f32 %v1272_v16, %v1244_v53  ;;  %v1275_v50 = vadd.f32 %v1273_v26, %v1245_v27  ;;  %v1392_v4 = vmul.f32 %v4295_v41, %v1386_v39  ;;  %v1393_v55 = vmul.f32 %v4295_v41, %v1387_v44  ;;  %v5453_v39 = vld [vmem:[#allocation41_spill] sm:$0xff]  ;;  %v1607_v44 = vld [vmem:[#allocation5 + $0x17] ss:$8 sm:$0x3] }
 0x47a   : > { %2008 = vrot.lane.b32.xlu1 %v4359_v30, %s3100_s5  ;;  %v1463_v58 = vsel %vm1462_vm12, %v4486_v35, %v4492_v54  ;;  %v1464_v6 = vsel %vm1462_vm12, %v4492_v54, %v4486_v35  ;;  %v1446_v16 = vmul.f32 %v1439_v25, %v1434_v2  ;;  %v1447_v26 = vmul.f32 %v1443_v62, %v1433_v20  ;;  %v1577_v62 = vld [vmem:[#allocation5 + $0x16] ss:$8 sm:$0x3]  ;;  %s3112_s5 = smov 80  }
 0x47b   : > { %v1304_v9 = vadd.f32 %v1302_v63, %v1274_v0  ;;  %v1305_v21 = vadd.f32 %v1303_v43, %v1275_v50  ;;  %v1533_v13 = vrot.slane %v1517_v8, %v3695_v3  ;;  %vm1552_vm15 = vcmp.lt.s32.totalorder %v3687_v5, 29 }
 0x47c   : > { %v4675_v12 = vpop.permute.xlu1 %1668  ;;  %v1422_v17 = vmul.f32 %v4299_v23, %v1416_v31  ;;  %v1423_v53 = vmul.f32 %v4299_v23, %v1417_v47  ;;  %v1476_v27 = vmul.f32 %v1469_v42, %v1464_v6  ;;  %v1477_v54 = vmul.f32 %v1473_v51, %v1463_v58  ;;  %v5456_v31 = vld [vmem:[#allocation39_spill] sm:$0xff]  ;;  %v5457_v6 = vld [vmem:[#allocation21_spill] sm:$0xff] }
 0x47d   : > { %v1334_v28 = vadd.f32 %v1332_v49, %v1304_v9  ;;  %v1335_v24 = vadd.f32 %v1333_v1, %v1305_v21  ;;  %v1493_v35 = vsel %vm1492_vm13, %v4495_v14, %v4500_v33  ;;  %v1494_v25 = vsel %vm1492_vm13, %v4500_v33, %v4495_v14 }
 0x47e   : > { %2036 = vrot.lane.b32.xlu1 %v4355_v59, %s3101_s23  ;;  %v1559_v23 = vrot.slane %v1547_v48, %v3693_v10  ;;  %v1563_v52 = vrot.slane %v1547_v48, %v3695_v3  ;;  %v1452_v42 = vmul.f32 %v4302_v7, %v1446_v16  ;;  %v1453_v15 = vmul.f32 %v4302_v7, %v1447_v26 }
 0x47f   : > { %v1364_v41 = vadd.f32 %v1362_v29, %v1334_v28  ;;  %v1365_v46 = vadd.f32 %v1363_v22, %v1335_v24  ;;  %v1523_v56 = vsel %vm1522_vm14, %v4505_v18, %v4508_v38  ;;  %v1524_v33 = vsel %vm1522_vm14, %v4508_v38, %v4505_v18  ;;  %v5455_v22 = vld [vmem:[#allocation42_spill] sm:$0xff] }
 0x480   : > { %v4701_v45 = vpop.permute.xlu1 %1670  ;;  %v1506_v14 = vmul.f32 %v1499_v34, %v1494_v25  ;;  %v1507_v36 = vmul.f32 %v1503_v61, %v1493_v35  ;;  %vm1582_vm8 = vcmp.lt.s32.totalorder %v3687_v5, 19  ;;  %v1589_v0 = vrot.slane %v1577_v62, %v3693_v10 }
 0x481   : > { %v1394_v63 = vadd.f32 %v1392_v4, %v1364_v41  ;;  %v1395_v43 = vadd.f32 %v1393_v55, %v1365_v46  ;;  %v1482_v51 = vmul.f32 %v4305_v11, %v1476_v27  ;;  %v1483_v49 = vmul.f32 %v4305_v11, %v1477_v54  ;;  %v5454_v11 = vld [vmem:[#allocation11_spill] sm:$0xff]  ;;  %v4785_v4 = vld [vmem:[#allocation5 + $0x23] ss:$8 sm:$0x3] }
 0x482   : > { %2038 = vrot.lane.b32.xlu1 %v4359_v30, %s3101_s23  ;;  %v1536_v1 = vmul.f32 %v1529_v37, %v1524_v33  ;;  %v1537_v32 = vmul.f32 %v1533_v13, %v1523_v56  ;;  %v1553_v38 = vsel %vm1552_vm15, %v5453_v39, %v5452_v57  ;;  %v1554_v18 = vsel %vm1552_vm15, %v5452_v57, %v5453_v39  ;;  %v5458_v46 = vld [vmem:[#allocation46_spill] sm:$0xff]  ;;  %v5465_v39 = vld [vmem:[#allocation45_spill] sm:$0xff]  ;;  %s3113_s23 = smov 79  }
 0x483   : > { %v1424_v50 = vadd.f32 %v1422_v17, %v1394_v63  ;;  %v1425_v7 = vadd.f32 %v1423_v53, %v1395_v43  ;;  %v1593_v9 = vrot.slane %v1577_v62, %v3695_v3  ;;  %vm1612_vm9 = vcmp.lt.s32.totalorder %v3687_v5, 18  ;;  %v5459_v17 = vld [vmem:[#allocation47_spill] sm:$0xff]  ;;  %v5460_v62 = vld [vmem:[#allocation18_spill] sm:$0xff] }
 0x484   : > { %v4726_v60 = vpop.permute.xlu1 %1686  ;;  %v1512_v21 = vmul.f32 %v5454_v11, %v1506_v14  ;;  %v1513_v29 = vmul.f32 %v5454_v11, %v1507_v36  ;;  %v1583_v47 = vsel %vm1582_vm8, %v5456_v31, %v5455_v22  ;;  %v1584_v20 = vsel %vm1582_vm8, %v5455_v22, %v5456_v31  ;;  %v1715_v36 = vld [vmem:[#allocation5 + $0x24] ss:$8 sm:$0x3]  ;;  %v5467_v22 = vld [vmem:[#allocation15_spill] sm:$0xff] }
 0x485   : > { %v1454_v61 = vadd.f32 %v1452_v42, %v1424_v50  ;;  %v1455_v8 = vadd.f32 %v1453_v15, %v1425_v7  ;;  %v1566_v2 = vmul.f32 %v1559_v23, %v1554_v18  ;;  %v1567_v28 = vmul.f32 %v1563_v52, %v1553_v38  ;;  %v5461_v23 = vld [vmem:[#allocation58_spill] sm:$0xff]  ;;  %v5466_v18 = vld [vmem:[#allocation65_spill] sm:$0xff] }
 0x486   : > { %2066 = vrot.lane.b32.xlu1 %v4355_v59, %s3102_s12  ;;  %v1619_v24 = vrot.slane %v1607_v44, %v3693_v10  ;;  %v1623_v37 = vrot.slane %v1607_v44, %v3695_v3  ;;  %v1542_v16 = vmul.f32 %v5457_v6, %v1536_v1  ;;  %v1543_v26 = vmul.f32 %v5457_v6, %v1537_v32  ;;  %v5462_v52 = vld [vmem:[#allocation50_spill] sm:$0xff]  ;;  %v5464_v32 = vld [vmem:[#allocation44_spill] sm:$0xff] }
 0x487   : > { %v1484_v55 = vadd.f32 %v1482_v51, %v1454_v61  ;;  %v1485_v58 = vadd.f32 %v1483_v49, %v1455_v8  ;;  %v1596_v48 = vmul.f32 %v1589_v0, %v1584_v20  ;;  %v1597_v41 = vmul.f32 %v1593_v9, %v1583_v47  ;;  %v5463_v51 = vld [vmem:[#allocation17_spill] sm:$0xff] }
 0x488   : > { %v4743_v40 = vpop.permute.xlu1 %1688  ;;  %v1613_v53 = vsel %vm1612_vm9, %v5459_v17, %v5458_v46  ;;  %v1614_v27 = vsel %vm1612_vm9, %v5458_v46, %v5459_v17  ;;  %vm1690_vm10 = vcmp.lt.s32.totalorder %v3687_v5, 14  ;;  %v1697_v25 = vrot.slane %v4785_v4, %v3693_v10  ;;  %v1745_v8 = vld [vmem:[#allocation5 + $0x25] ss:$8 sm:$0x3] }
 0x489   : > { %v1514_v54 = vadd.f32 %v1512_v21, %v1484_v55  ;;  %v1515_v35 = vadd.f32 %v1513_v29, %v1485_v58  ;;  %v1572_v63 = vmul.f32 %v5460_v62, %v1566_v2  ;;  %v1573_v43 = vmul.f32 %v5460_v62, %v1567_v28  ;;  %v5468_v28 = vld [vmem:[#allocation48_spill] sm:$0xff] }
 0x48a   : > { %2068 = vrot.lane.b32.xlu1 %v4359_v30, %s3102_s12  ;;  %v1640_v42 = vsel %vm351_vm0, %v5462_v52, %v5461_v23  ;;  %v1641_v15 = vsel %vm351_vm0, %v5461_v23, %v5462_v52  ;;  %v1626_v56 = vmul.f32 %v1619_v24, %v1614_v27  ;;  %v1627_v33 = vmul.f32 %v1623_v37, %v1613_v53  ;;  %v5469_v37 = vld [vmem:[#allocation49_spill] sm:$0xff]  ;;  %s3114_s12 = smov 78  }
 0x48b   : > { %v1701_v14 = vrot.slane %v4785_v4, %v3695_v3  ;;  %vm1720_vm11 = vcmp.lt.s32.totalorder %v3687_v5, 13  ;;  %v1544_v50 = vadd.f32 %v1542_v16, %v1514_v54  ;;  %v1545_v7 = vadd.f32 %v1543_v26, %v1515_v35  ;;  %v5470_v16 = vld [vmem:[#allocation22_spill] sm:$0xff] }
 0x48c   : > { %v4768_v34 = vpop.permute.xlu1 %1716  ;;  %v1602_v49 = vmul.f32 %v5463_v51, %v1596_v48  ;;  %v1603_v1 = vmul.f32 %v5463_v51, %v1597_v41  ;;  %v1642_v57 = vmul.f32 %v1641_v15, %v5464_v32  ;;  %v1643_v38 = vmul.f32 %v1640_v42, %v5465_v39  ;;  %v5471_v41 = vld [vmem:[#allocation51_spill] sm:$0xff] }
 0x48d   : > { %v1656_v44 = vsel %vm429_vm1, %v5466_v18, %v4653_v19  ;;  %v1657_v61 = vsel %vm429_vm1, %v4653_v19, %v5466_v18  ;;  %v1574_v9 = vadd.f32 %v1572_v63, %v1544_v50  ;;  %v1575_v11 = vadd.f32 %v1573_v43, %v1545_v7  ;;  %v5473_v63 = vld [vmem:[#allocation19_spill] sm:$0xff]  ;;  %v5475_v18 = vld [vmem:[#allocation25_spill] sm:$0xff] }
 0x48e   : > { %2096 = vrot.lane.b32.xlu1 %v4355_v59, %s3103_s28  ;;  %v1727_v21 = vrot.slane %v1715_v36, %v3693_v10  ;;  %v1731_v29 = vrot.slane %v1715_v36, %v3695_v3  ;;  %v1632_v31 = vmul.f32 %v5467_v22, %v1626_v56  ;;  %v1633_v47 = vmul.f32 %v5467_v22, %v1627_v33  ;;  %v5474_v36 = vld [vmem:[#allocation23_spill] sm:$0xff] }
 0x48f   : > { %v1672_v20 = vsel %vm507_vm2, %v4675_v12, %v4701_v45  ;;  %v1673_v19 = vsel %vm507_vm2, %v4701_v45, %v4675_v12  ;;  %v1658_v24 = vmul.f32 %v1657_v61, %v5468_v28  ;;  %v1659_v4 = vmul.f32 %v1656_v44, %v5469_v37  ;;  %v5472_v12 = vld [vmem:[#allocation52_spill] sm:$0xff]  ;;  %v5477_v28 = vld [vmem:[#allocation14_spill] sm:$0xff] }
 0x490   : > { %v1719_v13 = vpop.permute.xlu1 %1718  ;;  %vm1750_vm0 = vcmp.lt.s32.totalorder %v3687_v5, 3  ;;  %v1757_v55 = vrot.slane %v1745_v8, %v3693_v10  ;;  %v1604_v58 = vadd.f32 %v1602_v49, %v1574_v9  ;;  %v1605_v6 = vadd.f32 %v1603_v1, %v1575_v11 }
 0x491   : > { %v1648_v26 = vmul.f32 %v5470_v16, %v1642_v57  ;;  %v1649_v48 = vmul.f32 %v5470_v16, %v1643_v38  ;;  %v1674_v46 = vmul.f32 %v1673_v19, %v5471_v41  ;;  %v1675_v45 = vmul.f32 %v1672_v20, %v5472_v12 }
 0x492   : > { %2098 = vrot.lane.b32.xlu1 %v4359_v30, %s3103_s28  ;;  %v1691_v17 = vsel %vm1690_vm10, %v4726_v60, %v4743_v40  ;;  %v1692_v53 = vsel %vm1690_vm10, %v4743_v40, %v4726_v60  ;;  %v1634_v27 = vadd.f32 %v1632_v31, %v1604_v58  ;;  %v1635_v54 = vadd.f32 %v1633_v47, %v1605_v6  ;;  %v1775_v60 = vld [vmem:[#allocation5 + $0x26] ss:$8 sm:$0x3]  ;;  %s230_s28 = scalar_lea.vmem [#allocation7], %s2624_s20  ;;  %s2520_s20 = scalar_lea.sflag [#allocation4], %s3287_s11 }
 0x493   : > { %v1761_v35 = vrot.slane %v1745_v8, %v3695_v3  ;;  %vm1780_vm1 = vcmp.lt.s32.totalorder %v3687_v5, 2  ;;  %v1664_v43 = vmul.f32 %v5473_v63, %v1658_v24  ;;  %v1665_v23 = vmul.f32 %v5473_v63, %v1659_v4  ;;  %v5478_v58 = vld [vmem:[#allocation30_spill] sm:$0xff] }
 0x494   : > { %v1747_v0 = vpop.permute.xlu1 %1746  ;;  %v1721_v52 = vsel %vm1720_vm11, %v4768_v34, %v1719_v13  ;;  %v1722_v42 = vsel %vm1720_vm11, %v1719_v13, %v4768_v34  ;;  %v1650_v40 = vadd.f32 %v1648_v26, %v1634_v27  ;;  %v1651_v15 = vadd.f32 %v1649_v48, %v1635_v54 }
 0x495   : > { %v1704_v56 = vmul.f32 %v1697_v25, %v1692_v53  ;;  %v1705_v33 = vmul.f32 %v1701_v14, %v1691_v17  ;;  %v1680_v50 = vmul.f32 %v5474_v36, %v1674_v46  ;;  %v1681_v7 = vmul.f32 %v5474_v36, %v1675_v45  ;;  %v5479_v45 = vld [vmem:[#allocation54_spill] sm:$0xff]  ;;  %v5480_v53 = vld [vmem:[#allocation55_spill] sm:$0xff]  ;;  %v5483_v36 = vld [vmem:[#allocation57_spill] sm:$0xff] }
 0x496   : > { %2126 = vrot.lane.b32.xlu1 %v4355_v59, %s3104_s7  ;;  %v1734_v1 = vmul.f32 %v1727_v21, %v1722_v42  ;;  %v1735_v34 = vmul.f32 %v1731_v29, %v1721_v52  ;;  %v1787_v13 = vrot.slane %v1775_v60, %v3693_v10  ;;  %v1791_v25 = vrot.slane %v1775_v60, %v3695_v3  ;;  %v5476_v21 = vld [vmem:[#allocation16_spill] sm:$0xff] }
 0x497   : > { %v1666_v32 = vadd.f32 %v1664_v43, %v1650_v40  ;;  %v1667_v57 = vadd.f32 %v1665_v23, %v1651_v15  ;;  %v1710_v44 = vmul.f32 %v5475_v18, %v1704_v56  ;;  %v1711_v61 = vmul.f32 %v5475_v18, %v1705_v33  ;;  %v5482_v56 = vld [vmem:[#allocation56_spill] sm:$0xff] }
 0x498   : > { %v1749_v2 = vpop.permute.xlu1 %1748  ;;  %v1740_v29 = vmul.f32 %v5476_v21, %v1734_v1  ;;  %v1741_v22 = vmul.f32 %v5476_v21, %v1735_v34  ;;  %vm1842_vm2 = vcmp.lt.s32.totalorder %v3687_v5, 126  ;;  %vm1932_vm12 = vcmp.lt.s32.totalorder %v3687_v5, 114 }
 0x499   : > { %v1751_v51 = vsel %vm1750_vm0, %v1747_v0, %v1749_v2  ;;  %v1752_v49 = vsel %vm1750_vm0, %v1749_v2, %v1747_v0  ;;  %v1682_v9 = vadd.f32 %v1680_v50, %v1666_v32  ;;  %v1683_v11 = vadd.f32 %v1681_v7, %v1667_v57  ;;  %v1837_v7 = vld [vmem:[#allocation5 + $0x31] ss:$8 sm:$0x3] }
 0x49a   : > { %2128 = vrot.lane.b32.xlu1 %v4359_v30, %s3104_s7  ;;  %v1764_v0 = vmul.f32 %v1757_v55, %v1752_v49  ;;  %v1765_v8 = vmul.f32 %v1761_v35, %v1751_v51  ;;  %v5484_v51 = vld [vmem:[#allocation31_spill] sm:$0xff]  ;;  %v1853_v32 = vrot.slane %v1837_v7, %v3695_v3  ;;  %vm2100_vm13 = vcmp.lt.s32.totalorder %v3687_v5, 98  ;;  %s2533_s7 = sshll.u32 %s230_s28, 4  ;;  %s5128_s7 = int_to_ptr.vmem [resolvable:$true] %s2533_s7 }
 0x49b   : > { %v1712_v19 = vadd.f32 %v1710_v44, %v1682_v9  ;;  %v1713_v2 = vadd.f32 %v1711_v61, %v1683_v11  ;;  %v1867_v61 = vld [vmem:[#allocation5 + $0x32] ss:$8 sm:$0x3]  ;;  %vm2130_vm14 = vcmp.lt.s32.totalorder %v3687_v5, 97  ;;  %vm2160_vm15 = vcmp.lt.s32.totalorder %v3687_v5, 96 }
 0x49c   : > { %v1777_v62 = vpop.permute.xlu1 %1776  ;;  %v1770_v24 = vmul.f32 %v5477_v28, %v1764_v0  ;;  %v1771_v37 = vmul.f32 %v5477_v28, %v1765_v8  ;;  %v5485_v0 = vld [vmem:[#allocation27_spill] sm:$0xff]  ;;  %vm2190_vm8 = vcmp.lt.s32.totalorder %v3687_v5, 95  ;;  %vm2220_vm9 = vcmp.lt.s32.totalorder %v3687_v5, 94 }
 0x49d   : > { %v1742_v4 = vadd.f32 %v1740_v29, %v1712_v19  ;;  %v1743_v55 = vadd.f32 %v1741_v22, %v1713_v2  ;;  %v1879_v22 = vrot.slane %v1867_v61, %v3693_v10  ;;  %vm2250_vm10 = vcmp.lt.s32.totalorder %v3687_v5, 93 }
 0x49e   : > { %2156 = vrot.lane.b32.xlu1 %v4355_v59, %s3105_s10  ;;  %vm2280_vm11 = vcmp.lt.s32.totalorder %v3687_v5, 83  ;;  %vm2310_vm0 = vcmp.lt.s32.totalorder %v3687_v5, 82 }
 0x49f   : > { %v1772_v46 = vadd.f32 %v1770_v24, %v1742_v4  ;;  %v1773_v12 = vadd.f32 %v1771_v37, %v1743_v55  ;;  %v1897_v24 = vld [vmem:[#allocation5 + $0x33] ss:$8 sm:$0x3] }
 0x4a0   : > { %v1779_v14 = vpop.permute.xlu1 %1778  ;;  %v5486_v37 = vld [vmem:[#allocation32_spill] sm:$0xff] }
 0x4a1   : > { %v1781_v39 = vsel %vm1780_vm1, %v1777_v62, %v1779_v14  ;;  %v1782_v38 = vsel %vm1780_vm1, %v1779_v14, %v1777_v62  ;;  %v5481_v62 = vld [vmem:[#allocation26_spill] sm:$0xff]  ;;  %v1849_v14 = vrot.slane %v1837_v7, %v3693_v10  ;;  %vm2340_vm1 = vcmp.lt.s32.totalorder %v3687_v5, 81 }
 0x4a2   : > { %2158 = vrot.lane.b32.xlu1 %v4359_v30, %s3105_s10  ;;  %v1794_v31 = vmul.f32 %v1787_v13, %v1782_v38  ;;  %v1795_v47 = vmul.f32 %v1791_v25, %v1781_v39 }
 0x4a4   : > { %v1805_v20 = vpop.permute.xlu1 %1804  ;;  %v1800_v6 = vmul.f32 %v5478_v58, %v1794_v31  ;;  %v1801_v16 = vmul.f32 %v5478_v58, %v1795_v47  ;;  %v1883_v31 = vrot.slane %v1867_v61, %v3695_v3 }
 0x4a6   : > { %2186 = vrot.lane.b32.xlu1 %v4355_v59, %s3106_s8  ;;  %v1802_v54 = vadd.f32 %v1800_v6, %v1772_v46  ;;  %v1803_v35 = vadd.f32 %v1801_v16, %v1773_v12 }
 0x4a8   : > { %v1807_v26 = vpop.permute.xlu1 %1806 }
 0x4a9   : > { %v1808_v48 = vsel %vm585_vm3, %v1805_v20, %v1807_v26  ;;  %v1809_v41 = vsel %vm585_vm3, %v1807_v26, %v1805_v20  ;;  %vm1872_vm3 = vcmp.lt.s32.totalorder %v3687_v5, 125  ;;  %v1909_v26 = vrot.slane %v1897_v24, %v3693_v10 }
 0x4aa   : > { %v1810_v17 = vmul.f32 %v1809_v41, %v5479_v45  ;;  %v1811_v27 = vmul.f32 %v1808_v48, %v5480_v53  ;;  %2188 = vrot.lane.b32.xlu1 %v4359_v30, %s3106_s8  ;;  %v1913_v48 = vrot.slane %v1897_v24, %v3695_v3  ;;  %v1927_v53 = vld [vmem:[#allocation5 + $0x34] ss:$8 sm:$0x3] }
 0x4ac   : > { %v1816_v63 = vmul.f32 %v5481_v62, %v1810_v17  ;;  %v1817_v43 = vmul.f32 %v5481_v62, %v1811_v27  ;;  %v1821_v23 = vpop.permute.xlu1 %1820  ;;  %v5487_v27 = vld [vmem:[#allocation33_spill] sm:$0xff] }
 0x4ae   : > { %v1818_v52 = vadd.f32 %v1816_v63, %v1802_v54  ;;  %v1819_v42 = vadd.f32 %v1817_v43, %v1803_v35  ;;  %2216 = vrot.lane.b32.xlu1 %v4355_v59, %s3107_s6 }
 0x4b0   : > { %v1823_v60 = vpop.permute.xlu1 %1822 }
 0x4b1   : > { %v1824_v40 = vsel %vm663_vm4, %v1821_v23, %v1823_v60  ;;  %v1825_v15 = vsel %vm663_vm4, %v1823_v60, %v1821_v23  ;;  %vm1902_vm4 = vcmp.lt.s32.totalorder %v3687_v5, 115  ;;  %v1939_v23 = vrot.slane %v1927_v53, %v3693_v10 }
 0x4b2   : > { %v1826_v33 = vmul.f32 %v1824_v40, %v5482_v56  ;;  %v1827_v50 = vmul.f32 %v1825_v15, %v5483_v36  ;;  %2218 = vrot.lane.b32.xlu1 %v4359_v30, %s3107_s6  ;;  %s2942_s6 = scalar_lea.vmem %s5128_s7, 512 }
 0x4b3   : > { %p2943_p4 = scmp.ne.s32.totalorder %s5128_s7, %s2942_s6 }
 0x4b4   : > { %v1832_v49 = vmul.f32 %v5484_v51, %v1826_v33  ;;  %v1833_v1 = vmul.f32 %v5484_v51, %v1827_v50  ;;  %v1839_v34 = vpop.permute.xlu1 %1838  ;;  %v5488_v33 = vld [vmem:[#allocation40_spill] sm:$0xff] }
 0x4b5   : > { %p2944_p6 = pnand %p2943_p4, %p3236_p12 }
 0x4b6   : > { %v1834_v13 = vadd.f32 %v1832_v49, %v1818_v52  ;;  %v1835_v25 = vadd.f32 %v1833_v1, %v1819_v42  ;;  %2246 = vrot.lane.b32.xlu1 %v4355_v59, %s3108_s13  ;;  %v1943_v52 = vrot.slane %v1927_v53, %v3695_v3  ;;  %v4937_v1 = vpop.permute.xlu0 %2177 }
 0x4b7   : > { %p2945_p8 = pneg %p2944_p6 }
 0x4b8   : > { %v1841_v57 = vpop.permute.xlu1 %1840 }
 0x4b9   : > { %v1843_v39 = vsel %vm1842_vm2, %v1839_v34, %v1841_v57  ;;  %v1844_v38 = vsel %vm1842_vm2, %v1841_v57, %v1839_v34  ;;  %v5490_v57 = vld [vmem:[#allocation60_spill] sm:$0xff]  ;;  %vm2370_vm2 = vcmp.lt.s32.totalorder %v3687_v5, 80 }
 0x4ba   : > { %v1856_v18 = vmul.f32 %v1849_v14, %v1843_v39  ;;  %v1857_v44 = vmul.f32 %v1853_v32, %v1844_v38  ;;  %2248 = vrot.lane.b32.xlu1 %v4359_v30, %s3108_s13  ;;  %v5489_v14 = vld [vmem:[#allocation59_spill] sm:$0xff]  ;;  %v5491_v38 = vld [vmem:[#allocation36_spill] sm:$0xff]  ;;  %s3115_s13 = smov [#allocation7]  }
 0x4bc   : > { %v1862_v8 = vmul.f32 %v5485_v0, %v1856_v18  ;;  %v1863_v9 = vmul.f32 %v5485_v0, %v1857_v44  ;;  %v1869_v11 = vpop.permute.xlu1 %1868  ;;  %v4948_v0 = vpop.permute.xlu0 %2207 }
 0x4be   : > { %v1864_v21 = vadd.f32 %v1862_v8, %v1834_v13  ;;  %v1865_v29 = vadd.f32 %v1863_v9, %v1835_v25  ;;  %2276 = vrot.lane.b32.xlu1 %v4355_v59, %s3109_s25 }
 0x4c0   : > { %v1871_v47 = vpop.permute.xlu1 %1870 }
 0x4c1   : > { %v1873_v20 = vsel %vm1872_vm3, %v1869_v11, %v1871_v47  ;;  %v1874_v19 = vsel %vm1872_vm3, %v1871_v47, %v1869_v11  ;;  %v5493_v47 = vld [vmem:[#allocation62_spill] sm:$0xff]  ;;  %vm2400_vm3 = vcmp.lt.s32.totalorder %v3687_v5, 79 }
 0x4c2   : > { %v1886_v2 = vmul.f32 %v1879_v22, %v1873_v20  ;;  %v1887_v28 = vmul.f32 %v1883_v31, %v1874_v19  ;;  %2278 = vrot.lane.b32.xlu1 %v4359_v30, %s3109_s25  ;;  %v5492_v22 = vld [vmem:[#allocation61_spill] sm:$0xff]  ;;  %v1989_v19 = vpop.permute.xlu0 %1988  ;;  %s2946_s25 = sshll.u32 %s3115_s13, 4  ;;  %s2947_s25 = int_to_ptr.vmem [resolvable:$false] %s2946_s25 }
 0x4c3   : > { %p2949_p10 = scmp.lt.s32.totalorder %s5128_s7, %s2947_s25 }
 0x4c4   : > { %v1892_v4 = vmul.f32 %v5486_v37, %v1886_v2  ;;  %v1893_v55 = vmul.f32 %v5486_v37, %v1887_v28  ;;  %v1899_v58 = vpop.permute.xlu1 %1898  ;;  %v5494_v2 = vld [vmem:[#allocation34_spill] sm:$0xff] }
 0x4c6   : > { %v1894_v6 = vadd.f32 %v1892_v4, %v1864_v21  ;;  %v1895_v16 = vadd.f32 %v1893_v55, %v1865_v29  ;;  %2306 = vrot.lane.b32.xlu1 %v4355_v59, %s3110_s14 }
 0x4c8   : > { %v1901_v41 = vpop.permute.xlu1 %1900 }
 0x4c9   : > { %v1903_v46 = vsel %vm1902_vm4, %v1899_v58, %v1901_v41  ;;  %v1904_v12 = vsel %vm1902_vm4, %v1901_v41, %v1899_v58  ;;  %vm2430_vm4 = vcmp.lt.s32.totalorder %v3687_v5, 78 }
 0x4ca   : > { %v1916_v45 = vmul.f32 %v1909_v26, %v1903_v46  ;;  %v1917_v17 = vmul.f32 %v1913_v48, %v1904_v12  ;;  %2308 = vrot.lane.b32.xlu1 %v4359_v30, %s3110_s14  ;;  %v5496_v48 = vld [vmem:[#allocation64_spill] sm:$0xff]  ;;  %v2005_v46 = vld [vmem:[#allocation5 + $0x40] ss:$8 sm:$0x3] }
 0x4cb   : > { %v5497_v12 = vld [vmem:[#allocation12_spill] sm:$0xff] }
 0x4cc   : > { %v1922_v54 = vmul.f32 %v5487_v27, %v1916_v45  ;;  %v1923_v35 = vmul.f32 %v5487_v27, %v1917_v17  ;;  %v1929_v62 = vpop.permute.xlu1 %1928 }
 0x4ce   : > { %v1924_v63 = vadd.f32 %v1922_v54, %v1894_v6  ;;  %v1925_v43 = vadd.f32 %v1923_v35, %v1895_v16  ;;  %2336 = vrot.lane.b32.xlu1 %v4355_v59, %s3111_s21  ;;  %v5495_v16 = vld [vmem:[#allocation63_spill] sm:$0xff]  ;;  %v2017_v35 = vrot.slane %v2005_v46, %v3693_v10 }
 0x4d0   : > { %v1931_v42 = vpop.permute.xlu1 %1930 }
 0x4d1   : > { %v1933_v60 = vsel %vm1932_vm12, %v1929_v62, %v1931_v42  ;;  %v1934_v40 = vsel %vm1932_vm12, %v1931_v42, %v1929_v62  ;;  %v2021_v62 = vrot.slane %v2005_v46, %v3695_v3  ;;  %v2035_v42 = vld [vmem:[#allocation5 + $0x41] ss:$8 sm:$0x3]  ;;  %vm2460_vm12 = vcmp.lt.s32.totalorder %v3687_v5, 77 }
 0x4d2   : > { %v1946_v15 = vmul.f32 %v1939_v23, %v1933_v60  ;;  %v1947_v56 = vmul.f32 %v1943_v52, %v1934_v40  ;;  %2338 = vrot.lane.b32.xlu1 %v4359_v30, %s3111_s21  ;;  %v5498_v60 = vld [vmem:[#allocation20_spill] sm:$0xff] }
 0x4d4   : > { %v1952_v36 = vmul.f32 %v5488_v33, %v1946_v15  ;;  %v1953_v50 = vmul.f32 %v5488_v33, %v1947_v56  ;;  %v1957_v7 = vpop.permute.xlu1 %1956 }
 0x4d6   : > { %v1954_v51 = vadd.f32 %v1952_v36, %v1924_v63  ;;  %v1955_v49 = vadd.f32 %v1953_v50, %v1925_v43  ;;  %2366 = vrot.lane.b32.xlu1 %v4355_v59, %s3112_s5  ;;  %v2047_v50 = vrot.slane %v2035_v42, %v3693_v10 }
 0x4d8   : > { %v1959_v34 = vpop.permute.xlu1 %1958 }
 0x4d9   : > { %v1960_v13 = vsel %vm741_vm5, %v1957_v7, %v1959_v34  ;;  %v1961_v25 = vsel %vm741_vm5, %v1959_v34, %v1957_v7  ;;  %vm2010_vm5 = vcmp.lt.s32.totalorder %v3687_v5, 110  ;;  %v2051_v7 = vrot.slane %v2035_v42, %v3695_v3 }
 0x4da   : > { %v1962_v32 = vmul.f32 %v1960_v13, %v5489_v14  ;;  %v1963_v39 = vmul.f32 %v1961_v25, %v5490_v57  ;;  %2368 = vrot.lane.b32.xlu1 %v4359_v30, %s3112_s5  ;;  %v5499_v14 = vld [vmem:[#allocation37_spill] sm:$0xff] }
 0x4dc   : > { %v1968_v18 = vmul.f32 %v5491_v38, %v1962_v32  ;;  %v1969_v44 = vmul.f32 %v5491_v38, %v1963_v39  ;;  %v1973_v61 = vpop.permute.xlu1 %1972 }
 0x4de   : > { %v1970_v8 = vadd.f32 %v1968_v18, %v1954_v51  ;;  %v1971_v9 = vadd.f32 %v1969_v44, %v1955_v49  ;;  %2396 = vrot.lane.b32.xlu1 %v4355_v59, %s3113_s23 }
 0x4e0   : > { %v1975_v11 = vpop.permute.xlu1 %1974 }
 0x4e1   : > { %v1976_v21 = vsel %vm819_vm6, %v1973_v61, %v1975_v11  ;;  %v1977_v29 = vsel %vm819_vm6, %v1975_v11, %v1973_v61  ;;  %vm2040_vm6 = vcmp.lt.s32.totalorder %v3687_v5, 109 }
 0x4e2   : > { %v1978_v31 = vmul.f32 %v1976_v21, %v5492_v22  ;;  %v1979_v20 = vmul.f32 %v1977_v29, %v5493_v47  ;;  %2398 = vrot.lane.b32.xlu1 %v4359_v30, %s3113_s23  ;;  %v2095_v22 = vld [vmem:[#allocation5 + $0x43] ss:$8 sm:$0x3] }
 0x4e4   : > { %v1984_v28 = vmul.f32 %v5494_v2, %v1978_v31  ;;  %v1985_v24 = vmul.f32 %v5494_v2, %v1979_v20  ;;  %v1991_v37 = vpop.permute.xlu1 %1990  ;;  %v5500_v31 = vld [vmem:[#allocation35_spill] sm:$0xff] }
 0x4e5   : > { %v1992_v4 = vsel %vm897_vm7, %v1989_v19, %v1991_v37  ;;  %v1993_v55 = vsel %vm897_vm7, %v1991_v37, %v1989_v19  ;;  %vm2070_vm7 = vcmp.lt.s32.totalorder %v3687_v5, 99  ;;  %v2111_v37 = vrot.slane %v2095_v22, %v3695_v3 }
 0x4e6   : > { %v1986_v58 = vadd.f32 %v1984_v28, %v1970_v8  ;;  %v1987_v6 = vadd.f32 %v1985_v24, %v1971_v9  ;;  %v1994_v26 = vmul.f32 %v1992_v4, %v5495_v16  ;;  %v1995_v41 = vmul.f32 %v1993_v55, %v5496_v48  ;;  %2426 = vrot.lane.b32.xlu1 %v4355_v59, %s3114_s12  ;;  %v5501_v48 = vld [vmem:[#allocation38_spill] sm:$0xff] }
 0x4e7   : > { %v2107_v24 = vrot.slane %v2095_v22, %v3693_v10 }
 0x4e8   : > { %v2000_v45 = vmul.f32 %v5497_v12, %v1994_v26  ;;  %v2001_v17 = vmul.f32 %v5497_v12, %v1995_v41  ;;  %v2007_v53 = vpop.permute.xlu1 %2006  ;;  %v2125_v26 = vld [vmem:[#allocation5 + $0x44] ss:$8 sm:$0x3] }
 0x4ea   : > { %v2002_v27 = vadd.f32 %v2000_v45, %v1986_v58  ;;  %v2003_v54 = vadd.f32 %v2001_v17, %v1987_v6  ;;  %2428 = vrot.lane.b32.xlu1 %v4359_v30, %s3114_s12 }
 0x4ec   : > { %v2009_v63 = vpop.permute.xlu1 %2008 }
 0x4ed   : > { %v2011_v43 = vsel %vm2010_vm5, %v2007_v53, %v2009_v63  ;;  %v2012_v23 = vsel %vm2010_vm5, %v2009_v63, %v2007_v53  ;;  %v2137_v53 = vrot.slane %v2125_v26, %v3693_v10  ;;  %vm2484_vm5 = vcmask 1041408  }
 0x4ee   : > { %v2024_v59 = vmul.f32 %v2017_v35, %v2011_v43  ;;  %v2025_v52 = vmul.f32 %v2021_v62, %v2012_v23  ;;  %2458 = vrot.lane.b32.xlu1 %v4359_v30, %s3084_s9  ;;  %v2065_v30 = vld [vmem:[#allocation5 + $0x42] ss:$8 sm:$0x3]  ;;  %s2633_s9 = sshll.u32 %s3163_s19, 9 }
 0x4ef   : > { %v2077_v44 = vrot.slane %v2065_v30, %v3693_v10  ;;  %v2081_v61 = vrot.slane %v2065_v30, %v3695_v3  ;;  %v5502_v23 = vld [vmem:[#allocation53_spill] sm:$0xff]  ;;  %s5124_s19 = scalar_lea.hbm %s5177_s4, %s2633_s9 }
 0x4f0   : > { %v2030_v40 = vmul.f32 %v5498_v60, %v2024_v59  ;;  %v2031_v15 = vmul.f32 %v5498_v60, %v2025_v52  ;;  %v2037_v56 = vpop.permute.xlu1 %2036 }
 0x4f2   : > { %v2032_v33 = vadd.f32 %v2030_v40, %v2002_v27  ;;  %v2033_v36 = vadd.f32 %v2031_v15, %v2003_v54  ;;  %v2141_v27 = vrot.slane %v2125_v26, %v3695_v3 }
 0x4f4   : > { %v2039_v51 = vpop.permute.xlu1 %2038 }
 0x4f5   : > { %v2041_v49 = vsel %vm2040_vm6, %v2037_v56, %v2039_v51  ;;  %v2042_v34 = vsel %vm2040_vm6, %v2039_v51, %v2037_v56  ;;  %v5001_v51 = vpop.permute.xlu0 %2237 }
 0x4f6   : > { %v2054_v13 = vmul.f32 %v2047_v50, %v2041_v49  ;;  %v2055_v25 = vmul.f32 %v2051_v7, %v2042_v34 }
 0x4f8   : > { %v2060_v32 = vmul.f32 %v5499_v14, %v2054_v13  ;;  %v2061_v57 = vmul.f32 %v5499_v14, %v2055_v25  ;;  %v2067_v39 = vpop.permute.xlu1 %2066 }
 0x4f9   : > { %v5003_v34 = vpop.permute.xlu0 %2267 }
 0x4fa   : > { %v2062_v38 = vadd.f32 %v2060_v32, %v2032_v33  ;;  %v2063_v18 = vadd.f32 %v2061_v57, %v2033_v36 }
 0x4fc   : > { %v2069_v8 = vpop.permute.xlu1 %2068 }
 0x4fd   : > { %v2071_v9 = vsel %vm2070_vm7, %v2067_v39, %v2069_v8  ;;  %v2072_v11 = vsel %vm2070_vm7, %v2069_v8, %v2067_v39  ;;  %v5005_v30 = vpop.permute.xlu0 %2297  ;;  %v2155_v39 = vld [vmem:[#allocation5 + $0x45] ss:$8 sm:$0x3]  ;;  %v2185_v8 = vld [vmem:[#allocation5 + $0x46] ss:$8 sm:$0x3] }
 0x4fe   : > { %v2084_v21 = vmul.f32 %v2077_v44, %v2071_v9  ;;  %v2085_v29 = vmul.f32 %v2081_v61, %v2072_v11  ;;  %v2167_v44 = vrot.slane %v2155_v39, %v3693_v10  ;;  %v2171_v61 = vrot.slane %v2155_v39, %v3695_v3  ;;  %v2365_v39 = vld [vmem:[#allocation5 + $0x54] ss:$8 sm:$0x3] }
 0x4ff   : > { %v2197_v22 = vrot.slane %v2185_v8, %v3693_v10 }
 0x500   : > { %v2090_v47 = vmul.f32 %v5500_v31, %v2084_v21  ;;  %v2091_v20 = vmul.f32 %v5500_v31, %v2085_v29  ;;  %v2097_v19 = vpop.permute.xlu1 %2096  ;;  %v2215_v21 = vld [vmem:[#allocation5 + $0x47] ss:$8 sm:$0x3]  ;;  %v2201_v31 = vrot.slane %v2185_v8, %v3695_v3 }
 0x501   : > { %v5009_v32 = vpop.permute.xlu0 %2327 }
 0x502   : > { %v2092_v2 = vadd.f32 %v2090_v47, %v2062_v38  ;;  %v2093_v28 = vadd.f32 %v2091_v20, %v2063_v18  ;;  %v2245_v47 = vld [vmem:[#allocation5 + $0x50] ss:$8 sm:$0x3] }
 0x504   : > { %v2099_v4 = vpop.permute.xlu1 %2098 }
 0x505   : > { %v2101_v55 = vsel %vm2100_vm13, %v2097_v19, %v2099_v4  ;;  %v2102_v58 = vsel %vm2100_vm13, %v2099_v4, %v2097_v19  ;;  %v5016_v18 = vpop.permute.xlu0 %2357  ;;  %v2275_v4 = vld [vmem:[#allocation5 + $0x51] ss:$8 sm:$0x3] }
 0x506   : > { %v2114_v6 = vmul.f32 %v2107_v24, %v2101_v55  ;;  %v2115_v16 = vmul.f32 %v2111_v37, %v2102_v58  ;;  %v2227_v24 = vrot.slane %v2215_v21, %v3693_v10  ;;  %v2231_v37 = vrot.slane %v2215_v21, %v3695_v3 }
 0x508   : > { %v2120_v41 = vmul.f32 %v5501_v48, %v2114_v6  ;;  %v2121_v46 = vmul.f32 %v5501_v48, %v2115_v16  ;;  %v2127_v12 = vpop.permute.xlu1 %2126  ;;  %v2257_v16 = vrot.slane %v2245_v47, %v3693_v10 }
 0x509   : > { %v5028_v55 = vpop.permute.xlu0 %2387 }
 0x50a   : > { %v2122_v45 = vadd.f32 %v2120_v41, %v2092_v2  ;;  %v2123_v17 = vadd.f32 %v2121_v46, %v2093_v28  ;;  %v2261_v46 = vrot.slane %v2245_v47, %v3695_v3 }
 0x50c   : > { %v2129_v54 = vpop.permute.xlu1 %2128 }
 0x50d   : > { %v2131_v35 = vsel %vm2130_vm14, %v2127_v12, %v2129_v54  ;;  %v2132_v62 = vsel %vm2130_vm14, %v2129_v54, %v2127_v12  ;;  %v2305_v12 = vld [vmem:[#allocation5 + $0x52] ss:$8 sm:$0x3] }
 0x50e   : > { %v2144_v63 = vmul.f32 %v2137_v53, %v2131_v35  ;;  %v2145_v43 = vmul.f32 %v2141_v27, %v2132_v62  ;;  %v2287_v53 = vrot.slane %v2275_v4, %v3693_v10  ;;  %v2291_v27 = vrot.slane %v2275_v4, %v3695_v3 }
 0x510   : > { %v2150_v59 = vmul.f32 %v5502_v23, %v2144_v63  ;;  %v2151_v52 = vmul.f32 %v5502_v23, %v2145_v43  ;;  %v2157_v42 = vpop.permute.xlu1 %2156  ;;  %v2335_v43 = vld [vmem:[#allocation5 + $0x53] ss:$8 sm:$0x3]  ;;  %v2317_v23 = vrot.slane %v2305_v12, %v3693_v10 }
 0x512   : > { %v4997_v60 = vadd.f32 %v2150_v59, %v2122_v45  ;;  %v4999_v40 = vadd.f32 %v2151_v52, %v2123_v17  ;;  %v2321_v59 = vrot.slane %v2305_v12, %v3695_v3 }
 0x514   : > { %v2159_v15 = vpop.permute.xlu1 %2158 }
 0x515   : > { %v2161_v9 = vsel %vm2160_vm15, %v2157_v42, %v2159_v15  ;;  %v2162_v11 = vsel %vm2160_vm15, %v2159_v15, %v2157_v42 }
 0x516   : > { %v2174_v20 = vmul.f32 %v2167_v44, %v2161_v9  ;;  %v2175_v19 = vmul.f32 %v2171_v61, %v2162_v11 }
 0x518   : > { %v2187_v56 = vpop.permute.xlu1 %2186  ;;  %v2180_v45 = vmul.f32 %v4937_v1, %v2174_v20  ;;  %v2181_v17 = vmul.f32 %v4937_v1, %v2175_v19  ;;  %v2381_v19 = vrot.slane %v2365_v39, %v3695_v3 }
 0x51a   : > { %v2182_v44 = vadd.f32 %v2180_v45, %v4997_v60  ;;  %v2183_v61 = vadd.f32 %v2181_v17, %v4999_v40  ;;  %v2377_v40 = vrot.slane %v2365_v39, %v3693_v10 }
 0x51c   : > { %v2189_v33 = vpop.permute.xlu1 %2188 }
 0x51d   : > { %v2191_v2 = vsel %vm2190_vm8, %v2187_v56, %v2189_v33  ;;  %v2192_v28 = vsel %vm2190_vm8, %v2189_v33, %v2187_v56  ;;  %v5048_v33 = vpop.permute.xlu0 %2417 }
 0x51e   : > { %v2204_v48 = vmul.f32 %v2197_v22, %v2191_v2  ;;  %v2205_v41 = vmul.f32 %v2201_v31, %v2192_v28  ;;  %v2395_v2 = vld [vmem:[#allocation5 + $0x55] ss:$8 sm:$0x3] }
 0x51f   : > { %v2411_v12 = vrot.slane %v2395_v2, %v3695_v3 }
 0x520   : > { %v2217_v36 = vpop.permute.xlu1 %2216  ;;  %v2210_v1 = vmul.f32 %v4948_v0, %v2204_v48  ;;  %v2211_v42 = vmul.f32 %v4948_v0, %v2205_v41 }
 0x521   : > { %v2448_v28 = vpop.permute.xlu0 %2447 }
 0x522   : > { %v2212_v60 = vadd.f32 %v2210_v1, %v2182_v44  ;;  %v2213_v22 = vadd.f32 %v2211_v42, %v2183_v61 }
 0x524   : > { %v2219_v50 = vpop.permute.xlu1 %2218 }
 0x525   : > { %v2221_v58 = vsel %vm2220_vm9, %v2217_v36, %v2219_v50  ;;  %v2222_v6 = vsel %vm2220_vm9, %v2219_v50, %v2217_v36 }
 0x526   : > { %v2234_v54 = vmul.f32 %v2227_v24, %v2221_v58  ;;  %v2235_v35 = vmul.f32 %v2231_v37, %v2222_v6 }
 0x528   : > { %v2247_v7 = vpop.permute.xlu1 %2246  ;;  %v2240_v0 = vmul.f32 %v5001_v51, %v2234_v54  ;;  %v2241_v8 = vmul.f32 %v5001_v51, %v2235_v35 }
 0x52a   : > { %v2242_v24 = vadd.f32 %v2240_v0, %v2212_v60 }
 0x52c   : > { %v2249_v49 = vpop.permute.xlu1 %2248 }
 0x52d   : > { %v2251_v62 = vsel %vm2250_vm10, %v2247_v7, %v2249_v49  ;;  %v2252_v63 = vsel %vm2250_vm10, %v2249_v49, %v2247_v7  ;;  %v2347_v7 = vrot.slane %v2335_v43, %v3693_v10  ;;  %v2351_v49 = vrot.slane %v2335_v43, %v3695_v3 }
 0x52e   : > { %v2264_v36 = vmul.f32 %v2257_v16, %v2251_v62  ;;  %v2265_v50 = vmul.f32 %v2261_v46, %v2252_v63  ;;  %v2407_v46 = vrot.slane %v2395_v2, %v3693_v10 }
 0x530   : > { %v2277_v13 = vpop.permute.xlu1 %2276  ;;  %v2270_v51 = vmul.f32 %v5003_v34, %v2264_v36  ;;  %v2271_v31 = vmul.f32 %v5003_v34, %v2265_v50  ;;  %v2243_v34 = vadd.f32 %v2241_v8, %v2213_v22 }
 0x532   : > { %v2272_v48 = vadd.f32 %v2270_v51, %v2242_v24  ;;  %v2273_v41 = vadd.f32 %v2271_v31, %v2243_v34 }
 0x534   : > { %v2279_v25 = vpop.permute.xlu1 %2278 }
 0x535   : > { %v2281_v15 = vsel %vm2280_vm11, %v2277_v13, %v2279_v25  ;;  %v2282_v56 = vsel %vm2280_vm11, %v2279_v25, %v2277_v13 }
 0x536   : > { %v2294_v9 = vmul.f32 %v2287_v53, %v2281_v15  ;;  %v2295_v11 = vmul.f32 %v2291_v27, %v2282_v56  ;;  %v2425_v27 = vld [vmem:[#allocation5 + $0x56] ss:$8 sm:$0x3] }
 0x537   : > { %v2437_v42 = vrot.slane %v2425_v27, %v3693_v10  ;;  %v2441_v15 = vrot.slane %v2425_v27, %v3695_v3 }
 0x538   : > { %v5007_v14 = vpop.permute.xlu1 %2306  ;;  %v2300_v37 = vmul.f32 %v5005_v30, %v2294_v9  ;;  %v2301_v4 = vmul.f32 %v5005_v30, %v2295_v11 }
 0x53a   : > { %v2302_v62 = vadd.f32 %v2300_v37, %v2272_v48  ;;  %v2303_v63 = vadd.f32 %v2301_v4, %v2273_v41 }
 0x53c   : > { %v5011_v57 = vpop.permute.xlu1 %2308 }
 0x53d   : > { %v2311_v13 = vsel %vm2310_vm0, %v5007_v14, %v5011_v57  ;;  %v2312_v25 = vsel %vm2310_vm0, %v5011_v57, %v5007_v14 }
 0x53e   : > { %v2324_v57 = vmul.f32 %v2317_v23, %v2311_v13  ;;  %v2325_v20 = vmul.f32 %v2321_v59, %v2312_v25  ;;  %v2455_v59 = vld [vmem:[#allocation5 + $0x57] ss:$8 sm:$0x3] }
 0x53f   : > { %v2467_v39 = vrot.slane %v2455_v59, %v3693_v10 }
 0x540   : > { %v5014_v38 = vpop.permute.xlu1 %2336  ;;  %v2330_v45 = vmul.f32 %v5009_v32, %v2324_v57  ;;  %v2331_v17 = vmul.f32 %v5009_v32, %v2325_v20  ;;  %v2478_v32 = vpop.permute.xlu0 %2477 }
 0x542   : > { %v2332_v56 = vadd.f32 %v2330_v45, %v2302_v62  ;;  %v2333_v36 = vadd.f32 %v2331_v17, %v2303_v63  ;;  %v5503_v63 = vld [vmem:[#allocation13_spill] sm:$0xff] }
 0x544   : > { %v5021_v29 = vpop.permute.xlu1 %2338 }
 0x545   : > { %v2341_v47 = vsel %vm2340_vm1, %v5014_v38, %v5021_v29  ;;  %v2342_v14 = vsel %vm2340_vm1, %v5021_v29, %v5014_v38 }
 0x546   : > { %v2354_v6 = vmul.f32 %v2347_v7, %v2341_v47  ;;  %v2355_v16 = vmul.f32 %v2351_v49, %v2342_v14 }
 0x548   : > { %v2367_v26 = vpop.permute.xlu1 %2366  ;;  %v2360_v43 = vmul.f32 %v5016_v18, %v2354_v6  ;;  %v2361_v23 = vmul.f32 %v5016_v18, %v2355_v16  ;;  %v2471_v18 = vrot.slane %v2455_v59, %v3695_v3 }
 0x54a   : > { %v2362_v44 = vadd.f32 %v2360_v43, %v2332_v56  ;;  %v2363_v61 = vadd.f32 %v2361_v23, %v2333_v36  ;;  %v5504_v23 = vld [vmem:[#allocation28_spill] sm:$0xff]  ;;  %v2881_v36 = vld [vmem:[%s3293_s29 + $0x10] sm:$0xff] }
 0x54c   : > { %v2369_v52 = vpop.permute.xlu1 %2368 }
 0x54d   : > { %v2371_v38 = vsel %vm2370_vm2, %v2367_v26, %v2369_v52  ;;  %v2372_v29 = vsel %vm2370_vm2, %v2369_v52, %v2367_v26 }
 0x54e   : > { %v2384_v54 = vmul.f32 %v2377_v40, %v2371_v38  ;;  %v2385_v35 = vmul.f32 %v2381_v19, %v2372_v29 }
 0x550   : > { %v2397_v21 = vpop.permute.xlu1 %2396  ;;  %v2390_v50 = vmul.f32 %v5028_v55, %v2384_v54  ;;  %v2391_v7 = vmul.f32 %v5028_v55, %v2385_v35  ;;  %v2457_v55 = vpop.permute.xlu0 %2456 }
 0x552   : > { %v2393_v60 = vadd.f32 %v2391_v7, %v2363_v61  ;;  %v2882_v7 = vld [vmem:[%s3293_s29 + $0x8] sm:$0xff] }
 0x554   : > { %v2399_v58 = vpop.permute.xlu1 %2398 }
 0x555   : > { %v2401_v30 = vsel %vm2400_vm3, %v2397_v21, %v2399_v58  ;;  %v2402_v53 = vsel %vm2400_vm3, %v2399_v58, %v2397_v21  ;;  %v2392_v21 = vadd.f32 %v2390_v50, %v2362_v44 }
 0x556   : > { %v2414_v52 = vmul.f32 %v2407_v46, %v2401_v30  ;;  %v2415_v1 = vmul.f32 %v2411_v12, %v2402_v53 }
 0x558   : > { %v2427_v26 = vpop.permute.xlu1 %2426  ;;  %v2420_v9 = vmul.f32 %v5048_v33, %v2414_v52  ;;  %v2421_v11 = vmul.f32 %v5048_v33, %v2415_v1  ;;  %v5506_v1 = vld [vmem:[#allocation24_spill] sm:$0xff] }
 0x55a   : > { %v2422_v31 = vadd.f32 %v2420_v9, %v2392_v21  ;;  %v2423_v47 = vadd.f32 %v2421_v11, %v2393_v60 }
 0x55c   : > { %v2429_v49 = vpop.permute.xlu1 %2428 }
 0x55d   : > { %v2431_v0 = vsel %vm2430_vm4, %v2427_v26, %v2429_v49  ;;  %v2432_v8 = vsel %vm2430_vm4, %v2429_v49, %v2427_v26 }
 0x55e   : > { %v2444_v13 = vmul.f32 %v2437_v42, %v2431_v0  ;;  %v2445_v25 = vmul.f32 %v2441_v15, %v2432_v8  ;;  %v2880_v15 = vld [vmem:[%s3293_s29] sm:$0xff] }
 0x560   : > { %v2450_v10 = vmul.f32 %v2448_v28, %v2444_v13  ;;  %v2451_v22 = vmul.f32 %v2448_v28, %v2445_v25  ;;  %v2459_v3 = vpop.permute.xlu1 %2458 }
 0x561   : > { %v2461_v40 = vsel %vm2460_vm12, %v2457_v55, %v2459_v3  ;;  %v2462_v51 = vsel %vm2460_vm12, %v2459_v3, %v2457_v55 }
 0x562   : > { %v2474_v14 = vmul.f32 %v2467_v39, %v2461_v40  ;;  %v2475_v57 = vmul.f32 %v2471_v18, %v2462_v51  ;;  %v2452_v20 = vadd.f32 %v2450_v10, %v2422_v31  ;;  %v2453_v33 = vadd.f32 %v2451_v22, %v2423_v47  ;;  %v2883_v39 = vld [vmem:[%s3293_s29 + $0x18] sm:$0xff]  ;;  %s2948_s29 = scalar_lea.vmem %s2947_s25, 1024 }
 0x563   : > { %p2950_p13 = scmp.lt.s32.totalorder %s2948_s29, %s2942_s6 }
 0x564   : > { %v2480_v19 = vmul.f32 %v2478_v32, %v2474_v14  ;;  %v2481_v2 = vmul.f32 %v2478_v32, %v2475_v57  ;;  %v5505_v32 = vld [vmem:[#allocation29_spill] sm:$0xff] }
 0x565   : > { %p2951_p3 = por %p2950_p13, %p2949_p10 }
 0x566   : > { %v2482_v24 = vadd.f32 %v2480_v19, %v2452_v20  ;;  %v2483_v34 = vadd.f32 %v2481_v2, %v2453_v33 }
 0x567   : > { %p2952_p7 = pnand %p2951_p3, %p2945_p8 }
 0x568   : > { %v2485_v37 = vsel %vm2484_vm5, %v2482_v24, 0.0  ;;  %v2492_v28 = vsel %vm2484_vm5, %v2483_v34, 0.0 }
 0x569   : > { %v2486_v4 = vrot.slane %v2485_v37, 4  ;;  %v2493_v58 = vrot.slane %v2492_v28, 4 }
 0x56b   : > { %v2487_v6 = vadd.f32 %v2486_v4, %v2485_v37  ;;  %v2494_v16 = vadd.f32 %v2493_v58, %v2492_v28 }
 0x56d   : > { %v2488_v38 = vrot.slane %v2487_v6, 2  ;;  %v2495_v5 = vrot.slane %v2494_v16, 2 }
 0x56f   : > { %v2489_v29 = vadd.f32 %v2488_v38, %v2487_v6  ;;  %v2496_v48 = vadd.f32 %v2495_v5, %v2494_v16 }
 0x571   : > { %v2490_v41 = vrot.slane %v2489_v29, 1  ;;  %v2497_v46 = vrot.slane %v2496_v48, 1 }
 0x573   : > { %v2491_v12 = vadd.f32 %v2490_v41, %v2489_v29  ;;  %v2498_v45 = vadd.f32 %v2497_v46, %v2496_v48 }
 0x575   : > { %v2499_v17 = vmul.f32 0.5, %v2491_v12  ;;  %v2500_v30 = vmul.f32 0.5, %v2498_v45 }
 0x577   : > { %2872 = vtanh.f32 %v2499_v17 }
 0x578   : > { %2874 = vtanh.f32 %v2500_v30 }
 0x581   : > { %v2873_v53 = vpop.eup %2872 }
 0x582   : > { %v2875_v27 = vpop.eup %2874  ;;  %v2503_v54 = vadd.f32 1.0, %v2873_v53 }
 0x583   : > { %v2504_v35 = vadd.f32 1.0, %v2875_v27 }
 0x584   : > { %v2505_v26 = vmul.f32 0.5, %v2503_v54 }
 0x585   : > { %v2506_v62 = vmul.f32 0.5, %v2504_v35 }
 0x586   : > { %v2507_v43 = vmul.f32 %v2505_v26, %v5503_v63  ;;  %v2509_v59 = vmul.f32 %v2505_v26, %v5504_v23 }
 0x587   : > { %v2508_v52 = vmul.f32 %v2506_v62, %v5505_v32  ;;  %v2510_v42 = vmul.f32 %v2506_v62, %v5506_v1 }
 0x588   : > { %v2511_v56 = vadd.f32 %v2880_v15, %v2507_v43  ;;  %v2513_v50 = vadd.f32 %v2881_v36, %v2509_v59 }
 0x589   : > { %v2512_v49 = vadd.f32 %v2882_v7, %v2508_v52  ;;  %v2514_v18 = vadd.f32 %v2883_v39, %v2510_v42 }
 0x58a   : > { %2515 = vst [vmem:[%s230_s28] sm:$0xff] %v2511_v56  ;;  %2517 = vst [vmem:[%s230_s28 + $0x10] sm:$0xff] %v2513_v50 }
 0x58b   : > { %2516 = vst [vmem:[%s230_s28 + $0x8] sm:$0xff] %v2512_v49  ;;  %2518 = vst [vmem:[%s230_s28 + $0x18] sm:$0xff] %v2514_v18 }
 0x58c   : > { %2955 = shalt.err (!%p2952_p7)
}
 0x58d   : > { %s2956_s14 = scalar_lea.hbm %s5124_s19, 512  ;;  %s2960_s23 = scalar_lea.hbm %s5177_s4, 1024 }
 0x58e   : > { %p2957_p9 = scmp.ne.s32.totalorder %s5124_s19, %s2956_s14  ;;  %p2961_p5 = scmp.lt.u32.totalorder %s5124_s19, %s5177_s4 }
 0x58f   : > { %p2962_p11 = scmp.lt.u32.totalorder %s2960_s23, %s2956_s14  ;;  %p2964_p4 = scmp.lt.u32.totalorder %s2956_s14, %s5124_s19 }
 0x590   : > { %p2958_p1 = pnand %p2957_p9, %p3236_p12 }
 0x591   : > { %p2963_p2 = por %p2962_p11, %p2961_p5 }
 0x592   : > { %p2959_p0 = pneg %p2958_p1 }
 0x593   : > { %p2965_p6 = por %p2964_p4, %p2963_p2 }
 0x595   : > { %p2966_p8 = pnand %p2965_p6, %p2959_p0 }
 0x597   : > { %2969 = shalt.err (!%p2966_p8)
}
 0x598   : > { %s3116_s28 = smov 256  }
 0x599   : > { %2640 = dma.vmem_to_hbm [thread:$0]  (%p3236_p12), %s5128_s7, 512, %s5124_s19, %s2520_s20, %s3116_s28, %s3116_s28, %s3027_s26  }
 0x59a PF: > { %s2548_s10 = sand.u32 1, %s3000_s15   ;;  %p5507_p10 = scmp.ne.s32.totalorder %s5293_s22, 0 }
 0x59b   : > { %p5508_p13 = scmp.ge.s32.totalorder %s3012_s18, 2  ;;  %s2549_s8 = scalar_lea.sflag [#allocation4], %s2548_s10 }
 0x59d   : > { %p2651_p3 = pnand %p5508_p13, %p5507_p10 }
 0x59f   : > { %2995 = dma.done.wait (!%p2651_p3), %s2549_s8, 512  }
 0x5a0   : > { %2997 = vsyncadd (!%p2651_p3), %s2549_s8, 4294966784  ;;  %p18_p7 = scmp.ge.s32.totalorder %s3198_s27, 4   ;;  %s5509_s15 = smov %s3004_s16 }
 0x5a1   : > { %s5510_s16 = smov %s3008_s17  ;;  %s5511_s17 = smov %s3232_s24 }
 0x5a2   : > { %s5512_s18 = smov %s3198_s27  ;;  %20 = sbr.rel (!%p18_p7) target bundleno = 6 (0x6), region = 132 }
 0x5a9   :  { %2554 = vsyncpa [#allocation3], 1 }
 0x5aa   :  { %2556 = vsyncpa [#allocation3 + $0x1], 1 }
 0x5ab   :  { %2557 = vsyncpa [#allocation6], 1 }
 0x5ac   :  { %2558 = vsyncpa [#allocation4], 1 }
 0x5ad   :  { %2560 = vsyncpa [#allocation4 + $0x1], 1 }

</bundles_post_ra>
